<compile_context>
chip_gen: v7x
topology: tpu7x:2x2x1
jax: 0.10.0
libtpu: 0.0.40
codegen_flags: <defaults>
</compile_context>

<pallas_src>
import functools

import jax
import jax.numpy as jnp
import numpy as np
from jax.experimental import pallas as pl
from jax.experimental.pallas import tpu as pltpu

EPS = 1e-5          # nn.BatchNorm2d default eps
NEG_SLOPE = 0.2     # nn.LeakyReLU(0.2)


def _round_up(n, m):
    return (n + m - 1) // m * m


# ----------------------------------------------------------------------------
# Pallas kernel
# ----------------------------------------------------------------------------
def _conv3x3_bn_lrelu(x, wmat, gamma, beta, h_idx, w_idx, H, W):
    """Fused 3x3 conv (pad=1) + training-mode BatchNorm + LeakyReLU(0.2).

    x     : (C, P) f32, P = N*H*W flattened spatial on the lane axis.
    wmat  : (Co, 9*C) bf16 im2col weights, K ordered (ky, kx, ci).
    gamma : (Co, 1) f32, beta: (Co, 1) f32.
    h_idx : (1, P) i32 row coordinate per lane, w_idx: (1, P) i32 col coordinate.
    Returns (Co, P) f32.  Conv bias is intentionally omitted (cancelled by BN mean).
    """
    C, P = x.shape
    taps = []
    for ky in range(3):
        for kx in range(3):
            dy, dx = ky - 1, kx - 1
            off = dy * W + dx
            if off == 0:                       # center tap: no shift, no mask
                taps.append(x)
                continue
            # shifted[c, p] = x[c, p + off]  (wrap-around is masked off below)
            shifted = pltpu.roll(x, (-off) % P, axis=1)
            hv = h_idx + dy
            wv = w_idx + dx
            valid = (hv >= 0) & (hv < H) & (wv >= 0) & (wv < W)   # fused zero-pad
            taps.append(jnp.where(valid, shifted, 0.0))

    # Single im2col matmul: (Co, 9C) @ (9C, P); bf16 operands, f32 accumulation.
    patches = jnp.concatenate(taps, axis=0).astype(jnp.bfloat16)      # (9C, P)
    acc = jnp.dot(wmat, patches, preferred_element_type=jnp.float32)  # (Co, P) f32

    # BatchNorm2d training-mode batch statistics, folded to scale/shift (one
    # sum pass + one sum-of-squares pass, then a single FMA-shaped apply).
    inv_p = 1.0 / P
    mean = jnp.sum(acc, axis=1, keepdims=True) * inv_p
    ex2 = jnp.sum(acc * acc, axis=1, keepdims=True) * inv_p
    var = ex2 - mean * mean                        # biased variance (torch forward)
    scale = gamma * jax.lax.rsqrt(var + EPS)
    bn_shift = beta - scale * mean
    y = acc * scale + bn_shift
    return jnp.maximum(y, NEG_SLOPE * y)           # LeakyReLU(0.2)


def upblock_kernel(x_ref, h_ref, w_ref, w1_ref, g1_ref, be1_ref,
                   w2_ref, g2_ref, be2_ref, o_ref, *, H, W):
    h_idx = h_ref[...]                             # (1, P) i32
    w_idx = w_ref[...]                             # (1, P) i32
    y1 = _conv3x3_bn_lrelu(x_ref[...], w1_ref[...], g1_ref[...], be1_ref[...],
                           h_idx, w_idx, H, W)
    y2 = _conv3x3_bn_lrelu(y1, w2_ref[...], g2_ref[...], be2_ref[...],
                           h_idx, w_idx, H, W)
    o_ref[...] = y2                                # lane-dense (Co, P) store


# ----------------------------------------------------------------------------
# JAX glue
# ----------------------------------------------------------------------------
def upsample2x_bilinear_nchw(x):
    """NCHW bilinear x2, matches torch Upsample(scale_factor=2, align_corners=False)."""
    xp = jnp.concatenate([x[:, :, :1], x[:, :, :-1]], axis=2)
    xn = jnp.concatenate([x[:, :, 1:], x[:, :, -1:]], axis=2)
    rows = jnp.stack([0.25 * xp + 0.75 * x, 0.75 * x + 0.25 * xn], axis=3)
    xh = rows.reshape(x.shape[0], x.shape[1], 2 * x.shape[2], x.shape[3])
    yp = jnp.concatenate([xh[:, :, :, :1], xh[:, :, :, :-1]], axis=3)
    yn = jnp.concatenate([xh[:, :, :, 1:], xh[:, :, :, -1:]], axis=3)
    cols = jnp.stack([0.25 * yp + 0.75 * xh, 0.75 * xh + 0.25 * yn], axis=4)
    return cols.reshape(xh.shape[0], xh.shape[1], xh.shape[2], 2 * xh.shape[3])


def init_params(key, cin, cout):
    """Parameters in PyTorch-native layouts (Conv2d OIHW weights, per-channel BN)."""
    k1, k2, k3, k4 = jax.random.split(key, 4)
    return dict(
        w1=jax.random.normal(k1, (cout, cin, 3, 3), jnp.float32) * 0.1,
        b1=jax.random.normal(k3, (cout,), jnp.float32) * 0.1,
        g1=jnp.ones((cout,), jnp.float32), be1=jnp.zeros((cout,), jnp.float32),
        w2=jax.random.normal(k2, (cout, cout, 3, 3), jnp.float32) * 0.1,
        b2=jax.random.normal(k4, (cout,), jnp.float32) * 0.1,
        g2=jnp.ones((cout,), jnp.float32), be2=jnp.zeros((cout,), jnp.float32),
    )


@jax.jit
def upblock_forward(x_nchw, params):
    w1, w2 = params["w1"], params["w2"]
    cout, cin = w1.shape[0], w1.shape[1]

    x = upsample2x_bilinear_nchw(x_nchw.astype(jnp.float32))      # (N, Cin, H, W)
    N, _, H, W = x.shape
    P = N * H * W
    C1 = _round_up(cin, 8)       # pad channel counts to the 8-sublane f32 tile
    C2 = _round_up(cout, 8)

    # Activations: channels on sublanes, flattened (n, h, w) on lanes (lane-dense).
    x_t = jnp.transpose(x, (1, 0, 2, 3)).reshape(cin, P)
    x_t = jnp.pad(x_t, ((0, C1 - cin), (0, 0)))

    # Per-lane (h, w) coordinates for the in-kernel boundary masks.
    pos = jnp.arange(P, dtype=jnp.int32)
    w_idx = (pos % W).reshape(1, P)
    h_idx = ((pos // W) % H).reshape(1, P)

    def pack_w(w, c_in_pad, c_out_pad):          # (Co,Ci,3,3) -> (Co',9*Ci') bf16
        co, ci = w.shape[0], w.shape[1]
        w = jnp.transpose(w, (0, 2, 3, 1))                        # (Co, ky, kx, Ci)
        w = jnp.pad(w, ((0, c_out_pad - co), (0, 0), (0, 0), (0, c_in_pad - ci)))
        return w.reshape(c_out_pad, 9 * c_in_pad).astype(jnp.bfloat16)

    def pack_bn(g, b):                            # -> (Co', 1) f32
        g = jnp.pad(g, (0, C2 - g.shape[0]), constant_values=1.0)
        b = jnp.pad(b, (0, C2 - b.shape[0]))
        return g.reshape(C2, 1), b.reshape(C2, 1)

    w1m = pack_w(w1, C1, C2)
    w2m = pack_w(w2, C2, C2)
    g1, be1 = pack_bn(params["g1"], params["be1"])
    g2, be2 = pack_bn(params["g2"], params["be2"])
    # NOTE: conv biases b1/b2 are not passed to the kernel — training-mode BN's mean
    # subtraction cancels them exactly (checked against the biased f32 reference).

    vmem = pl.BlockSpec(memory_space=pltpu.MemorySpace.VMEM)
    out = pl.pallas_call(
        functools.partial(upblock_kernel, H=H, W=W),
        out_shape=jax.ShapeDtypeStruct((C2, P), jnp.float32),
        in_specs=[vmem] * 9,
        out_specs=vmem,
        compiler_params=pltpu.CompilerParams(vmem_limit_bytes=32 * 1024 * 1024),
    )(x_t, h_idx, w_idx, w1m, g1, be1, w2m, g2, be2)

    out = out[:cout].reshape(cout, N, H, W)
    return jnp.transpose(out, (1, 0, 2, 3))                       # -> NCHW


# ----------------------------------------------------------------------------
# Pure-JAX f32 reference (full torch semantics incl. conv bias)
# ----------------------------------------------------------------------------
def reference_forward(x_nchw, params):
    x = upsample2x_bilinear_nchw(x_nchw.astype(jnp.float32))

    def block(x, w, b, g, be):
        y = jax.lax.conv_general_dilated(
            x, w, (1, 1), 'SAME',
            dimension_numbers=('NCHW', 'OIHW', 'NCHW')) + b.reshape(1, -1, 1, 1)
        mu = y.mean(axis=(0, 2, 3), keepdims=True)
        var = ((y - mu) ** 2).mean(axis=(0, 2, 3), keepdims=True)  # biased
        y = g.reshape(1, -1, 1, 1) * (y - mu) * jax.lax.rsqrt(var + EPS) \
            + be.reshape(1, -1, 1, 1)
        return jnp.where(y > 0, y, NEG_SLOPE * y)

    x = block(x, params["w1"], params["b1"], params["g1"], params["be1"])
    x = block(x, params["w2"], params["b2"], params["g2"], params["be2"])
    return x


if __name__ == "__main__":
    key = jax.random.PRNGKey(0)
    kx, kp = jax.random.split(key)

    in_channels, out_channels = 4, 8
    N, H0, W0 = 2, 16, 16
    x = jax.random.normal(kx, (N, in_channels, H0, W0), jnp.float32)   # NCHW
    params = init_params(kp, in_channels, out_channels)

    out = jax.block_until_ready(upblock_forward(x, params))
    assert out.shape == (N, out_channels, 2 * H0, 2 * W0), out.shape

    ref = jax.block_until_ready(reference_forward(x, params))
    np.testing.assert_allclose(np.asarray(out), np.asarray(ref), rtol=5e-2, atol=5e-2)

    print("KERNEL_OK")
</pallas_src>

<mosaic_0001>
module attributes {stable_mosaic.version = 11 : i64} {
  func.func @upblock_kernel(%arg0: memref<8x2048xf32, #tpu.memory_space<vmem>>, %arg1: memref<1x2048xi32, #tpu.memory_space<vmem>>, %arg2: memref<1x2048xi32, #tpu.memory_space<vmem>>, %arg3: memref<8x72xbf16, #tpu.memory_space<vmem>>, %arg4: memref<8x1xf32, #tpu.memory_space<vmem>>, %arg5: memref<8x1xf32, #tpu.memory_space<vmem>>, %arg6: memref<8x72xbf16, #tpu.memory_space<vmem>>, %arg7: memref<8x1xf32, #tpu.memory_space<vmem>>, %arg8: memref<8x1xf32, #tpu.memory_space<vmem>>, %arg9: memref<8x2048xf32, #tpu.memory_space<vmem>>) attributes {dimension_semantics = [], scalar_prefetch = 0 : i64, scratch_operands = 0 : i64, tpu.core_type = #tpu.core_type<tc>} {
    %c0 = arith.constant 0 : index
    %c0_0 = arith.constant 0 : index
    %0 = vector.load %arg1[%c0, %c0_0] : memref<1x2048xi32, #tpu.memory_space<vmem>>, vector<1x2048xi32>
    %c0_1 = arith.constant 0 : index
    %c0_2 = arith.constant 0 : index
    %1 = vector.load %arg2[%c0_1, %c0_2] : memref<1x2048xi32, #tpu.memory_space<vmem>>, vector<1x2048xi32>
    %c0_3 = arith.constant 0 : index
    %c0_4 = arith.constant 0 : index
    %2 = vector.load %arg0[%c0_3, %c0_4] : memref<8x2048xf32, #tpu.memory_space<vmem>>, vector<8x2048xf32>
    %c0_5 = arith.constant 0 : index
    %c0_6 = arith.constant 0 : index
    %3 = vector.load %arg3[%c0_5, %c0_6] : memref<8x72xbf16, #tpu.memory_space<vmem>>, vector<8x72xbf16>
    %c0_7 = arith.constant 0 : index
    %c0_8 = arith.constant 0 : index
    %4 = vector.load %arg4[%c0_7, %c0_8] : memref<8x1xf32, #tpu.memory_space<vmem>>, vector<8x1xf32>
    %c0_9 = arith.constant 0 : index
    %c0_10 = arith.constant 0 : index
    %5 = vector.load %arg5[%c0_9, %c0_10] : memref<8x1xf32, #tpu.memory_space<vmem>>, vector<8x1xf32>
    %c33_i32 = arith.constant 33 : i32
    %6 = tpu.dynamic_rotate %2 by %c33_i32 dim 1 : vector<8x2048xf32>, i32 -> vector<8x2048xf32>
    %c-1_i32 = arith.constant -1 : i32
    %7 = vector.broadcast %c-1_i32 : i32 to vector<1x2048xi32>
    %8 = arith.addi %0, %7 : vector<1x2048xi32>
    %c-1_i32_11 = arith.constant -1 : i32
    %9 = vector.broadcast %c-1_i32_11 : i32 to vector<1x2048xi32>
    %10 = arith.addi %1, %9 : vector<1x2048xi32>
    %c0_i32 = arith.constant 0 : i32
    %11 = vector.broadcast %c0_i32 : i32 to vector<1x2048xi32>
    %12 = arith.cmpi sge, %8, %11 : vector<1x2048xi32>
    %c32_i32 = arith.constant 32 : i32
    %13 = vector.broadcast %c32_i32 : i32 to vector<1x2048xi32>
    %14 = arith.cmpi slt, %8, %13 : vector<1x2048xi32>
    %15 = arith.andi %12, %14 : vector<1x2048xi1>
    %c0_i32_12 = arith.constant 0 : i32
    %16 = vector.broadcast %c0_i32_12 : i32 to vector<1x2048xi32>
    %17 = arith.cmpi sge, %10, %16 : vector<1x2048xi32>
    %18 = arith.andi %15, %17 : vector<1x2048xi1>
    %c32_i32_13 = arith.constant 32 : i32
    %19 = vector.broadcast %c32_i32_13 : i32 to vector<1x2048xi32>
    %20 = arith.cmpi slt, %10, %19 : vector<1x2048xi32>
    %21 = arith.andi %18, %20 : vector<1x2048xi1>
    %cst = arith.constant 0.000000e+00 : f32
    %22 = vector.shape_cast %21 : vector<1x2048xi1> to vector<1x2048xi1>
    %23 = vector.broadcast %22 : vector<1x2048xi1> to vector<8x2048xi1>
    %24 = vector.broadcast %cst : f32 to vector<8x2048xf32>
    %25 = arith.select %23, %6, %24 : vector<8x2048xi1>, vector<8x2048xf32>
    %c32_i32_14 = arith.constant 32 : i32
    %26 = tpu.dynamic_rotate %2 by %c32_i32_14 dim 1 : vector<8x2048xf32>, i32 -> vector<8x2048xf32>
    %c-1_i32_15 = arith.constant -1 : i32
    %27 = vector.broadcast %c-1_i32_15 : i32 to vector<1x2048xi32>
    %28 = arith.addi %0, %27 : vector<1x2048xi32>
    %c0_i32_16 = arith.constant 0 : i32
    %29 = vector.broadcast %c0_i32_16 : i32 to vector<1x2048xi32>
    %30 = arith.addi %1, %29 : vector<1x2048xi32>
    %c0_i32_17 = arith.constant 0 : i32
    %31 = vector.broadcast %c0_i32_17 : i32 to vector<1x2048xi32>
    %32 = arith.cmpi sge, %28, %31 : vector<1x2048xi32>
    %c32_i32_18 = arith.constant 32 : i32
    %33 = vector.broadcast %c32_i32_18 : i32 to vector<1x2048xi32>
    %34 = arith.cmpi slt, %28, %33 : vector<1x2048xi32>
    %35 = arith.andi %32, %34 : vector<1x2048xi1>
    %c0_i32_19 = arith.constant 0 : i32
    %36 = vector.broadcast %c0_i32_19 : i32 to vector<1x2048xi32>
    %37 = arith.cmpi sge, %30, %36 : vector<1x2048xi32>
    %38 = arith.andi %35, %37 : vector<1x2048xi1>
    %c32_i32_20 = arith.constant 32 : i32
    %39 = vector.broadcast %c32_i32_20 : i32 to vector<1x2048xi32>
    %40 = arith.cmpi slt, %30, %39 : vector<1x2048xi32>
    %41 = arith.andi %38, %40 : vector<1x2048xi1>
    %cst_21 = arith.constant 0.000000e+00 : f32
    %42 = vector.shape_cast %41 : vector<1x2048xi1> to vector<1x2048xi1>
    %43 = vector.broadcast %42 : vector<1x2048xi1> to vector<8x2048xi1>
    %44 = vector.broadcast %cst_21 : f32 to vector<8x2048xf32>
    %45 = arith.select %43, %26, %44 : vector<8x2048xi1>, vector<8x2048xf32>
    %c31_i32 = arith.constant 31 : i32
    %46 = tpu.dynamic_rotate %2 by %c31_i32 dim 1 : vector<8x2048xf32>, i32 -> vector<8x2048xf32>
    %c-1_i32_22 = arith.constant -1 : i32
    %47 = vector.broadcast %c-1_i32_22 : i32 to vector<1x2048xi32>
    %48 = arith.addi %0, %47 : vector<1x2048xi32>
    %c1_i32 = arith.constant 1 : i32
    %49 = vector.broadcast %c1_i32 : i32 to vector<1x2048xi32>
    %50 = arith.addi %1, %49 : vector<1x2048xi32>
    %c0_i32_23 = arith.constant 0 : i32
    %51 = vector.broadcast %c0_i32_23 : i32 to vector<1x2048xi32>
    %52 = arith.cmpi sge, %48, %51 : vector<1x2048xi32>
    %c32_i32_24 = arith.constant 32 : i32
    %53 = vector.broadcast %c32_i32_24 : i32 to vector<1x2048xi32>
    %54 = arith.cmpi slt, %48, %53 : vector<1x2048xi32>
    %55 = arith.andi %52, %54 : vector<1x2048xi1>
    %c0_i32_25 = arith.constant 0 : i32
    %56 = vector.broadcast %c0_i32_25 : i32 to vector<1x2048xi32>
    %57 = arith.cmpi sge, %50, %56 : vector<1x2048xi32>
    %58 = arith.andi %55, %57 : vector<1x2048xi1>
    %c32_i32_26 = arith.constant 32 : i32
    %59 = vector.broadcast %c32_i32_26 : i32 to vector<1x2048xi32>
    %60 = arith.cmpi slt, %50, %59 : vector<1x2048xi32>
    %61 = arith.andi %58, %60 : vector<1x2048xi1>
    %cst_27 = arith.constant 0.000000e+00 : f32
    %62 = vector.shape_cast %61 : vector<1x2048xi1> to vector<1x2048xi1>
    %63 = vector.broadcast %62 : vector<1x2048xi1> to vector<8x2048xi1>
    %64 = vector.broadcast %cst_27 : f32 to vector<8x2048xf32>
    %65 = arith.select %63, %46, %64 : vector<8x2048xi1>, vector<8x2048xf32>
    %c1_i32_28 = arith.constant 1 : i32
    %66 = tpu.dynamic_rotate %2 by %c1_i32_28 dim 1 : vector<8x2048xf32>, i32 -> vector<8x2048xf32>
    %c0_i32_29 = arith.constant 0 : i32
    %67 = vector.broadcast %c0_i32_29 : i32 to vector<1x2048xi32>
    %68 = arith.addi %0, %67 : vector<1x2048xi32>
    %c-1_i32_30 = arith.constant -1 : i32
    %69 = vector.broadcast %c-1_i32_30 : i32 to vector<1x2048xi32>
    %70 = arith.addi %1, %69 : vector<1x2048xi32>
    %c0_i32_31 = arith.constant 0 : i32
    %71 = vector.broadcast %c0_i32_31 : i32 to vector<1x2048xi32>
    %72 = arith.cmpi sge, %68, %71 : vector<1x2048xi32>
    %c32_i32_32 = arith.constant 32 : i32
    %73 = vector.broadcast %c32_i32_32 : i32 to vector<1x2048xi32>
    %74 = arith.cmpi slt, %68, %73 : vector<1x2048xi32>
    %75 = arith.andi %72, %74 : vector<1x2048xi1>
    %c0_i32_33 = arith.constant 0 : i32
    %76 = vector.broadcast %c0_i32_33 : i32 to vector<1x2048xi32>
    %77 = arith.cmpi sge, %70, %76 : vector<1x2048xi32>
    %78 = arith.andi %75, %77 : vector<1x2048xi1>
    %c32_i32_34 = arith.constant 32 : i32
    %79 = vector.broadcast %c32_i32_34 : i32 to vector<1x2048xi32>
    %80 = arith.cmpi slt, %70, %79 : vector<1x2048xi32>
    %81 = arith.andi %78, %80 : vector<1x2048xi1>
    %cst_35 = arith.constant 0.000000e+00 : f32
    %82 = vector.shape_cast %81 : vector<1x2048xi1> to vector<1x2048xi1>
    %83 = vector.broadcast %82 : vector<1x2048xi1> to vector<8x2048xi1>
    %84 = vector.broadcast %cst_35 : f32 to vector<8x2048xf32>
    %85 = arith.select %83, %66, %84 : vector<8x2048xi1>, vector<8x2048xf32>
    %c2047_i32 = arith.constant 2047 : i32
    %86 = tpu.dynamic_rotate %2 by %c2047_i32 dim 1 : vector<8x2048xf32>, i32 -> vector<8x2048xf32>
    %c0_i32_36 = arith.constant 0 : i32
    %87 = vector.broadcast %c0_i32_36 : i32 to vector<1x2048xi32>
    %88 = arith.addi %0, %87 : vector<1x2048xi32>
    %c1_i32_37 = arith.constant 1 : i32
    %89 = vector.broadcast %c1_i32_37 : i32 to vector<1x2048xi32>
    %90 = arith.addi %1, %89 : vector<1x2048xi32>
    %c0_i32_38 = arith.constant 0 : i32
    %91 = vector.broadcast %c0_i32_38 : i32 to vector<1x2048xi32>
    %92 = arith.cmpi sge, %88, %91 : vector<1x2048xi32>
    %c32_i32_39 = arith.constant 32 : i32
    %93 = vector.broadcast %c32_i32_39 : i32 to vector<1x2048xi32>
    %94 = arith.cmpi slt, %88, %93 : vector<1x2048xi32>
    %95 = arith.andi %92, %94 : vector<1x2048xi1>
    %c0_i32_40 = arith.constant 0 : i32
    %96 = vector.broadcast %c0_i32_40 : i32 to vector<1x2048xi32>
    %97 = arith.cmpi sge, %90, %96 : vector<1x2048xi32>
    %98 = arith.andi %95, %97 : vector<1x2048xi1>
    %c32_i32_41 = arith.constant 32 : i32
    %99 = vector.broadcast %c32_i32_41 : i32 to vector<1x2048xi32>
    %100 = arith.cmpi slt, %90, %99 : vector<1x2048xi32>
    %101 = arith.andi %98, %100 : vector<1x2048xi1>
    %cst_42 = arith.constant 0.000000e+00 : f32
    %102 = vector.shape_cast %101 : vector<1x2048xi1> to vector<1x2048xi1>
    %103 = vector.broadcast %102 : vector<1x2048xi1> to vector<8x2048xi1>
    %104 = vector.broadcast %cst_42 : f32 to vector<8x2048xf32>
    %105 = arith.select %103, %86, %104 : vector<8x2048xi1>, vector<8x2048xf32>
    %c2017_i32 = arith.constant 2017 : i32
    %106 = tpu.dynamic_rotate %2 by %c2017_i32 dim 1 : vector<8x2048xf32>, i32 -> vector<8x2048xf32>
    %c1_i32_43 = arith.constant 1 : i32
    %107 = vector.broadcast %c1_i32_43 : i32 to vector<1x2048xi32>
    %108 = arith.addi %0, %107 : vector<1x2048xi32>
    %c-1_i32_44 = arith.constant -1 : i32
    %109 = vector.broadcast %c-1_i32_44 : i32 to vector<1x2048xi32>
    %110 = arith.addi %1, %109 : vector<1x2048xi32>
    %c0_i32_45 = arith.constant 0 : i32
    %111 = vector.broadcast %c0_i32_45 : i32 to vector<1x2048xi32>
    %112 = arith.cmpi sge, %108, %111 : vector<1x2048xi32>
    %c32_i32_46 = arith.constant 32 : i32
    %113 = vector.broadcast %c32_i32_46 : i32 to vector<1x2048xi32>
    %114 = arith.cmpi slt, %108, %113 : vector<1x2048xi32>
    %115 = arith.andi %112, %114 : vector<1x2048xi1>
    %c0_i32_47 = arith.constant 0 : i32
    %116 = vector.broadcast %c0_i32_47 : i32 to vector<1x2048xi32>
    %117 = arith.cmpi sge, %110, %116 : vector<1x2048xi32>
    %118 = arith.andi %115, %117 : vector<1x2048xi1>
    %c32_i32_48 = arith.constant 32 : i32
    %119 = vector.broadcast %c32_i32_48 : i32 to vector<1x2048xi32>
    %120 = arith.cmpi slt, %110, %119 : vector<1x2048xi32>
    %121 = arith.andi %118, %120 : vector<1x2048xi1>
    %cst_49 = arith.constant 0.000000e+00 : f32
    %122 = vector.shape_cast %121 : vector<1x2048xi1> to vector<1x2048xi1>
    %123 = vector.broadcast %122 : vector<1x2048xi1> to vector<8x2048xi1>
    %124 = vector.broadcast %cst_49 : f32 to vector<8x2048xf32>
    %125 = arith.select %123, %106, %124 : vector<8x2048xi1>, vector<8x2048xf32>
    %c2016_i32 = arith.constant 2016 : i32
    %126 = tpu.dynamic_rotate %2 by %c2016_i32 dim 1 : vector<8x2048xf32>, i32 -> vector<8x2048xf32>
    %c1_i32_50 = arith.constant 1 : i32
    %127 = vector.broadcast %c1_i32_50 : i32 to vector<1x2048xi32>
    %128 = arith.addi %0, %127 : vector<1x2048xi32>
    %c0_i32_51 = arith.constant 0 : i32
    %129 = vector.broadcast %c0_i32_51 : i32 to vector<1x2048xi32>
    %130 = arith.addi %1, %129 : vector<1x2048xi32>
    %c0_i32_52 = arith.constant 0 : i32
    %131 = vector.broadcast %c0_i32_52 : i32 to vector<1x2048xi32>
    %132 = arith.cmpi sge, %128, %131 : vector<1x2048xi32>
    %c32_i32_53 = arith.constant 32 : i32
    %133 = vector.broadcast %c32_i32_53 : i32 to vector<1x2048xi32>
    %134 = arith.cmpi slt, %128, %133 : vector<1x2048xi32>
    %135 = arith.andi %132, %134 : vector<1x2048xi1>
    %c0_i32_54 = arith.constant 0 : i32
    %136 = vector.broadcast %c0_i32_54 : i32 to vector<1x2048xi32>
    %137 = arith.cmpi sge, %130, %136 : vector<1x2048xi32>
    %138 = arith.andi %135, %137 : vector<1x2048xi1>
    %c32_i32_55 = arith.constant 32 : i32
    %139 = vector.broadcast %c32_i32_55 : i32 to vector<1x2048xi32>
    %140 = arith.cmpi slt, %130, %139 : vector<1x2048xi32>
    %141 = arith.andi %138, %140 : vector<1x2048xi1>
    %cst_56 = arith.constant 0.000000e+00 : f32
    %142 = vector.shape_cast %141 : vector<1x2048xi1> to vector<1x2048xi1>
    %143 = vector.broadcast %142 : vector<1x2048xi1> to vector<8x2048xi1>
    %144 = vector.broadcast %cst_56 : f32 to vector<8x2048xf32>
    %145 = arith.select %143, %126, %144 : vector<8x2048xi1>, vector<8x2048xf32>
    %c2015_i32 = arith.constant 2015 : i32
    %146 = tpu.dynamic_rotate %2 by %c2015_i32 dim 1 : vector<8x2048xf32>, i32 -> vector<8x2048xf32>
    %c1_i32_57 = arith.constant 1 : i32
    %147 = vector.broadcast %c1_i32_57 : i32 to vector<1x2048xi32>
    %148 = arith.addi %0, %147 : vector<1x2048xi32>
    %c1_i32_58 = arith.constant 1 : i32
    %149 = vector.broadcast %c1_i32_58 : i32 to vector<1x2048xi32>
    %150 = arith.addi %1, %149 : vector<1x2048xi32>
    %c0_i32_59 = arith.constant 0 : i32
    %151 = vector.broadcast %c0_i32_59 : i32 to vector<1x2048xi32>
    %152 = arith.cmpi sge, %148, %151 : vector<1x2048xi32>
    %c32_i32_60 = arith.constant 32 : i32
    %153 = vector.broadcast %c32_i32_60 : i32 to vector<1x2048xi32>
    %154 = arith.cmpi slt, %148, %153 : vector<1x2048xi32>
    %155 = arith.andi %152, %154 : vector<1x2048xi1>
    %c0_i32_61 = arith.constant 0 : i32
    %156 = vector.broadcast %c0_i32_61 : i32 to vector<1x2048xi32>
    %157 = arith.cmpi sge, %150, %156 : vector<1x2048xi32>
    %158 = arith.andi %155, %157 : vector<1x2048xi1>
    %c32_i32_62 = arith.constant 32 : i32
    %159 = vector.broadcast %c32_i32_62 : i32 to vector<1x2048xi32>
    %160 = arith.cmpi slt, %150, %159 : vector<1x2048xi32>
    %161 = arith.andi %158, %160 : vector<1x2048xi1>
    %cst_63 = arith.constant 0.000000e+00 : f32
    %162 = vector.shape_cast %161 : vector<1x2048xi1> to vector<1x2048xi1>
    %163 = vector.broadcast %162 : vector<1x2048xi1> to vector<8x2048xi1>
    %164 = vector.broadcast %cst_63 : f32 to vector<8x2048xf32>
    %165 = arith.select %163, %146, %164 : vector<8x2048xi1>, vector<8x2048xf32>
    %166 = tpu.concatenate %25, %45, %65, %85, %2, %105, %125, %145, %165 in 0 : vector<8x2048xf32>, vector<8x2048xf32>, vector<8x2048xf32>, vector<8x2048xf32>, vector<8x2048xf32>, vector<8x2048xf32>, vector<8x2048xf32>, vector<8x2048xf32>, vector<8x2048xf32> -> vector<72x2048xf32>
    %167 = arith.truncf %166 : vector<72x2048xf32> to vector<72x2048xbf16>
    %cst_64 = arith.constant dense<0.000000e+00> : vector<8x2048xf32>
    %168 = tpu.matmul %3, %167, %cst_64 {dimension_numbers = #tpu.dot_dimension_numbers<[1], [0], [0], [1], [0, 0, 1, 1], [], []>} : vector<8x72xbf16>, vector<72x2048xbf16>, vector<8x2048xf32> -> vector<8x2048xf32>
    %cst_65 = arith.constant dense<0.000000e+00> : vector<8xf32>
    %169 = vector.multi_reduction <add>, %168, %cst_65 [1] : vector<8x2048xf32> to vector<8xf32>
    %170 = vector.shape_cast %169 : vector<8xf32> to vector<8x1xf32>
    %cst_66 = arith.constant 4.8828125E-4 : f32
    %171 = vector.broadcast %cst_66 : f32 to vector<8x1xf32>
    %172 = arith.mulf %170, %171 : vector<8x1xf32>
    %173 = arith.mulf %168, %168 : vector<8x2048xf32>
    %cst_67 = arith.constant dense<0.000000e+00> : vector<8xf32>
    %174 = vector.multi_reduction <add>, %173, %cst_67 [1] : vector<8x2048xf32> to vector<8xf32>
    %175 = vector.shape_cast %174 : vector<8xf32> to vector<8x1xf32>
    %cst_68 = arith.constant 4.8828125E-4 : f32
    %176 = vector.broadcast %cst_68 : f32 to vector<8x1xf32>
    %177 = arith.mulf %175, %176 : vector<8x1xf32>
    %178 = arith.mulf %172, %172 : vector<8x1xf32>
    %179 = arith.subf %177, %178 : vector<8x1xf32>
    %cst_69 = arith.constant 9.99999974E-6 : f32
    %180 = vector.broadcast %cst_69 : f32 to vector<8x1xf32>
    %181 = arith.addf %179, %180 : vector<8x1xf32>
    %182 = math.rsqrt %181 : vector<8x1xf32>
    %183 = arith.mulf %4, %182 : vector<8x1xf32>
    %184 = arith.mulf %183, %172 : vector<8x1xf32>
    %185 = arith.subf %5, %184 : vector<8x1xf32>
    %186 = vector.broadcast %183 : vector<8x1xf32> to vector<8x2048xf32>
    %187 = arith.mulf %168, %186 : vector<8x2048xf32>
    %188 = vector.broadcast %185 : vector<8x1xf32> to vector<8x2048xf32>
    %189 = arith.addf %187, %188 : vector<8x2048xf32>
    %cst_70 = arith.constant 2.000000e-01 : f32
    %190 = vector.broadcast %cst_70 : f32 to vector<8x2048xf32>
    %191 = arith.mulf %190, %189 : vector<8x2048xf32>
    %192 = arith.maximumf %189, %191 : vector<8x2048xf32>
    %c0_71 = arith.constant 0 : index
    %c0_72 = arith.constant 0 : index
    %193 = vector.load %arg6[%c0_71, %c0_72] : memref<8x72xbf16, #tpu.memory_space<vmem>>, vector<8x72xbf16>
    %c0_73 = arith.constant 0 : index
    %c0_74 = arith.constant 0 : index
    %194 = vector.load %arg7[%c0_73, %c0_74] : memref<8x1xf32, #tpu.memory_space<vmem>>, vector<8x1xf32>
    %c0_75 = arith.constant 0 : index
    %c0_76 = arith.constant 0 : index
    %195 = vector.load %arg8[%c0_75, %c0_76] : memref<8x1xf32, #tpu.memory_space<vmem>>, vector<8x1xf32>
    %c33_i32_77 = arith.constant 33 : i32
    %196 = tpu.dynamic_rotate %192 by %c33_i32_77 dim 1 : vector<8x2048xf32>, i32 -> vector<8x2048xf32>
    %c-1_i32_78 = arith.constant -1 : i32
    %197 = vector.broadcast %c-1_i32_78 : i32 to vector<1x2048xi32>
    %198 = arith.addi %0, %197 : vector<1x2048xi32>
    %c-1_i32_79 = arith.constant -1 : i32
    %199 = vector.broadcast %c-1_i32_79 : i32 to vector<1x2048xi32>
    %200 = arith.addi %1, %199 : vector<1x2048xi32>
    %c0_i32_80 = arith.constant 0 : i32
    %201 = vector.broadcast %c0_i32_80 : i32 to vector<1x2048xi32>
    %202 = arith.cmpi sge, %198, %201 : vector<1x2048xi32>
    %c32_i32_81 = arith.constant 32 : i32
    %203 = vector.broadcast %c32_i32_81 : i32 to vector<1x2048xi32>
    %204 = arith.cmpi slt, %198, %203 : vector<1x2048xi32>
    %205 = arith.andi %202, %204 : vector<1x2048xi1>
    %c0_i32_82 = arith.constant 0 : i32
    %206 = vector.broadcast %c0_i32_82 : i32 to vector<1x2048xi32>
    %207 = arith.cmpi sge, %200, %206 : vector<1x2048xi32>
    %208 = arith.andi %205, %207 : vector<1x2048xi1>
    %c32_i32_83 = arith.constant 32 : i32
    %209 = vector.broadcast %c32_i32_83 : i32 to vector<1x2048xi32>
    %210 = arith.cmpi slt, %200, %209 : vector<1x2048xi32>
    %211 = arith.andi %208, %210 : vector<1x2048xi1>
    %cst_84 = arith.constant 0.000000e+00 : f32
    %212 = vector.shape_cast %211 : vector<1x2048xi1> to vector<1x2048xi1>
    %213 = vector.broadcast %212 : vector<1x2048xi1> to vector<8x2048xi1>
    %214 = vector.broadcast %cst_84 : f32 to vector<8x2048xf32>
    %215 = arith.select %213, %196, %214 : vector<8x2048xi1>, vector<8x2048xf32>
    %c32_i32_85 = arith.constant 32 : i32
    %216 = tpu.dynamic_rotate %192 by %c32_i32_85 dim 1 : vector<8x2048xf32>, i32 -> vector<8x2048xf32>
    %c-1_i32_86 = arith.constant -1 : i32
    %217 = vector.broadcast %c-1_i32_86 : i32 to vector<1x2048xi32>
    %218 = arith.addi %0, %217 : vector<1x2048xi32>
    %c0_i32_87 = arith.constant 0 : i32
    %219 = vector.broadcast %c0_i32_87 : i32 to vector<1x2048xi32>
    %220 = arith.addi %1, %219 : vector<1x2048xi32>
    %c0_i32_88 = arith.constant 0 : i32
    %221 = vector.broadcast %c0_i32_88 : i32 to vector<1x2048xi32>
    %222 = arith.cmpi sge, %218, %221 : vector<1x2048xi32>
    %c32_i32_89 = arith.constant 32 : i32
    %223 = vector.broadcast %c32_i32_89 : i32 to vector<1x2048xi32>
    %224 = arith.cmpi slt, %218, %223 : vector<1x2048xi32>
    %225 = arith.andi %222, %224 : vector<1x2048xi1>
    %c0_i32_90 = arith.constant 0 : i32
    %226 = vector.broadcast %c0_i32_90 : i32 to vector<1x2048xi32>
    %227 = arith.cmpi sge, %220, %226 : vector<1x2048xi32>
    %228 = arith.andi %225, %227 : vector<1x2048xi1>
    %c32_i32_91 = arith.constant 32 : i32
    %229 = vector.broadcast %c32_i32_91 : i32 to vector<1x2048xi32>
    %230 = arith.cmpi slt, %220, %229 : vector<1x2048xi32>
    %231 = arith.andi %228, %230 : vector<1x2048xi1>
    %cst_92 = arith.constant 0.000000e+00 : f32
    %232 = vector.shape_cast %231 : vector<1x2048xi1> to vector<1x2048xi1>
    %233 = vector.broadcast %232 : vector<1x2048xi1> to vector<8x2048xi1>
    %234 = vector.broadcast %cst_92 : f32 to vector<8x2048xf32>
    %235 = arith.select %233, %216, %234 : vector<8x2048xi1>, vector<8x2048xf32>
    %c31_i32_93 = arith.constant 31 : i32
    %236 = tpu.dynamic_rotate %192 by %c31_i32_93 dim 1 : vector<8x2048xf32>, i32 -> vector<8x2048xf32>
    %c-1_i32_94 = arith.constant -1 : i32
    %237 = vector.broadcast %c-1_i32_94 : i32 to vector<1x2048xi32>
    %238 = arith.addi %0, %237 : vector<1x2048xi32>
    %c1_i32_95 = arith.constant 1 : i32
    %239 = vector.broadcast %c1_i32_95 : i32 to vector<1x2048xi32>
    %240 = arith.addi %1, %239 : vector<1x2048xi32>
    %c0_i32_96 = arith.constant 0 : i32
    %241 = vector.broadcast %c0_i32_96 : i32 to vector<1x2048xi32>
    %242 = arith.cmpi sge, %238, %241 : vector<1x2048xi32>
    %c32_i32_97 = arith.constant 32 : i32
    %243 = vector.broadcast %c32_i32_97 : i32 to vector<1x2048xi32>
    %244 = arith.cmpi slt, %238, %243 : vector<1x2048xi32>
    %245 = arith.andi %242, %244 : vector<1x2048xi1>
    %c0_i32_98 = arith.constant 0 : i32
    %246 = vector.broadcast %c0_i32_98 : i32 to vector<1x2048xi32>
    %247 = arith.cmpi sge, %240, %246 : vector<1x2048xi32>
    %248 = arith.andi %245, %247 : vector<1x2048xi1>
    %c32_i32_99 = arith.constant 32 : i32
    %249 = vector.broadcast %c32_i32_99 : i32 to vector<1x2048xi32>
    %250 = arith.cmpi slt, %240, %249 : vector<1x2048xi32>
    %251 = arith.andi %248, %250 : vector<1x2048xi1>
    %cst_100 = arith.constant 0.000000e+00 : f32
    %252 = vector.shape_cast %251 : vector<1x2048xi1> to vector<1x2048xi1>
    %253 = vector.broadcast %252 : vector<1x2048xi1> to vector<8x2048xi1>
    %254 = vector.broadcast %cst_100 : f32 to vector<8x2048xf32>
    %255 = arith.select %253, %236, %254 : vector<8x2048xi1>, vector<8x2048xf32>
    %c1_i32_101 = arith.constant 1 : i32
    %256 = tpu.dynamic_rotate %192 by %c1_i32_101 dim 1 : vector<8x2048xf32>, i32 -> vector<8x2048xf32>
    %c0_i32_102 = arith.constant 0 : i32
    %257 = vector.broadcast %c0_i32_102 : i32 to vector<1x2048xi32>
    %258 = arith.addi %0, %257 : vector<1x2048xi32>
    %c-1_i32_103 = arith.constant -1 : i32
    %259 = vector.broadcast %c-1_i32_103 : i32 to vector<1x2048xi32>
    %260 = arith.addi %1, %259 : vector<1x2048xi32>
    %c0_i32_104 = arith.constant 0 : i32
    %261 = vector.broadcast %c0_i32_104 : i32 to vector<1x2048xi32>
    %262 = arith.cmpi sge, %258, %261 : vector<1x2048xi32>
    %c32_i32_105 = arith.constant 32 : i32
    %263 = vector.broadcast %c32_i32_105 : i32 to vector<1x2048xi32>
    %264 = arith.cmpi slt, %258, %263 : vector<1x2048xi32>
    %265 = arith.andi %262, %264 : vector<1x2048xi1>
    %c0_i32_106 = arith.constant 0 : i32
    %266 = vector.broadcast %c0_i32_106 : i32 to vector<1x2048xi32>
    %267 = arith.cmpi sge, %260, %266 : vector<1x2048xi32>
    %268 = arith.andi %265, %267 : vector<1x2048xi1>
    %c32_i32_107 = arith.constant 32 : i32
    %269 = vector.broadcast %c32_i32_107 : i32 to vector<1x2048xi32>
    %270 = arith.cmpi slt, %260, %269 : vector<1x2048xi32>
    %271 = arith.andi %268, %270 : vector<1x2048xi1>
    %cst_108 = arith.constant 0.000000e+00 : f32
    %272 = vector.shape_cast %271 : vector<1x2048xi1> to vector<1x2048xi1>
    %273 = vector.broadcast %272 : vector<1x2048xi1> to vector<8x2048xi1>
    %274 = vector.broadcast %cst_108 : f32 to vector<8x2048xf32>
    %275 = arith.select %273, %256, %274 : vector<8x2048xi1>, vector<8x2048xf32>
    %c2047_i32_109 = arith.constant 2047 : i32
    %276 = tpu.dynamic_rotate %192 by %c2047_i32_109 dim 1 : vector<8x2048xf32>, i32 -> vector<8x2048xf32>
    %c0_i32_110 = arith.constant 0 : i32
    %277 = vector.broadcast %c0_i32_110 : i32 to vector<1x2048xi32>
    %278 = arith.addi %0, %277 : vector<1x2048xi32>
    %c1_i32_111 = arith.constant 1 : i32
    %279 = vector.broadcast %c1_i32_111 : i32 to vector<1x2048xi32>
    %280 = arith.addi %1, %279 : vector<1x2048xi32>
    %c0_i32_112 = arith.constant 0 : i32
    %281 = vector.broadcast %c0_i32_112 : i32 to vector<1x2048xi32>
    %282 = arith.cmpi sge, %278, %281 : vector<1x2048xi32>
    %c32_i32_113 = arith.constant 32 : i32
    %283 = vector.broadcast %c32_i32_113 : i32 to vector<1x2048xi32>
    %284 = arith.cmpi slt, %278, %283 : vector<1x2048xi32>
    %285 = arith.andi %282, %284 : vector<1x2048xi1>
    %c0_i32_114 = arith.constant 0 : i32
    %286 = vector.broadcast %c0_i32_114 : i32 to vector<1x2048xi32>
    %287 = arith.cmpi sge, %280, %286 : vector<1x2048xi32>
    %288 = arith.andi %285, %287 : vector<1x2048xi1>
    %c32_i32_115 = arith.constant 32 : i32
    %289 = vector.broadcast %c32_i32_115 : i32 to vector<1x2048xi32>
    %290 = arith.cmpi slt, %280, %289 : vector<1x2048xi32>
    %291 = arith.andi %288, %290 : vector<1x2048xi1>
    %cst_116 = arith.constant 0.000000e+00 : f32
    %292 = vector.shape_cast %291 : vector<1x2048xi1> to vector<1x2048xi1>
    %293 = vector.broadcast %292 : vector<1x2048xi1> to vector<8x2048xi1>
    %294 = vector.broadcast %cst_116 : f32 to vector<8x2048xf32>
    %295 = arith.select %293, %276, %294 : vector<8x2048xi1>, vector<8x2048xf32>
    %c2017_i32_117 = arith.constant 2017 : i32
    %296 = tpu.dynamic_rotate %192 by %c2017_i32_117 dim 1 : vector<8x2048xf32>, i32 -> vector<8x2048xf32>
    %c1_i32_118 = arith.constant 1 : i32
    %297 = vector.broadcast %c1_i32_118 : i32 to vector<1x2048xi32>
    %298 = arith.addi %0, %297 : vector<1x2048xi32>
    %c-1_i32_119 = arith.constant -1 : i32
    %299 = vector.broadcast %c-1_i32_119 : i32 to vector<1x2048xi32>
    %300 = arith.addi %1, %299 : vector<1x2048xi32>
    %c0_i32_120 = arith.constant 0 : i32
    %301 = vector.broadcast %c0_i32_120 : i32 to vector<1x2048xi32>
    %302 = arith.cmpi sge, %298, %301 : vector<1x2048xi32>
    %c32_i32_121 = arith.constant 32 : i32
    %303 = vector.broadcast %c32_i32_121 : i32 to vector<1x2048xi32>
    %304 = arith.cmpi slt, %298, %303 : vector<1x2048xi32>
    %305 = arith.andi %302, %304 : vector<1x2048xi1>
    %c0_i32_122 = arith.constant 0 : i32
    %306 = vector.broadcast %c0_i32_122 : i32 to vector<1x2048xi32>
    %307 = arith.cmpi sge, %300, %306 : vector<1x2048xi32>
    %308 = arith.andi %305, %307 : vector<1x2048xi1>
    %c32_i32_123 = arith.constant 32 : i32
    %309 = vector.broadcast %c32_i32_123 : i32 to vector<1x2048xi32>
    %310 = arith.cmpi slt, %300, %309 : vector<1x2048xi32>
    %311 = arith.andi %308, %310 : vector<1x2048xi1>
    %cst_124 = arith.constant 0.000000e+00 : f32
    %312 = vector.shape_cast %311 : vector<1x2048xi1> to vector<1x2048xi1>
    %313 = vector.broadcast %312 : vector<1x2048xi1> to vector<8x2048xi1>
    %314 = vector.broadcast %cst_124 : f32 to vector<8x2048xf32>
    %315 = arith.select %313, %296, %314 : vector<8x2048xi1>, vector<8x2048xf32>
    %c2016_i32_125 = arith.constant 2016 : i32
    %316 = tpu.dynamic_rotate %192 by %c2016_i32_125 dim 1 : vector<8x2048xf32>, i32 -> vector<8x2048xf32>
    %c1_i32_126 = arith.constant 1 : i32
    %317 = vector.broadcast %c1_i32_126 : i32 to vector<1x2048xi32>
    %318 = arith.addi %0, %317 : vector<1x2048xi32>
    %c0_i32_127 = arith.constant 0 : i32
    %319 = vector.broadcast %c0_i32_127 : i32 to vector<1x2048xi32>
    %320 = arith.addi %1, %319 : vector<1x2048xi32>
    %c0_i32_128 = arith.constant 0 : i32
    %321 = vector.broadcast %c0_i32_128 : i32 to vector<1x2048xi32>
    %322 = arith.cmpi sge, %318, %321 : vector<1x2048xi32>
    %c32_i32_129 = arith.constant 32 : i32
    %323 = vector.broadcast %c32_i32_129 : i32 to vector<1x2048xi32>
    %324 = arith.cmpi slt, %318, %323 : vector<1x2048xi32>
    %325 = arith.andi %322, %324 : vector<1x2048xi1>
    %c0_i32_130 = arith.constant 0 : i32
    %326 = vector.broadcast %c0_i32_130 : i32 to vector<1x2048xi32>
    %327 = arith.cmpi sge, %320, %326 : vector<1x2048xi32>
    %328 = arith.andi %325, %327 : vector<1x2048xi1>
    %c32_i32_131 = arith.constant 32 : i32
    %329 = vector.broadcast %c32_i32_131 : i32 to vector<1x2048xi32>
    %330 = arith.cmpi slt, %320, %329 : vector<1x2048xi32>
    %331 = arith.andi %328, %330 : vector<1x2048xi1>
    %cst_132 = arith.constant 0.000000e+00 : f32
    %332 = vector.shape_cast %331 : vector<1x2048xi1> to vector<1x2048xi1>
    %333 = vector.broadcast %332 : vector<1x2048xi1> to vector<8x2048xi1>
    %334 = vector.broadcast %cst_132 : f32 to vector<8x2048xf32>
    %335 = arith.select %333, %316, %334 : vector<8x2048xi1>, vector<8x2048xf32>
    %c2015_i32_133 = arith.constant 2015 : i32
    %336 = tpu.dynamic_rotate %192 by %c2015_i32_133 dim 1 : vector<8x2048xf32>, i32 -> vector<8x2048xf32>
    %c1_i32_134 = arith.constant 1 : i32
    %337 = vector.broadcast %c1_i32_134 : i32 to vector<1x2048xi32>
    %338 = arith.addi %0, %337 : vector<1x2048xi32>
    %c1_i32_135 = arith.constant 1 : i32
    %339 = vector.broadcast %c1_i32_135 : i32 to vector<1x2048xi32>
    %340 = arith.addi %1, %339 : vector<1x2048xi32>
    %c0_i32_136 = arith.constant 0 : i32
    %341 = vector.broadcast %c0_i32_136 : i32 to vector<1x2048xi32>
    %342 = arith.cmpi sge, %338, %341 : vector<1x2048xi32>
    %c32_i32_137 = arith.constant 32 : i32
    %343 = vector.broadcast %c32_i32_137 : i32 to vector<1x2048xi32>
    %344 = arith.cmpi slt, %338, %343 : vector<1x2048xi32>
    %345 = arith.andi %342, %344 : vector<1x2048xi1>
    %c0_i32_138 = arith.constant 0 : i32
    %346 = vector.broadcast %c0_i32_138 : i32 to vector<1x2048xi32>
    %347 = arith.cmpi sge, %340, %346 : vector<1x2048xi32>
    %348 = arith.andi %345, %347 : vector<1x2048xi1>
    %c32_i32_139 = arith.constant 32 : i32
    %349 = vector.broadcast %c32_i32_139 : i32 to vector<1x2048xi32>
    %350 = arith.cmpi slt, %340, %349 : vector<1x2048xi32>
    %351 = arith.andi %348, %350 : vector<1x2048xi1>
    %cst_140 = arith.constant 0.000000e+00 : f32
    %352 = vector.shape_cast %351 : vector<1x2048xi1> to vector<1x2048xi1>
    %353 = vector.broadcast %352 : vector<1x2048xi1> to vector<8x2048xi1>
    %354 = vector.broadcast %cst_140 : f32 to vector<8x2048xf32>
    %355 = arith.select %353, %336, %354 : vector<8x2048xi1>, vector<8x2048xf32>
    %356 = tpu.concatenate %215, %235, %255, %275, %192, %295, %315, %335, %355 in 0 : vector<8x2048xf32>, vector<8x2048xf32>, vector<8x2048xf32>, vector<8x2048xf32>, vector<8x2048xf32>, vector<8x2048xf32>, vector<8x2048xf32>, vector<8x2048xf32>, vector<8x2048xf32> -> vector<72x2048xf32>
    %357 = arith.truncf %356 : vector<72x2048xf32> to vector<72x2048xbf16>
    %cst_141 = arith.constant dense<0.000000e+00> : vector<8x2048xf32>
    %358 = tpu.matmul %193, %357, %cst_141 {dimension_numbers = #tpu.dot_dimension_numbers<[1], [0], [0], [1], [0, 0, 1, 1], [], []>} : vector<8x72xbf16>, vector<72x2048xbf16>, vector<8x2048xf32> -> vector<8x2048xf32>
    %cst_142 = arith.constant dense<0.000000e+00> : vector<8xf32>
    %359 = vector.multi_reduction <add>, %358, %cst_142 [1] : vector<8x2048xf32> to vector<8xf32>
    %360 = vector.shape_cast %359 : vector<8xf32> to vector<8x1xf32>
    %cst_143 = arith.constant 4.8828125E-4 : f32
    %361 = vector.broadcast %cst_143 : f32 to vector<8x1xf32>
    %362 = arith.mulf %360, %361 : vector<8x1xf32>
    %363 = arith.mulf %358, %358 : vector<8x2048xf32>
    %cst_144 = arith.constant dense<0.000000e+00> : vector<8xf32>
    %364 = vector.multi_reduction <add>, %363, %cst_144 [1] : vector<8x2048xf32> to vector<8xf32>
    %365 = vector.shape_cast %364 : vector<8xf32> to vector<8x1xf32>
    %cst_145 = arith.constant 4.8828125E-4 : f32
    %366 = vector.broadcast %cst_145 : f32 to vector<8x1xf32>
    %367 = arith.mulf %365, %366 : vector<8x1xf32>
    %368 = arith.mulf %362, %362 : vector<8x1xf32>
    %369 = arith.subf %367, %368 : vector<8x1xf32>
    %cst_146 = arith.constant 9.99999974E-6 : f32
    %370 = vector.broadcast %cst_146 : f32 to vector<8x1xf32>
    %371 = arith.addf %369, %370 : vector<8x1xf32>
    %372 = math.rsqrt %371 : vector<8x1xf32>
    %373 = arith.mulf %194, %372 : vector<8x1xf32>
    %374 = arith.mulf %373, %362 : vector<8x1xf32>
    %375 = arith.subf %195, %374 : vector<8x1xf32>
    %376 = vector.broadcast %373 : vector<8x1xf32> to vector<8x2048xf32>
    %377 = arith.mulf %358, %376 : vector<8x2048xf32>
    %378 = vector.broadcast %375 : vector<8x1xf32> to vector<8x2048xf32>
    %379 = arith.addf %377, %378 : vector<8x2048xf32>
    %cst_147 = arith.constant 2.000000e-01 : f32
    %380 = vector.broadcast %cst_147 : f32 to vector<8x2048xf32>
    %381 = arith.mulf %380, %379 : vector<8x2048xf32>
    %382 = arith.maximumf %379, %381 : vector<8x2048xf32>
    %c0_148 = arith.constant 0 : index
    %c0_149 = arith.constant 0 : index
    %383 = vector.load %arg9[%c0_148, %c0_149] : memref<8x2048xf32, #tpu.memory_space<vmem>>, vector<8x2048xf32>
    tpu.vector_store %arg9[%c0_148, %c0_149], %382 {strides = array<i32>} : memref<8x2048xf32, #tpu.memory_space<vmem>>, vector<8x2048xf32>,
    return
  }
}

</mosaic_0001>

<bundles_post_ra>
// kernel: upblock_forward.1
= control target key start
LH: loop header
LB: loop body
LE: loop exit
PB: predicated region body
PF: predicated region fallthrough
CT: control target
= control target key end

     0   :  { %v8028_v3 = vmov 0   ;;  %s4072_s17 = smov 33   ;;  %s4073_s22 = smov 32   ;;  %v8032_v25 = vlaneseq  ;;  %v8404_v47 = vmov 0  ;;  %v8411_v55 = vmov 0  ;;  %s7977_s0 = inlined_call_operand.vmem [shape: f32[8,2048], index: 0, kind: input, shape index: {}]   ;;  %s7978_s1 = inlined_call_operand.vmem [shape: s32[1,2048], index: 1, kind: input, shape index: {}]   ;;  %s7979_s2 = inlined_call_operand.vmem [shape: s32[1,2048], index: 2, kind: input, shape index: {}]   ;;  %s7980_s3 = inlined_call_operand.vmem [shape: bf16[8,72], index: 3, kind: input, shape index: {}]   ;;  %s7981_s4 = inlined_call_operand.vmem [shape: f32[8,1], index: 4, kind: input, shape index: {}]   ;;  %s7982_s5 = inlined_call_operand.vmem [shape: f32[8,1], index: 5, kind: input, shape index: {}]   ;;  %s7983_s6 = inlined_call_operand.vmem [shape: bf16[8,72], index: 6, kind: input, shape index: {}]   ;;  %s7984_s7 = inlined_call_operand.vmem [shape: f32[8,1], index: 7, kind: input, shape index: {}]   ;;  %s7985_s8 = inlined_call_operand.vmem [shape: f32[8,1], index: 8, kind: input, shape index: {}]   ;;  %s7986_s9 = inlined_call_operand.vmem [shape: f32[8,2048], index: 9, kind: output, shape index: {}]  }
   0x1   :  { %v39_v0 = vld [vmem:[%s7977_s0 + $0x10] sm:$0xff]  ;;  %v4137_v1 = vld [vmem:[%s7977_s0 + $0x78] sm:$0xff]  ;;  %v4142_v2 = vld [vmem:[%s7977_s0] sm:$0xff]  ;;  %1469 = vmatprep.mubr.bf16.mxu0 %v8028_v3  ;;  %1510 = vmatprep.mubr.bf16.mxu1 %v8028_v3  ;;  %s4074_s23 = smov 1   ;;  %s4075_s24 = smov 31   ;;  %v8414_v58 = vmov 0 }
   0x2   :  { %v3461_v4 = vpack.i.bf16 %v39_v0, %v4137_v1  ;;  %v4150_v5 = vld [vmem:[%s7977_s0 + $0x8] sm:$0xff]  ;;  %3751 = vset.pattern.permute.xlu0 %v8028_v3  ;;  %3752 = vset.pattern.permute.xlu1 %v8028_v3  ;;  %v40_v7 = vld [vmem:[%s7977_s0 + $0x18] sm:$0xff]  ;;  %v41_v8 = vld [vmem:[%s7977_s0 + $0x20] sm:$0xff]  ;;  %s4076_s27 = smov 127   ;;  %s4077_s28 = smov 97   ;;  %v4230_v30 = vshrl.u32 %v8032_v25, 7 }
   0x3   :  { %v3451_v6 = vpack.i.bf16 %v4150_v5, %v4142_v2  ;;  %v3476_v9 = vpack.i.bf16 %v41_v8, %v40_v7  ;;  %v3516_v10 = vpack.i.bf16 %v40_v7, %v4142_v2  ;;  %v3511_v11 = vpack.i.bf16 %v39_v0, %v4150_v5  ;;  %v42_v12 = vld [vmem:[%s7977_s0 + $0x28] sm:$0xff]  ;;  %s4078_s29 = smov 96   ;;  %s4079_s30 = smov 95   ;;  %v43_v15 = vld [vmem:[%s7977_s0 + $0x30] sm:$0xff]  ;;  %v44_v17 = vld [vmem:[%s7977_s0 + $0x38] sm:$0xff] }
   0x4   :  { %3462 = vrot.lane.b32.xlu1 %v3461_v4, %s4072_s17  ;;  %v3521_v13 = vpack.i.bf16 %v42_v12, %v41_v8  ;;  %v3551_v14 = vpack.i.bf16 %v40_v7, %v39_v0  ;;  %v3576_v16 = vpack.i.bf16 %v43_v15, %v42_v12  ;;  %v45_v18 = vld [vmem:[%s7977_s0 + $0x40] sm:$0xff]  ;;  %v46_v20 = vld [vmem:[%s7977_s0 + $0x48] sm:$0xff]  ;;  %v3611_v24 = vpack.i.bf16 %v44_v17, %v43_v15  ;;  %v4260_v35 = vld [vmem:[%s7977_s0 + $0x50] sm:$0xff] }
   0x5   :  { %3452 = vrot.lane.b32.xlu0 %v3451_v6, %s4072_s17  ;;  %v3586_v19 = vpack.i.bf16 %v45_v18, %v44_v17  ;;  %v4212_v21 = vld [vmem:[%s7978_s1] sm:$0xff]  ;;  %v4215_v22 = vpack.i.bf16 %v46_v20, %v45_v18  ;;  %v34_v23 = vld [vmem:[%s7978_s1 + $0x8] sm:$0xff]  ;;  %v4251_v34 = vsub.s32 1, %v4230_v30  ;;  %v4268_v37 = vsub.s32 0, %v4230_v30  ;;  %v48_v62 = vld [vmem:[%s7977_s0 + $0x58] sm:$0xff] }
   0x6   :  { %v107_v26 = vadd.s32 4294967295, %v4212_v21  ;;  %v4225_v27 = vld [vmem:[%s7979_s2 + $0x8] sm:$0xff]  ;;  %v108_v28 = vadd.s32 4294967295, %v34_v23  ;;  %v893_v29 = vadd.s32 1, %v34_v23  ;;  %v4265_v36 = vld [vmem:[%s7979_s2] sm:$0xff]  ;;  %v4297_v43 = vpack.i.bf16 %v4260_v35, %v46_v20 }
   0x7   :  { %v4233_v31 = vadd.s32 4294967295, %v4225_v27  ;;  %v4242_v33 = vadd.s32 1, %v4225_v27  ;;  %8396 = vst [vmem:[#allocation2_spill] sm:$0xff] %v4251_v34  ;;  %vm7988_vm11 = vcmp.ge.s32.totalorder %v4225_v27, 0  ;;  %8397 = vst [vmem:[#allocation3_spill] sm:$0xff] %v4268_v37  ;;  %vm7987_vm12 = vcmp.lt.s32.totalorder %v4225_v27, 32 }
   0x8   :  { %3467 = vrot.lane.b32.xlu1 %v3461_v4, %s4073_s22  ;;  %vm112_vm0 = vcmp.ge.s32.totalorder %v108_v28, 0  ;;  %vm114_vm1 = vcmp.lt.s32.totalorder %v108_v28, 32  ;;  %vm111_vm2 = vcmp.ge.s32.totalorder %v107_v26, 0  ;;  %vm113_vm5 = vcmp.lt.s32.totalorder %v107_v26, 32  ;;  %v4379_v63 = vld [vmem:[%s7977_s0 + $0x60] sm:$0xff] }
   0x9   :  { %3457 = vrot.lane.b32.xlu0 %v3451_v6, %s4073_s22  ;;  %vm4236_vm3 = vmand %vm112_vm0, %vm114_vm1  ;;  %vm7992_vm4 = vcmp.ge.s32.totalorder %v4233_v31, 0  ;;  %vm7990_vm7 = vcmp.lt.s32.totalorder %v4233_v31, 32  ;;  %vm895_vm8 = vcmp.ge.s32.totalorder %v893_v29, 0  ;;  %vm897_vm9 = vcmp.lt.s32.totalorder %v893_v29, 32 }
   0xa   :  { %vm120_vm6 = vmand %vm4236_vm3, %vm7992_vm4  ;;  %vm7989_vm14 = vcmp.ge.s32.totalorder %v4242_v33, 0  ;;  %v4300_v44 = vadd.s32 4294967295, %v4265_v36  ;;  %v4303_v45 = vsub.s32 3, %v4230_v30  ;;  %v4306_v46 = vsub.s32 2, %v4230_v30 }
   0xb   :  { %vm124_vm10 = vmand %vm120_vm6, %vm7990_vm7  ;;  %vm587_vm6 = vcmp.lt.s32.totalorder %v34_v23, 32  ;;  %v8417_v59 = vmov 0  ;;  %v8420_v60 = vmov 0  ;;  %v8423_v61 = vmov 0 }
   0xc   :  { %3477 = vrot.lane.b32.xlu1 %v3476_v9, %s4073_s22  ;;  %v4271_v38 = vsel %vm124_vm10, 1, %v8028_v3  ;;  %vm4276_vm13 = vmand %vm111_vm2, %vm113_vm5  ;;  %8402 = vst [vmem:[#allocation4_spill] sm:$0xff] %v4303_v45  ;;  %vm585_vm5 = vcmp.ge.s32.totalorder %v34_v23, 0  ;;  %v8426_v0 = vmov 0  ;;  %v3666_v7 = vpack.i.bf16 %v4379_v63, %v48_v62 }
   0xd   :  { %3472 = vrot.lane.b32.xlu0 %v3476_v9, %s4072_s17  ;;  %v166_v40 = vrot.slane %v4271_v38, %v4251_v34  ;;  %vm4284_vm15 = vmand %vm895_vm8, %vm897_vm9  ;;  %v162_v42 = vrot.slane %v4271_v38, %v4268_v37  ;;  %8403 = vst [vmem:[#allocation5_spill] sm:$0xff] %v4306_v46  ;;  %v174_v52 = vrot.slane %v4271_v38, %v4303_v45  ;;  %vm8434_vm4 = vcmp.ge.s32.totalorder %v4233_v31, 0 }
   0xe   :  { %vm275_vm0 = vmand %vm4236_vm3, %vm7988_vm11  ;;  %v170_v56 = vrot.slane %v4271_v38, %v4306_v46  ;;  %v8441_v18 = vmov 0  ;;  %v8456_v26 = vmov 0  ;;  %v8459_v28 = vmov 0 }
   0xf   :  { %vm279_vm1 = vmand %vm275_vm0, %vm7987_vm12  ;;  %vm4311_vm2 = vcmp.eq.s32.totalorder %v166_v40, 1  ;;  %vm4338_vm10 = vcmp.eq.s32.totalorder %v162_v42, 1  ;;  %vm4361_vm12 = vcmp.eq.s32.totalorder %v174_v52, 1  ;;  %v8462_v29 = vmov 0  ;;  %v50_v40 = vld [vmem:[%s7977_s0 + $0x68] sm:$0xff]  ;;  %v51_v42 = vld [vmem:[%s7977_s0 + $0x70] sm:$0xff] }
  0x10   :  { %3487 = vrot.lane.b32.xlu1 %v3451_v6, %s4074_s23  ;;  %v8405_v47 = vsel %vm4311_vm2, 4294967295, %v8404_v47  ;;  %v4316_v48 = vsel %vm279_vm1, 1, %v8028_v3  ;;  %vm4322_vm8 = vmand %vm4284_vm15, %vm7989_vm14  ;;  %v8412_v55 = vsel %vm4338_vm10, 4294967295, %v8411_v55  ;;  %vm7991_vm1 = vcmp.lt.s32.totalorder %v4242_v33, 32 }
  0x11   :  { %3482 = vrot.lane.b32.xlu0 %v3451_v6, %s4075_s24  ;;  %8406 = vst [vmem:[#allocation6_spill] sm:$0xff] %v8405_v47  ;;  %v321_v50 = vrot.slane %v4316_v48, %v4251_v34  ;;  %v317_v51 = vrot.slane %v4316_v48, %v4268_v37  ;;  %v329_v53 = vrot.slane %v4316_v48, %v4303_v45  ;;  %vm4334_vm9 = vmand %vm585_vm5, %vm587_vm6  ;;  %v8421_v60 = vsel %vm4361_vm12, 4294967295, %v8420_v60 }
  0x12   :  { %8413 = vst [vmem:[#allocation7_spill] sm:$0xff] %v8412_v55  ;;  %v325_v57 = vrot.slane %v4316_v48, %v4306_v46  ;;  %vm432_vm0 = vmand %vm4236_vm3, %vm7989_vm14  ;;  %vm4385_vm7 = vcmp.eq.s32.totalorder %v170_v56, 1  ;;  %v8465_v32 = vmov 0  ;;  %v4545_v49 = vadd.s32 1, %v4265_v36 }
  0x13   :  { %vm4353_vm5 = vcmp.eq.s32.totalorder %v321_v50, 1  ;;  %vm4357_vm6 = vcmp.eq.s32.totalorder %v317_v51, 1  ;;  %8422 = vst [vmem:[#allocation10_spill] sm:$0xff] %v8421_v60  ;;  %vm4365_vm11 = vcmp.eq.s32.totalorder %v329_v53, 1  ;;  %vm436_vm3 = vmand %vm432_vm0, %vm7991_vm1  ;;  %v8427_v0 = vsel %vm4385_vm7, 4294967295, %v8426_v0 }
  0x14   :  { %3497 = vrot.lane.b32.xlu1 %v3461_v4, %s4074_s23  ;;  %v8415_v58 = vsel %vm4353_vm5, 4294967295, %v8414_v58  ;;  %v8418_v59 = vsel %vm4357_vm6, 4294967295, %v8417_v59  ;;  %v8424_v61 = vsel %vm4365_vm11, 4294967295, %v8423_v61  ;;  %8428 = vst [vmem:[#allocation12_spill] sm:$0xff] %v8427_v0  ;;  %vm4389_vm0 = vcmp.eq.s32.totalorder %v325_v57, 1  ;;  %vm591_vm12 = vmand %vm4334_vm9, %vm8434_vm4 }
  0x15   :  { %3492 = vrot.lane.b32.xlu0 %v3461_v4, %s4075_s24  ;;  %8416 = vst [vmem:[#allocation8_spill] sm:$0xff] %v8415_v58  ;;  %8419 = vst [vmem:[#allocation9_spill] sm:$0xff] %v8418_v59  ;;  %v8429_v4 = vmov 0  ;;  %vm7999_vm1 = vcmp.ge.s32.totalorder %v4300_v44, 0  ;;  %v3691_v50 = vpack.i.bf16 %v48_v62, %v4260_v35  ;;  %v4553_v51 = vpack.i.bf16 %v51_v42, %v50_v40 }
  0x16   :  { %8425 = vst [vmem:[#allocation11_spill] sm:$0xff] %v8424_v61  ;;  %v8430_v4 = vsel %vm4389_vm0, 4294967295, %v8429_v4  ;;  %vm4420_vm14 = vmand %vm4276_vm13, %vm7999_vm1  ;;  %vm8002_vm0 = vcmp.ge.s32.totalorder %v4265_v36, 0  ;;  %vm8436_vm1 = vcmp.ge.s32.totalorder %v4242_v33, 0  ;;  %v4577_v53 = vsub.s32 5, %v4230_v30 }
  0x17   :  { %8431 = vst [vmem:[#allocation13_spill] sm:$0xff] %v8430_v4  ;;  %vm742_vm4 = vmand %vm4334_vm9, %vm8436_vm1  ;;  %v4600_v41 = vsub.s32 7, %v4230_v30  ;;  %v8491_v23 = vmov 0  ;;  %v8494_v40 = vmov 0  ;;  %v8497_v39 = vmov 0 }
  0x18   :  { %3507 = vrot.lane.b32.xlu1 %v3476_v9, %s4074_s23  ;;  %v182_v42 = vrot.slane %v4271_v38, %v4577_v53 }
  0x19   :  { %3502 = vrot.lane.b32.xlu0 %v3476_v9, %s4075_s24  ;;  %v8475_v9 = vmov 0 }
  0x1c   :  { %3517 = vrot.lane.b32.xlu1 %v3516_v10, %s4076_s27 }
  0x1d   :  { %3512 = vrot.lane.b32.xlu0 %v3511_v11, %s4076_s27 }
  0x20   :  { %3527 = vrot.lane.b32.xlu1 %v3511_v11, %s4077_s28 }
  0x21   :  { %3522 = vrot.lane.b32.xlu0 %v3521_v13, %s4076_s27 }
  0x24   :  { %3537 = vrot.lane.b32.xlu1 %v3516_v10, %s4077_s28 }
  0x25   :  { %3532 = vrot.lane.b32.xlu0 %v3511_v11, %s4078_s29 }
  0x28   :  { %3547 = vrot.lane.b32.xlu1 %v3451_v6, %s4079_s30  ;;  %v4394_v6 = vsel %vm436_vm3, 1, %v8028_v3  ;;  %vm8435_vm3 = vcmp.lt.s32.totalorder %v4233_v31, 32 }
  0x29   :  { %3542 = vrot.lane.b32.xlu0 %v3516_v10, %s4078_s29  ;;  %v478_v8 = vrot.slane %v4394_v6, %v4251_v34  ;;  %v474_v10 = vrot.slane %v4394_v6, %v4268_v37  ;;  %vm593_vm7 = vmand %vm591_vm12, %vm8435_vm3  ;;  %v486_v11 = vrot.slane %v4394_v6, %v4303_v45 }
  0x2a   :  { %v4436_v12 = vsel %vm593_vm7, 1, %v8028_v3  ;;  %vm8440_vm7 = vcmp.lt.s32.totalorder %v4242_v33, 32  ;;  %v8468_v33 = vmov 0 }
  0x2b   :  { %vm4445_vm11 = vcmp.eq.s32.totalorder %v478_v8, 1  ;;  %v635_v15 = vrot.slane %v4436_v12, %v4251_v34  ;;  %v643_v17 = vrot.slane %v4436_v12, %v4303_v45  ;;  %vm4457_vm12 = vmand %vm742_vm4, %vm8440_vm7  ;;  %vm4462_vm9 = vcmp.eq.s32.totalorder %v474_v10, 1 }
  0x2c   :  { %3557 = vrot.lane.b32.xlu1 %v3521_v13, %s4077_s28  ;;  %v8442_v18 = vsel %vm4457_vm12, 4294967295, %v8441_v18  ;;  %v639_v20 = vrot.slane %v4436_v12, %v4306_v46  ;;  %vm8447_vm1 = vmmov %vm8440_vm7  ;;  %v4603_v8 = vsub.s32 6, %v4230_v30 }
  0x2d   :  { %3552 = vrot.lane.b32.xlu0 %v3551_v14, %s4079_s30  ;;  %v8437_v14 = vmov 0  ;;  %8443 = vst [vmem:[#allocation15_spill] sm:$0xff] %v8442_v18  ;;  %vm4472_vm3 = vmand %vm4322_vm8, %vm8447_vm1  ;;  %vm4484_vm7 = vcmp.eq.s32.totalorder %v635_v15, 1  ;;  %vm4492_vm8 = vcmp.eq.s32.totalorder %v486_v11, 1  ;;  %vm4496_vm1 = vcmp.eq.s32.totalorder %v643_v17, 1 }
  0x2e   :  { %v8438_v14 = vsel %vm4445_vm11, 4294967295, %v8437_v14  ;;  %vm4480_vm4 = vmand %vm4276_vm13, %vm8002_vm0  ;;  %v8460_v28 = vsel %vm4492_vm8, 4294967295, %v8459_v28  ;;  %v8463_v29 = vsel %vm4496_vm1, 4294967295, %v8462_v29  ;;  %vm4508_vm10 = vcmp.eq.s32.totalorder %v639_v20, 1 }
  0x2f   :  { %8439 = vst [vmem:[#allocation14_spill] sm:$0xff] %v8438_v14  ;;  %8461 = vst [vmem:[#allocation20_spill] sm:$0xff] %v8460_v28  ;;  %v8469_v33 = vsel %vm4508_vm10, 4294967295, %v8468_v33  ;;  %vm8013_vm0 = vcmp.lt.s32.totalorder %v4300_v44, 32  ;;  %vm586_vm8 = vcmp.lt.s32.totalorder %v4212_v21, 32  ;;  %v8478_v11 = vmov 0 }
  0x30   :  { %3567 = vrot.lane.b32.xlu1 %v3521_v13, %s4079_s30  ;;  %8464 = vst [vmem:[#allocation21_spill] sm:$0xff] %v8463_v29  ;;  %8470 = vst [vmem:[#allocation23_spill] sm:$0xff] %v8469_v33  ;;  %v8483_v15 = vmov 0  ;;  %v8486_v17 = vmov 0  ;;  %v186_v25 = vrot.slane %v4271_v38, %v4603_v8  ;;  %v8610_v29 = vmov 0 }
  0x31   :  { %3562 = vrot.lane.b32.xlu0 %v3521_v13, %s4078_s29  ;;  %v482_v13 = vrot.slane %v4394_v6, %v4306_v46  ;;  %vm123_vm11 = vmand %vm4420_vm14, %vm8013_vm0  ;;  %vm8471_vm14 = vcmp.ge.s32.totalorder %v4233_v31, 0 }
  0x32   :  { %v4556_v52 = vsel %vm123_vm11, 1, %v8028_v3  ;;  %vm901_vm6 = vmand %vm4284_vm15, %vm8471_vm14  ;;  %vm584_vm11 = vcmp.ge.s32.totalorder %v4212_v21, 0  ;;  %vm8503_vm14 = vcmp.ge.s32.totalorder %v4300_v44, 0 }
  0x34   :  { %3577 = vrot.lane.b32.xlu1 %v3576_v16, %s4073_s22 }
  0x35   :  { %3572 = vrot.lane.b32.xlu0 %v3576_v16, %s4072_s17 }
  0x38   :  { %3587 = vrot.lane.b32.xlu1 %v3586_v19, %s4073_s22 }
  0x39   :  { %3582 = vrot.lane.b32.xlu0 %v3586_v19, %s4072_s17 }
  0x3c   :  { %3597 = vrot.lane.b32.xlu1 %v3576_v16, %s4074_s23 }
  0x3d   :  { %3592 = vrot.lane.b32.xlu0 %v3576_v16, %s4075_s24  ;;  %v631_v16 = vrot.slane %v4436_v12, %v4268_v37 }
  0x3f   :  { %vm4488_vm12 = vcmp.eq.s32.totalorder %v631_v16, 1 }
  0x40   :  { %3607 = vrot.lane.b32.xlu1 %v3586_v19, %s4074_s23  ;;  %v8457_v26 = vsel %vm4488_vm12, 4294967295, %v8456_v26 }
  0x41   :  { %3602 = vrot.lane.b32.xlu0 %v3586_v19, %s4075_s24  ;;  %v8444_v19 = vmov 0  ;;  %8458 = vst [vmem:[#allocation19_spill] sm:$0xff] %v8457_v26 }
  0x42   :  { %v8445_v19 = vsel %vm4462_vm9, 4294967295, %v8444_v19 }
  0x43   :  { %8446 = vst [vmem:[#allocation16_spill] sm:$0xff] %v8445_v19 }
  0x44   :  { %3617 = vrot.lane.b32.xlu1 %v4215_v22, %s4076_s27 }
  0x45   :  { %3612 = vrot.lane.b32.xlu0 %v3611_v24, %s4076_s27 }
  0x48   :  { %3627 = vrot.lane.b32.xlu1 %v3611_v24, %s4078_s29 }
  0x49   :  { %3622 = vrot.lane.b32.xlu0 %v3611_v24, %s4077_s28 }
  0x4c   :  { %3637 = vrot.lane.b32.xlu1 %v4215_v22, %s4077_s28 }
  0x4d   :  { %3632 = vrot.lane.b32.xlu0 %v3611_v24, %s4079_s30  ;;  %v8453_v24 = vmov 0 }
  0x4e   :  { %v8454_v24 = vsel %vm4484_vm7, 4294967295, %v8453_v24  ;;  %vm8014_vm7 = vcmp.lt.s32.totalorder %v4265_v36, 32 }
  0x4f   :  { %8455 = vst [vmem:[#allocation18_spill] sm:$0xff] %v8454_v24  ;;  %vm278_vm2 = vmand %vm4480_vm4, %vm8014_vm7  ;;  %vm8021_vm7 = vcmp.ge.s32.totalorder %v4545_v49, 0 }
  0x50   :  { %3647 = vrot.lane.b32.xlu1 %v4215_v22, %s4079_s30  ;;  %v4565_v35 = vsel %vm278_vm2, 1, %v8028_v3  ;;  %vm8473_vm2 = vcmp.ge.s32.totalorder %v4225_v27, 0 }
  0x51   :  { %3642 = vrot.lane.b32.xlu0 %v4215_v22, %s4078_s29  ;;  %v8448_v22 = vmov 0  ;;  %vm1052_vm0 = vmand %vm4284_vm15, %vm8473_vm2 }
  0x52   :  { %v8449_v22 = vsel %vm4472_vm3, 4294967295, %v8448_v22  ;;  %vm4504_vm3 = vcmp.eq.s32.totalorder %v482_v13, 1 }
  0x53   :  { %8450 = vst [vmem:[#allocation17_spill] sm:$0xff] %v8449_v22  ;;  %v8466_v32 = vsel %vm4504_vm3, 4294967295, %v8465_v32  ;;  %vm8472_vm3 = vcmp.lt.s32.totalorder %v4233_v31, 32 }
  0x54   :  { %3657 = vrot.lane.b32.xlu1 %v4297_v43, %s4073_s22  ;;  %8467 = vst [vmem:[#allocation22_spill] sm:$0xff] %v8466_v32  ;;  %vm903_vm10 = vmand %vm901_vm6, %vm8472_vm3  ;;  %vm8474_vm6 = vcmp.lt.s32.totalorder %v4225_v27, 32  ;;  %v8601_v32 = vmov 0 }
  0x55   :  { %3652 = vrot.lane.b32.xlu0 %v4297_v43, %s4072_s17  ;;  %v4580_v54 = vsel %vm903_vm10, 1, %v8028_v3  ;;  %vm1054_vm3 = vmand %vm1052_vm0, %vm8474_vm6 }
  0x56   :  { %v945_v31 = vrot.slane %v4580_v54, %v4251_v34  ;;  %v941_v56 = vrot.slane %v4580_v54, %v4268_v37  ;;  %v953_v57 = vrot.slane %v4580_v54, %v4303_v45  ;;  %v949_v62 = vrot.slane %v4580_v54, %v4306_v46  ;;  %vm4626_vm0 = vmand %vm584_vm11, %vm586_vm8 }
  0x57   :  { %v4606_v27 = vsel %vm1054_vm3, 1, %v8028_v3  ;;  %vm4646_vm8 = vmand %vm4276_vm13, %vm8021_vm7 }
  0x58   :  { %3667 = vrot.lane.b32.xlu1 %v3666_v7, %s4073_s22  ;;  %vm4609_vm15 = vcmp.eq.s32.totalorder %v945_v31, 1  ;;  %v1096_v10 = vrot.slane %v4606_v27, %v4251_v34  ;;  %vm4615_vm10 = vcmp.eq.s32.totalorder %v941_v56, 1  ;;  %vm4630_vm2 = vcmp.eq.s32.totalorder %v953_v57, 1  ;;  %vm4684_vm13 = vmand %vm4626_vm0, %vm8503_vm14 }
  0x59   :  { %3662 = vrot.lane.b32.xlu0 %v3666_v7, %s4072_s17  ;;  %v8476_v9 = vsel %vm4609_vm15, 4294967295, %v8475_v9  ;;  %v8479_v11 = vsel %vm4615_vm10, 4294967295, %v8478_v11  ;;  %v8484_v15 = vsel %vm4630_vm2, 4294967295, %v8483_v15  ;;  %v1104_v16 = vrot.slane %v4606_v27, %v4303_v45 }
  0x5a   :  { %8477 = vst [vmem:[#allocation24_spill] sm:$0xff] %v8476_v9  ;;  %8480 = vst [vmem:[#allocation25_spill] sm:$0xff] %v8479_v11  ;;  %vm4636_vm6 = vcmp.eq.s32.totalorder %v949_v62, 1  ;;  %v1100_v20 = vrot.slane %v4606_v27, %v4306_v46  ;;  %vm4650_vm11 = vcmp.eq.s32.totalorder %v1096_v10, 1  ;;  %v337_v31 = vrot.slane %v4316_v48, %v4577_v53 }
  0x5b   :  { %8485 = vst [vmem:[#allocation26_spill] sm:$0xff] %v8484_v15  ;;  %v8487_v17 = vsel %vm4636_vm6, 4294967295, %v8486_v17  ;;  %v8492_v23 = vsel %vm4650_vm11, 4294967295, %v8491_v23  ;;  %vm4666_vm7 = vcmp.eq.s32.totalorder %v1104_v16, 1  ;;  %v8500_v56 = vmov 0 }
  0x5c   :  { %3677 = vrot.lane.b32.xlu1 %v4297_v43, %s4074_s23  ;;  %8488 = vst [vmem:[#allocation27_spill] sm:$0xff] %v8487_v17  ;;  %8493 = vst [vmem:[#allocation28_spill] sm:$0xff] %v8492_v23  ;;  %v8498_v39 = vsel %vm4666_vm7, 4294967295, %v8497_v39  ;;  %vm4670_vm4 = vcmp.eq.s32.totalorder %v1100_v20, 1  ;;  %v190_v57 = vrot.slane %v4271_v38, %v4600_v41  ;;  %v345_v62 = vrot.slane %v4316_v48, %v4600_v41 }
  0x5d   :  { %3672 = vrot.lane.b32.xlu0 %v4297_v43, %s4075_s24  ;;  %v4542_v43 = vadd.s32 1, %v4212_v21  ;;  %8499 = vst [vmem:[#allocation30_spill] sm:$0xff] %v8498_v39  ;;  %v8501_v56 = vsel %vm4670_vm4, 4294967295, %v8500_v56  ;;  %vm4692_vm11 = vcmp.eq.s32.totalorder %v182_v42, 1  ;;  %vm4696_vm1 = vcmp.eq.s32.totalorder %v337_v31, 1 }
  0x5e   :  { %8502 = vst [vmem:[#allocation31_spill] sm:$0xff] %v8501_v56  ;;  %v8509_v16 = vmov 0  ;;  %vm4709_vm15 = vcmp.eq.s32.totalorder %v190_v57, 1  ;;  %v8512_v42 = vmov 0  ;;  %vm4713_vm10 = vcmp.eq.s32.totalorder %v345_v62, 1 }
  0x5f   :  { %v8510_v16 = vsel %vm4696_vm1, 4294967295, %v8509_v16  ;;  %v8513_v42 = vsel %vm4709_vm15, 4294967295, %v8512_v42  ;;  %v8515_v31 = vmov 0  ;;  %v341_v11 = vrot.slane %v4316_v48, %v4603_v8 }
  0x60   :  { %3687 = vrot.lane.b32.xlu1 %v3666_v7, %s4074_s23  ;;  %8511 = vst [vmem:[#allocation33_spill] sm:$0xff] %v8510_v16  ;;  %8514 = vst [vmem:[#allocation34_spill] sm:$0xff] %v8513_v42  ;;  %v8516_v31 = vsel %vm4713_vm10, 4294967295, %v8515_v31  ;;  %v8521_v57 = vmov 0  ;;  %v651_v21 = vrot.slane %v4436_v12, %v4577_v53  ;;  %vm4757_vm6 = vcmp.eq.s32.totalorder %v186_v25, 1 }
  0x61   :  { %3682 = vrot.lane.b32.xlu0 %v3666_v7, %s4075_s24  ;;  %v4597_v7 = vsub.s32 4, %v4230_v30  ;;  %v1092_v30 = vrot.slane %v4606_v27, %v4268_v37  ;;  %8517 = vst [vmem:[#allocation35_spill] sm:$0xff] %v8516_v31  ;;  %vm4761_vm4 = vcmp.eq.s32.totalorder %v341_v11, 1  ;;  %v659_v17 = vrot.slane %v4436_v12, %v4600_v41 }
  0x62   :  { %v8537_v25 = vmov 0  ;;  %vm4779_vm14 = vcmp.eq.s32.totalorder %v651_v21, 1  ;;  %v8540_v11 = vmov 0  ;;  %v8546_v21 = vmov 0 }
  0x63   :  { %vm4654_vm3 = vcmp.eq.s32.totalorder %v1092_v30, 1  ;;  %v8506_v30 = vmov 0  ;;  %v178_v20 = vrot.slane %v4271_v38, %v4597_v7  ;;  %v333_v3 = vrot.slane %v4316_v48, %v4597_v7 }
  0x64   :  { %716 = vrot.lane.b32.xlu1 %v4379_v63, %s4076_s27  ;;  %v8495_v40 = vsel %vm4654_vm3, 4294967295, %v8494_v40  ;;  %v8507_v30 = vsel %vm4692_vm11, 4294967295, %v8506_v30  ;;  %vm8518_vm3 = vcmp.lt.s32.totalorder %v4545_v49, 32  ;;  %v8524_v38 = vmov 0 }
  0x65   :  { %3692 = vrot.lane.b32.xlu0 %v3691_v50, %s4076_s27  ;;  %8496 = vst [vmem:[#allocation29_spill] sm:$0xff] %v8495_v40  ;;  %8508 = vst [vmem:[#allocation32_spill] sm:$0xff] %v8507_v30  ;;  %vm4733_vm2 = vcmp.eq.s32.totalorder %v178_v20, 1  ;;  %vm4737_vm7 = vcmp.eq.s32.totalorder %v333_v3, 1  ;;  %v494_v48 = vrot.slane %v4394_v6, %v4577_v53  ;;  %v8531_v3 = vmov 0 }
  0x66   :  { %vm4725_vm9 = vmand %vm4646_vm8, %vm8518_vm3  ;;  %v8522_v57 = vsel %vm4733_vm2, 4294967295, %v8521_v57  ;;  %v8525_v38 = vsel %vm4737_vm7, 4294967295, %v8524_v38  ;;  %vm8527_vm8 = vcmp.lt.s32.totalorder %v4542_v43, 32  ;;  %vm8528_vm3 = vcmp.ge.s32.totalorder %v4542_v43, 0 }
  0x67   :  { %8523 = vst [vmem:[#allocation36_spill] sm:$0xff] %v8522_v57  ;;  %8526 = vst [vmem:[#allocation37_spill] sm:$0xff] %v8525_v38  ;;  %v8532_v3 = vsel %vm4757_vm6, 4294967295, %v8531_v3  ;;  %v8534_v20 = vmov 0  ;;  %v502_v43 = vrot.slane %v4394_v6, %v4600_v41  ;;  %v8541_v11 = vsel %vm4779_vm14, 4294967295, %v8540_v11 }
  0x68   :  { %3702 = vrot.lane.b32.xlu1 %v3691_v50, %s4078_s29  ;;  %vm4749_vm12 = vmand %vm8528_vm3, %vm8527_vm8  ;;  %8533 = vst [vmem:[#allocation38_spill] sm:$0xff] %v8532_v3  ;;  %v8535_v20 = vsel %vm4761_vm4, 4294967295, %v8534_v20  ;;  %vm4775_vm3 = vcmp.eq.s32.totalorder %v494_v48, 1  ;;  %v490_v30 = vrot.slane %v4394_v6, %v4597_v7  ;;  %v647_v16 = vrot.slane %v4436_v12, %v4597_v7 }
  0x69   :  { %3697 = vrot.lane.b32.xlu0 %v3691_v50, %s4077_s28  ;;  %8536 = vst [vmem:[#allocation39_spill] sm:$0xff] %v8535_v20  ;;  %v8538_v25 = vsel %vm4775_vm3, 4294967295, %v8537_v25  ;;  %8542 = vst [vmem:[#allocation41_spill] sm:$0xff] %v8541_v11  ;;  %vm4793_vm15 = vcmp.eq.s32.totalorder %v502_v43, 1  ;;  %v8543_v48 = vmov 0  ;;  %vm4797_vm10 = vcmp.eq.s32.totalorder %v659_v17, 1 }
  0x6a   :  { %8539 = vst [vmem:[#allocation40_spill] sm:$0xff] %v8538_v25  ;;  %v8544_v48 = vsel %vm4793_vm15, 4294967295, %v8543_v48  ;;  %v8547_v21 = vsel %vm4797_vm10, 4294967295, %v8546_v21  ;;  %v498_v42 = vrot.slane %v4394_v6, %v4603_v8  ;;  %v655_v31 = vrot.slane %v4436_v12, %v4603_v8 }
  0x6b   :  { %8545 = vst [vmem:[#allocation42_spill] sm:$0xff] %v8544_v48  ;;  %8548 = vst [vmem:[#allocation43_spill] sm:$0xff] %v8547_v21  ;;  %v134_v57 = vrot.slane %v4556_v52, %v4251_v34  ;;  %vm4814_vm2 = vcmp.eq.s32.totalorder %v490_v30, 1  ;;  %v8550_v17 = vmov 0  ;;  %vm4818_vm7 = vcmp.eq.s32.totalorder %v647_v16, 1 }
  0x6c   :  { %867 = vrot.lane.b32.xlu1 %v4379_v63, %s4077_s28  ;;  %v8551_v17 = vsel %vm4814_vm2, 4294967295, %v8550_v17  ;;  %v8553_v6 = vmov 0  ;;  %v130_v12 = vrot.slane %v4556_v52, %v4268_v37  ;;  %v142_v43 = vrot.slane %v4556_v52, %v4303_v45 }
  0x6d   :  { %3707 = vrot.lane.b32.xlu0 %v3691_v50, %s4079_s30  ;;  %8552 = vst [vmem:[#allocation44_spill] sm:$0xff] %v8551_v17  ;;  %v8554_v6 = vsel %vm4818_vm7, 4294967295, %v8553_v6  ;;  %vm4830_vm8 = vcmp.eq.s32.totalorder %v498_v42, 1  ;;  %v8556_v30 = vmov 0  ;;  %vm4834_vm6 = vcmp.eq.s32.totalorder %v655_v31, 1 }
  0x6e   :  { %8555 = vst [vmem:[#allocation45_spill] sm:$0xff] %v8554_v6  ;;  %v8557_v30 = vsel %vm4830_vm8, 4294967295, %v8556_v30  ;;  %v8559_v16 = vmov 0  ;;  %v285_v25 = vrot.slane %v4565_v35, %v4268_v37  ;;  %v138_v11 = vrot.slane %v4556_v52, %v4306_v46 }
  0x6f   :  { %8558 = vst [vmem:[#allocation46_spill] sm:$0xff] %v8557_v30  ;;  %v8560_v16 = vsel %vm4834_vm6, 4294967295, %v8559_v16  ;;  %v297_v42 = vrot.slane %v4565_v35, %v4303_v45  ;;  %v961_v48 = vrot.slane %v4580_v54, %v4577_v53  ;;  %v1112_v21 = vrot.slane %v4606_v27, %v4577_v53 }
  0x70   :  { %1177 = vrot.lane.b32.xlu1 %v4379_v63, %s4079_s30  ;;  %8561 = vst [vmem:[#allocation47_spill] sm:$0xff] %v8560_v16  ;;  %vm4872_vm3 = vcmp.eq.s32.totalorder %v134_v57, 1  ;;  %v8563_v17 = vmov 0  ;;  %vm4876_vm14 = vcmp.eq.s32.totalorder %v130_v12, 1  ;;  %v8566_v6 = vmov 0 }
  0x71   :  { %1026 = vrot.lane.b32.xlu0 %v4379_v63, %s4078_s29  ;;  %v8549_v63 = vlaneseq  ;;  %v8564_v17 = vsel %vm4872_vm3, 4294967295, %v8563_v17  ;;  %v8567_v6 = vsel %vm4876_vm14, 4294967295, %v8566_v6  ;;  %vm4880_vm4 = vcmp.eq.s32.totalorder %v142_v43, 1 }
  0x72   :  { %8565 = vst [vmem:[#allocation49_spill] sm:$0xff] %v8564_v17  ;;  %8568 = vst [vmem:[#allocation50_spill] sm:$0xff] %v8567_v6  ;;  %v8569_v30 = vmov 0  ;;  %v293_v16 = vrot.slane %v4565_v35, %v4306_v46  ;;  %vm8572_vm11 = vcmp.lt.s32.totalorder %v4300_v44, 32  ;;  %v8575_v12 = vmov 0 }
  0x73   :  { %v4806_v56 = vand.u32 127, %v8549_v63  ;;  %v289_v63 = vrot.slane %v4565_v35, %v4251_v34  ;;  %v8570_v30 = vsel %vm4880_vm4, 4294967295, %v8569_v30  ;;  %vm4890_vm8 = vmand %vm4684_vm13, %vm8572_vm11  ;;  %vm4900_vm2 = vcmp.eq.s32.totalorder %v285_v25, 1 }
  0x74   :  { %3717 = vrot.lane.b32.xlu1 %v4553_v51, %s4073_s22  ;;  %8571 = vst [vmem:[#allocation51_spill] sm:$0xff] %v8570_v30  ;;  %v8578_v43 = vmov 0  ;;  %vm4904_vm7 = vcmp.eq.s32.totalorder %v138_v11, 1  ;;  %v8581_v20 = vmov 0  ;;  %vm4908_vm15 = vcmp.eq.s32.totalorder %v961_v48, 1 }
  0x75   :  { %3712 = vrot.lane.b32.xlu0 %v4553_v51, %s4072_s17  ;;  %vm4896_vm6 = vcmp.eq.s32.totalorder %v289_v63, 1  ;;  %v8579_v43 = vsel %vm4900_vm2, 4294967295, %v8578_v43  ;;  %v8582_v20 = vsel %vm4904_vm7, 4294967295, %v8581_v20  ;;  %v8584_v10 = vmov 0 }
  0x76   :  { %v4859_v31 = vpop.permute.xlu1 %3462  ;;  %v8576_v12 = vsel %vm4896_vm6, 4294967295, %v8575_v12  ;;  %8580 = vst [vmem:[#allocation53_spill] sm:$0xff] %v8579_v43  ;;  %8583 = vst [vmem:[#allocation54_spill] sm:$0xff] %v8582_v20  ;;  %v8585_v10 = vsel %vm4908_vm15, 4294967295, %v8584_v10  ;;  %vm4912_vm11 = vcmp.eq.s32.totalorder %v1112_v21, 1  ;;  %v8587_v38 = vmov 0 }
  0x77   :  { %8562 = vst [vmem:[#allocation48_spill] sm:$0xff] %v4859_v31  ;;  %v4870_v3 = vpop.permute.xlu0 %3452  ;;  %8577 = vst [vmem:[#allocation52_spill] sm:$0xff] %v8576_v12  ;;  %v8588_v38 = vsel %vm4912_vm11, 4294967295, %v8587_v38  ;;  %vm4918_vm13 = vcmp.eq.s32.totalorder %v297_v42, 1  ;;  %v8590_v25 = vmov 0  ;;  %v8593_v63 = vmov 0  }
  0x78   :  { %3727 = vrot.lane.b32.xlu1 %v4553_v51, %s4074_s23  ;;  %8586 = vst [vmem:[#allocation55_spill] sm:$0xff] %v8585_v10  ;;  %8589 = vst [vmem:[#allocation56_spill] sm:$0xff] %v8588_v38  ;;  %v8591_v25 = vsel %vm4918_vm13, 4294967295, %v8590_v25  ;;  %v4925_v11 = vsel %vm4725_vm9, 1, %v8593_v63  ;;  %v957_v48 = vrot.slane %v4580_v54, %v4597_v7  ;;  %v1108_v21 = vrot.slane %v4606_v27, %v4597_v7 }
  0x79   :  { %3722 = vrot.lane.b32.xlu0 %v4553_v51, %s4075_s24  ;;  %8592 = vst [vmem:[#allocation57_spill] sm:$0xff] %v8591_v25  ;;  %v3455_v39 = vunpack.i.h.bf16 %v4870_v3  ;;  %v3454_v42 = vunpack.i.l.bf16 %v4870_v3  ;;  %vm8595_vm1 = vcmp.ge.s32.totalorder %v4265_v36, 0  ;;  %v4948_v15 = vsel %vm4890_vm8, 1, %v8593_v63  ;;  %vm8167_vm15 = vmpackc.low %vm4896_vm6, %vm4872_vm3 }
  0x7a   :  { %v4934_v40 = vpop.permute.xlu1 %3467  ;;  %vm4941_vm9 = vmand %vm4749_vm12, %vm8595_vm1  ;;  %vm4952_vm7 = vcmp.eq.s32.totalorder %v293_v16, 1  ;;  %v8598_v23 = vmov 0  ;;  %vm4960_vm10 = vcmp.eq.s32.totalorder %v957_v48, 1  ;;  %vm4964_vm8 = vcmp.eq.s32.totalorder %v1108_v21, 1 }
  0x7b   :  { %8594 = vst [vmem:[#allocation58_spill] sm:$0xff] %v4934_v40  ;;  %v3458_v3 = vpop.permute.xlu0 %3457  ;;  %v8599_v23 = vsel %vm4952_vm7, 4294967295, %v8598_v23  ;;  %v8602_v32 = vsel %vm4960_vm10, 4294967295, %v8601_v32  ;;  %v8604_v57 = vmov 0  ;;  %v3470_v9 = vunpack.i.h.bf16 %v4934_v40 }
  0x7c   :  { %8600 = vst [vmem:[#allocation59_spill] sm:$0xff] %v8599_v23  ;;  %8603 = vst [vmem:[#allocation60_spill] sm:$0xff] %v8602_v32  ;;  %v8605_v57 = vsel %vm4964_vm8, 4294967295, %v8604_v57  ;;  %v3460_v33 = vunpack.i.h.bf16 %v3458_v3  ;;  %v3459_v16 = vunpack.i.l.bf16 %v3458_v3  ;;  %722 = vrot.lane.b32.xlu1 %v4137_v1, %s4076_s27  ;;  %v446_v10 = vrot.slane %v4925_v11, %v4251_v34 }
  0x7d   :  { %8606 = vst [vmem:[#allocation61_spill] sm:$0xff] %v8605_v57  ;;  %v3465_v48 = vunpack.i.h.bf16 %v4859_v31  ;;  %3732 = vrot.lane.b32.xlu0 %v4553_v51, %s4076_s27  ;;  %v603_v21 = vrot.slane %v4948_v15, %v4251_v34  ;;  %v969_v3 = vrot.slane %v4580_v54, %v4600_v41  ;;  %v1120_v38 = vrot.slane %v4606_v27, %v4600_v41 }
  0x7e   :  { %v4986_v28 = vpop.permute.xlu1 %3477  ;;  %vm8607_vm5 = vcmp.lt.s32.totalorder %v4806_v56, 33  ;;  %vm8608_vm1 = vcmp.lt.s32.totalorder %v4806_v56, 32  ;;  %vm8609_vm10 = vcmp.lt.s32.totalorder %v4265_v36, 32  ;;  %v8612_v19 = vunpack.i.l.bf16 %v4859_v31 }
  0x7f   :  { %v105_v32 = vsel %vm8607_vm5, %v3454_v42, %v3455_v39  ;;  %v270_v57 = vsel %vm8608_vm1, %v3459_v16, %v3460_v33  ;;  %vm4996_vm8 = vmand %vm4941_vm9, %vm8609_vm10  ;;  %v8613_v14 = vunpack.i.l.bf16 %v4934_v40  ;;  %v8169_v50 = vunpack.i.l.bf16 %v4986_v28  ;;  %v5013_v24 = vpop.permute.xlu0 %3472 }
  0x80   :  { %v8611_v29 = vsel %vm4996_vm8, 4294967295, %v8610_v29  ;;  %v106_v26 = vsel %vm8607_vm5, %v8612_v19, %v3454_v42  ;;  %v3026_v0 = vpack.c.bf16 %v270_v57, %v105_v32  ;;  %v442_v31 = vrot.slane %v4925_v11, %v4268_v37  ;;  %3742 = vrot.lane.b32.xlu1 %v4553_v51, %s4078_s29  ;;  %vm8614_vm5 = vmmov %vm8608_vm1 }
  0x81   :  { %v271_v36 = vsel %vm8608_vm1, %v8613_v14, %v3459_v16  ;;  %v8170_v19 = vunpack.i.l.bf16 %v5013_v24  ;;  %v269_v14 = vsel %vm8614_vm5, %v3460_v33, %v3470_v9  ;;  %vm5030_vm1 = vcmp.eq.s32.totalorder %v446_v10, 1  ;;  %3737 = vrot.lane.b32.xlu0 %v4553_v51, %s4077_s28 }
  0x82   :  { %v3029_v4 = vpack.c.bf16 %v271_v36, %v106_v26  ;;  %v8615_v32 = vmov 0  ;;  %v599_v26 = vrot.slane %v4948_v15, %v4268_v37  ;;  %3027 = vmatprep.subr.msk.bf16.mxu0 %vm8167_vm15, %v3026_v0  ;;  %v268_v33 = vsel %vm8614_vm5, %v3470_v9, %v8169_v50  ;;  %vm8630_vm5 = vmpackc.low %vm4900_vm2, %vm4876_vm14  ;;  %v3488_v9 = vpop.permute.xlu1 %3487 }
  0x83   :  { %v8616_v32 = vsel %vm5030_vm1, 4294967295, %v8615_v32  ;;  %vm5047_vm9 = vcmp.eq.s32.totalorder %v603_v21, 1  ;;  %v8618_v10 = vmov 0  ;;  %vm8621_vm10 = vcmp.ge.s32.totalorder %v4545_v49, 0  ;;  %v3483_v36 = vpop.permute.xlu0 %3482 }
  0x84   :  { %8617 = vst [vmem:[#allocation62_spill] sm:$0xff] %v8616_v32  ;;  %v8619_v10 = vsel %vm5047_vm9, 4294967295, %v8618_v10  ;;  %vm5055_vm11 = vmand %vm4626_vm0, %vm8621_vm10  ;;  %vm5059_vm8 = vcmp.eq.s32.totalorder %v969_v3, 1  ;;  %v8624_v57 = vmov 0  ;;  %vm5063_vm15 = vcmp.eq.s32.totalorder %v1120_v38, 1  ;;  %3030 = vmatpush1.bf16.msk.msra.mxu0 %vm8630_vm5, %v3029_v4  ;;  %873 = vrot.lane.b32.xlu1 %v4137_v1, %s4077_s28 }
  0x85   :  { %8620 = vst [vmem:[#allocation63_spill] sm:$0xff] %v8619_v10  ;;  %v8625_v57 = vsel %vm5059_vm8, 4294967295, %v8624_v57  ;;  %v8627_v0 = vmov 0  ;;  %vm8631_vm0 = vcmp.lt.s32.totalorder %v4806_v56, 33  ;;  %v965_v38 = vrot.slane %v4580_v54, %v4603_v8  ;;  %3747 = vrot.lane.b32.xlu0 %v4553_v51, %s4079_s30 }
  0x86   :  { %8626 = vst [vmem:[#allocation64_spill] sm:$0xff] %v8625_v57  ;;  %v8628_v0 = vsel %vm5063_vm15, 4294967295, %v8627_v0  ;;  %v103_v13 = vsel %vm8631_vm0, %v3465_v48, %v8170_v19  ;;  %vm8632_vm10 = vmmov %vm8631_vm0  ;;  %v1116_v4 = vrot.slane %v4606_v27, %v4603_v8  ;;  %v3490_v21 = vunpack.i.h.bf16 %v3488_v9 }
  0x87   :  { %8629 = vst [vmem:[#allocation65_spill] sm:$0xff] %v8628_v0  ;;  %v104_v16 = vsel %vm8632_vm10, %v3455_v39, %v3465_v48  ;;  %v3489_v3 = vunpack.i.l.bf16 %v3488_v9  ;;  %v3052_v50 = vpack.c.bf16 %v268_v33, %v103_v13  ;;  %vm8633_vm5 = vnez %v8582_v20 }
  0x88   :  { %v3055_v39 = vpack.c.bf16 %v269_v14, %v104_v16  ;;  %v3485_v48 = vunpack.i.h.bf16 %v3483_v36  ;;  %v3484_v19 = vunpack.i.l.bf16 %v3483_v36  ;;  %vm8634_vm10 = vcmp.lt.s32.totalorder %v4545_v49, 32  ;;  %v5147_v36 = vpop.permute.xlu0 %3492  ;;  %1183 = vrot.lane.b32.xlu1 %v4137_v1, %s4079_s30 }
  0x89   :  { %vm5096_vm3 = vmand %vm5055_vm11, %vm8634_vm10  ;;  %vm5100_vm14 = vcmp.eq.s32.totalorder %v965_v38, 1  ;;  %v8637_v27 = vmov 0  ;;  %vm5104_vm2 = vcmp.eq.s32.totalorder %v1116_v4, 1  ;;  %v8640_v33 = vmov 0  ;;  %8651 = vst [vmem:[#allocation70_spill] sm:$0xff] %v5147_v36  ;;  %1032 = vrot.lane.b32.xlu0 %v4137_v1, %s4078_s29 }
  0x8a   :  { %v8638_v27 = vsel %vm5100_vm14, 4294967295, %v8637_v27  ;;  %v8641_v33 = vsel %vm5104_vm2, 4294967295, %v8640_v33  ;;  %vm8643_vm0 = vcmp.lt.s32.totalorder %v4806_v56, 1  ;;  %vm8644_vm11 = vmpackc.low %vm4918_vm13, %vm4880_vm4  ;;  %v454_v42 = vrot.slane %v4925_v11, %v4303_v45 }
  0x8b   :  { %8639 = vst [vmem:[#allocation66_spill] sm:$0xff] %v8638_v27  ;;  %8642 = vst [vmem:[#allocation67_spill] sm:$0xff] %v8641_v33  ;;  %v582_v14 = vsel %vm8643_vm0, %v3489_v3, %v3490_v21  ;;  %3053 = vmatprep.subr.msk.bf16.mxu1 %vm8644_vm11, %v3052_v50  ;;  %v450_v9 = vrot.slane %v4925_v11, %v4306_v46  ;;  %vm8645_vm10 = vcmp.lt.s32.totalorder %v4806_v56, 31  ;;  %v5132_v50 = vpop.permute.xlu1 %3497  ;;  %vm5138_vm13 = vcmp.eq.s32.totalorder %v442_v31, 1 }
  0x8c   :  { %v425_v51 = vsel %vm8645_vm10, %v3484_v19, %v3485_v48  ;;  %vm8646_vm4 = vmpackc.low %vm4952_vm7, %vm8633_vm5  ;;  %8647 = vst [vmem:[#allocation68_spill] sm:$0xff] %v5132_v50  ;;  %v8648_v13 = vmov 0  ;;  %v611_v16 = vrot.slane %v4948_v15, %v4303_v45  ;;  %v607_v38 = vrot.slane %v4948_v15, %v4306_v46 }
  0x8d   :  { %3056 = vmatpush1.bf16.msk.msra.mxu1 %vm8646_vm4, %v3055_v39  ;;  %vm8179_vm11 = vmpackc.low %vm5047_vm9, %vm5030_vm1  ;;  %v8649_v13 = vsel %vm5138_vm13, 4294967295, %v8648_v13  ;;  %v8181_v4 = vunpack.i.l.bf16 %v5132_v50  ;;  %v3032_v39 = vpack.c.bf16 %v582_v14, %v425_v51  ;;  %vm5149_vm4 = vcmp.eq.s32.totalorder %v599_v26, 1 }
  0x8e   :  { %8650 = vst [vmem:[#allocation69_spill] sm:$0xff] %v8649_v13  ;;  %v8652_v20 = vmov 0  ;;  %v5156_v31 = vsel %vm5096_vm3, 1, %v8593_v63  ;;  %v8182_v23 = vunpack.i.l.bf16 %v5147_v36  ;;  %v3500_v30 = vunpack.i.h.bf16 %v5132_v50  ;;  %vm8655_vm10 = vmmov %vm8643_vm0 }
  0x8f   :  { %v8653_v20 = vsel %vm5149_vm4, 4294967295, %v8652_v20  ;;  %v583_v26 = vsel %vm8655_vm10, %v8181_v4, %v3489_v3  ;;  %v3495_v14 = vunpack.i.h.bf16 %v5147_v36  ;;  %3033 = vmatprep.subr.msk.bf16.mxu0 %vm8179_vm11, %v3032_v39  ;;  %vm8656_vm3 = vcmp.ge.s32.totalorder %v4300_v44, 0  ;;  %v5191_v51 = vpop.permute.xlu1 %3507  ;;  %vm8679_vm2 = vmpackc.low %vm5149_vm4, %vm5138_vm13 }
  0x90   :  { %8654 = vst [vmem:[#allocation71_spill] sm:$0xff] %v8653_v20  ;;  %vm5178_vm0 = vmand %vm4749_vm12, %vm8656_vm3  ;;  %vm8659_vm10 = vnez %v8611_v29  ;;  %vm8660_vm5 = vcmp.lt.s32.totalorder %v4806_v56, 31  ;;  %vm5197_vm11 = vcmp.eq.s32.totalorder %v454_v42, 1  ;;  %v8661_v39 = vmov 0 }
  0x91   :  { %v5185_v3 = vsel %vm8659_vm10, 1, %v8593_v63  ;;  %v426_v1 = vsel %vm8660_vm5, %v8182_v23, %v3484_v19  ;;  %v8662_v39 = vsel %vm5197_vm11, 4294967295, %v8661_v39  ;;  %vm5201_vm1 = vcmp.eq.s32.totalorder %v611_v16, 1  ;;  %v5208_v23 = vpop.permute.xlu0 %3502 }
  0x92   :  { %8663 = vst [vmem:[#allocation72_spill] sm:$0xff] %v8662_v39  ;;  %v8664_v29 = vmov 0  ;;  %v754_v4 = vrot.slane %v5156_v31, %v4251_v34  ;;  %v8193_v19 = vunpack.i.l.bf16 %v5191_v51  ;;  %v3035_v32 = vpack.c.bf16 %v583_v26, %v426_v1 }
  0x93   :  { %v8665_v29 = vsel %vm5201_vm1, 4294967295, %v8664_v29  ;;  %vm5210_vm5 = vcmp.eq.s32.totalorder %v450_v9, 1  ;;  %v8667_v10 = vmov 0  ;;  %vm5214_vm10 = vcmp.eq.s32.totalorder %v607_v38, 1 }
  0x94   :  { %8666 = vst [vmem:[#allocation73_spill] sm:$0xff] %v8665_v29  ;;  %v8668_v10 = vsel %vm5210_vm5, 4294967295, %v8667_v10  ;;  %v8670_v42 = vmov 0  ;;  %v8194_v16 = vunpack.i.l.bf16 %v5208_v23  ;;  %v750_v25 = vrot.slane %v5156_v31, %v4268_v37  ;;  %3036 = vmatpush1.bf16.msk.msra.mxu0 %vm8679_vm2, %v3035_v32 }
  0x95   :  { %8669 = vst [vmem:[#allocation74_spill] sm:$0xff] %v8668_v10  ;;  %v8671_v42 = vsel %vm5214_vm10, 4294967295, %v8670_v42  ;;  %vm8673_vm9 = vcmp.lt.s32.totalorder %v4300_v44, 32  ;;  %vm8676_vm6 = vcmp.lt.s32.totalorder %v4806_v56, 1  ;;  %vm8677_vm14 = vcmp.lt.s32.totalorder %v4806_v56, 31 }
  0x96   :  { %8672 = vst [vmem:[#allocation75_spill] sm:$0xff] %v8671_v42  ;;  %vm5226_vm7 = vmand %vm5178_vm0, %vm8673_vm9  ;;  %v581_v38 = vsel %vm8676_vm6, %v3490_v21, %v3500_v30  ;;  %v424_v26 = vsel %vm8677_vm14, %v3485_v48, %v3495_v14  ;;  %v1064_v44 = vrot.slane %v5185_v3, %v4251_v34  ;;  %v762_v48 = vrot.slane %v5156_v31, %v4303_v45 }
  0x97   :  { %vm8678_vm3 = vmmov %vm8676_vm6  ;;  %v1060_v54 = vrot.slane %v5185_v3, %v4268_v37  ;;  %v758_v13 = vrot.slane %v5156_v31, %v4306_v46  ;;  %vm8684_vm0 = vcmp.ge.s32.totalorder %v4545_v49, 0  ;;  %v3061_v43 = vpack.c.bf16 %v581_v38, %v424_v26 }
  0x98   :  { %v580_v1 = vsel %vm8678_vm3, %v3500_v30, %v8193_v19  ;;  %vm8201_vm9 = vmpackc.low %vm5201_vm1, %vm5197_vm11  ;;  %v5253_v30 = vpop.permute.xlu1 %3517  ;;  %v8689_v62 = vmov 0  ;;  %vm8692_vm13 = vcmp.lt.s32.totalorder %v4806_v56, 127  ;;  %v8721_v29 = vmov 0 }
  0x99   :  { %vm8680_vm6 = vmmov %vm8677_vm14  ;;  %8681 = vst [vmem:[#allocation76_spill] sm:$0xff] %v5253_v30  ;;  %vm5259_vm14 = vcmp.eq.s32.totalorder %v754_v4, 1  ;;  %v5273_v4 = vsel %vm5226_vm7, 1, %v8593_v63  ;;  %v3520_v9 = vunpack.i.h.bf16 %v5253_v30  ;;  %v8693_v38 = vunpack.i.l.bf16 %v5253_v30 }
  0x9a   :  { %v423_v21 = vsel %vm8680_vm6, %v3495_v14, %v8194_v16  ;;  %v3513_v14 = vpop.permute.xlu0 %3512  ;;  %vm5279_vm3 = vmand %vm4749_vm12, %vm8684_vm0  ;;  %vm5283_vm6 = vcmp.eq.s32.totalorder %v750_v25, 1  ;;  %vm8210_vm12 = vmmov 1   ;;  %vm8219_vm0 = vcmp.lt.s32.totalorder %v4806_v56, 96 }
  0x9b   :  { %v3058_v16 = vpack.c.bf16 %v580_v1, %v423_v21  ;;  %v3515_v6 = vunpack.i.h.bf16 %v3513_v14  ;;  %v3514_v19 = vunpack.i.l.bf16 %v3513_v14  ;;  %vm5297_vm7 = vmpackc.low %vm5259_vm14, %vm8210_vm12  ;;  %v8704_v1 = vmov 0 }
  0x9c   :  { %v8690_v62 = vsel %vm5297_vm7, 4294967295, %v8689_v62  ;;  %vm8694_vm11 = vmmov %vm8692_vm13  ;;  %v5314_v26 = vpop.permute.xlu1 %3527  ;;  %v8718_v14 = vmov 0  ;;  %v917_v42 = vrot.slane %v5273_v4, %v4306_v46  ;;  %v150_v39 = vrot.slane %v4556_v52, %v4577_v53 }
  0x9d   :  { %3059 = vmatprep.subr.msk.bf16.mxu1 %vm8201_vm9, %v3058_v16  ;;  %8691 = vst [vmem:[#allocation77_spill] sm:$0xff] %v8690_v62  ;;  %v738_v25 = vsel %vm8692_vm13, %v3514_v19, %v3515_v6  ;;  %v739_v16 = vsel %vm8694_vm11, %v8693_v38, %v3514_v19  ;;  %vm8695_vm14 = vmpackc.low %vm5214_vm10, %vm5210_vm5  ;;  %vm8696_vm9 = vcmp.lt.s32.totalorder %v4545_v49, 32  ;;  %v8697_v19 = vmov 0 }
  0x9e   :  { %3062 = vmatpush1.bf16.msk.msra.mxu1 %vm8695_vm14, %v3061_v43  ;;  %vm1204_vm2 = vmand %vm5279_vm3, %vm8696_vm9  ;;  %v5320_v21 = vpop.permute.xlu0 %3522  ;;  %v3038_v32 = vpack.c.bf16 %v738_v25, %v4150_v5  ;;  %v3041_v43 = vpack.c.bf16 %v739_v16, %v4142_v2  ;;  %vm5331_vm11 = vcmp.eq.s32.totalorder %v762_v48, 1  ;;  %v913_v49 = vrot.slane %v5273_v4, %v4251_v34  ;;  %v4058_v5 = vld [vmem:[%s7977_s0 + $0x10] sm:$0xff] }
  0x9f   :  { %vm5326_vm13 = vmpackc.low %vm5283_vm6, %vm8210_vm12  ;;  %v8203_v20 = vunpack.i.l.bf16 %v5320_v21  ;;  %vm5338_vm9 = vcmp.eq.s32.totalorder %v758_v13, 1  ;;  %vm5342_vm3 = vcmp.eq.s32.totalorder %v1064_v44, 1  ;;  %vm5346_vm6 = vcmp.eq.s32.totalorder %v1060_v54, 1 }
  0xa0   :  { %v8698_v19 = vsel %vm5326_vm13, 4294967295, %v8697_v19  ;;  %v8705_v1 = vsel %vm5342_vm3, 4294967295, %v8704_v1  ;;  %v8707_v25 = vmov 0  ;;  %vm8710_vm14 = vcmp.lt.s32.totalorder %v4806_v56, 127  ;;  %3039 = vmatprep.subr.msk.bf16.mxu0 %vm5297_vm7, %v3038_v32  ;;  %v5369_v16 = vpop.permute.xlu1 %3537 }
  0xa1   :  { %8699 = vst [vmem:[#allocation78_spill] sm:$0xff] %v8698_v19  ;;  %8706 = vst [vmem:[#allocation79_spill] sm:$0xff] %v8705_v1  ;;  %v8708_v25 = vsel %vm5346_vm6, 4294967295, %v8707_v25  ;;  %v737_v2 = vsel %vm8710_vm14, %v3515_v6, %v3520_v9  ;;  %v909_v13 = vrot.slane %v5273_v4, %v4268_v37  ;;  %v5357_v48 = vsel %vm1204_vm2, 1, %v8593_v63  ;;  %3042 = vmatpush1.bf16.msk.msra.mxu0 %vm5326_vm13, %v3041_v43 }
  0xa2   :  { %8709 = vst [vmem:[#allocation80_spill] sm:$0xff] %v8708_v25  ;;  %v1072_v44 = vrot.slane %v5185_v3, %v4303_v45  ;;  %v3529_v38 = vunpack.i.l.bf16 %v5314_v26  ;;  %v736_v6 = vsel %vm8710_vm14, %v3520_v9, %v8203_v20  ;;  %8711 = vst [vmem:[#allocation81_spill] sm:$0xff] %v5369_v16  ;;  %v8712_v32 = vmov 0  ;;  %v5380_v10 = vpop.permute.xlu0 %3532  ;;  %v4057_v9 = vld [vmem:[%s7977_s0 + $0x18] sm:$0xff] }
  0xa3   :  { %vm5374_vm2 = vmpackc.low %vm5331_vm11, %vm8210_vm12  ;;  %v1068_v54 = vrot.slane %v5185_v3, %v4306_v46  ;;  %v3064_v20 = vpack.c.bf16 %v736_v6, %v4057_v9  ;;  %v8715_v43 = vmov 0  ;;  %vm5392_vm11 = vcmp.eq.s32.totalorder %v913_v49, 1 }
  0xa4   :  { %v8713_v32 = vsel %vm5374_vm2, 4294967295, %v8712_v32  ;;  %vm5388_vm14 = vmpackc.low %vm5338_vm9, %vm8210_vm12  ;;  %v8719_v14 = vsel %vm5392_vm11, 4294967295, %v8718_v14  ;;  %v921_v19 = vrot.slane %v5273_v4, %v4303_v45  ;;  %v3534_v6 = vunpack.i.l.bf16 %v5380_v10  ;;  %v5430_v12 = vpop.permute.xlu1 %3547 }
  0xa5   :  { %8714 = vst [vmem:[#allocation82_spill] sm:$0xff] %v8713_v32  ;;  %v8716_v43 = vsel %vm5388_vm14, 4294967295, %v8715_v43  ;;  %8720 = vst [vmem:[#allocation84_spill] sm:$0xff] %v8719_v14  ;;  %v3067_v9 = vpack.c.bf16 %v737_v2, %v4058_v5  ;;  %v1211_v49 = vrot.slane %v5357_v48, %v4268_v37  ;;  %3065 = vmatprep.subr.msk.bf16.mxu1 %vm5374_vm2, %v3064_v20  ;;  %vm5409_vm9 = vcmp.eq.s32.totalorder %v909_v13, 1 }
  0xa6   :  { %8717 = vst [vmem:[#allocation83_spill] sm:$0xff] %v8716_v43  ;;  %v8722_v29 = vsel %vm5409_vm9, 4294967295, %v8721_v29  ;;  %v305_v62 = vrot.slane %v4565_v35, %v4577_v53  ;;  %v146_v17 = vrot.slane %v4556_v52, %v4597_v7  ;;  %v8724_v2 = vunpack.i.h.bf16 %v5314_v26  ;;  %8727 = vst [vmem:[#allocation86_spill] sm:$0xff] %v5430_v12  ;;  %v5440_v33 = vpop.permute.xlu0 %3542 }
  0xa7   :  { %8723 = vst [vmem:[#allocation85_spill] sm:$0xff] %v8722_v29  ;;  %vm8725_vm12 = vcmp.lt.s32.totalorder %v4806_v56, 97  ;;  %v8726_v13 = vunpack.i.h.bf16 %v5380_v10  ;;  %3068 = vmatpush1.bf16.msk.msra.mxu1 %vm5388_vm14, %v3067_v9  ;;  %v3550_v20 = vunpack.i.h.bf16 %v5430_v12  ;;  %8728 = vst [vmem:[#allocation87_spill] sm:$0xff] %v5440_v33  ;;  %v8729_v9 = vmov 0 }
  0xa8   :  { %v889_v5 = vsel %vm8725_vm12, %v3529_v38, %v8724_v2  ;;  %v301_v2 = vrot.slane %v4565_v35, %v4597_v7  ;;  %vm5446_vm14 = vcmp.eq.s32.totalorder %v1072_v44, 1  ;;  %v8731_v43 = vmov 0  ;;  %vm8740_vm5 = vmpackc.low %vm5342_vm3, %vm5392_vm11 }
  0xa9   :  { %v1048_v32 = vsel %vm8219_vm0, %v3534_v6, %v8726_v13  ;;  %vm5442_vm0 = vcmp.eq.s32.totalorder %v921_v19, 1  ;;  %v8732_v43 = vsel %vm5446_vm14, 4294967295, %v8731_v43  ;;  %v158_v57 = vrot.slane %v4556_v52, %v4600_v41 }
  0xaa   :  { %v3044_v13 = vpack.c.bf16 %v1048_v32, %v889_v5  ;;  %v8730_v9 = vsel %vm5442_vm0, 4294967295, %v8729_v9  ;;  %v1215_v27 = vrot.slane %v5357_v48, %v4251_v34  ;;  %vm5455_vm13 = vcmp.eq.s32.totalorder %v1211_v49, 1  ;;  %v3553_v36 = vpop.permute.xlu0 %3552 }
  0xab   :  { %v8733_v30 = vmov 0  ;;  %vm5459_vm12 = vcmp.eq.s32.totalorder %v917_v42, 1  ;;  %v8736_v19 = vmov 0  ;;  %vm5463_vm2 = vcmp.eq.s32.totalorder %v1068_v54, 1 }
  0xac   :  { %v8734_v30 = vsel %vm5455_vm13, 4294967295, %v8733_v30  ;;  %v8737_v19 = vsel %vm5459_vm12, 4294967295, %v8736_v19  ;;  %v8738_v44 = vmov 0  ;;  %v313_v32 = vrot.slane %v4565_v35, %v4600_v41  ;;  %3045 = vmatprep.subr.msk.bf16.mxu0 %vm8740_vm5, %v3044_v13 }
  0xad   :  { %8735 = vst [vmem:[#allocation88_spill] sm:$0xff] %v8734_v30  ;;  %v8739_v44 = vsel %vm5463_vm2, 4294967295, %v8738_v44  ;;  %v8741_v49 = vunpack.i.l.bf16 %v5430_v12  ;;  %vm8742_vm10 = vcmp.lt.s32.totalorder %v4806_v56, 95  ;;  %v1223_v54 = vrot.slane %v5357_v48, %v4303_v45 }
  0xae   :  { %v154_v5 = vrot.slane %v4556_v52, %v4603_v8  ;;  %v309_v0 = vrot.slane %v4565_v35, %v4603_v8  ;;  %v8743_v1 = vunpack.i.l.bf16 %v5369_v16  ;;  %vm8744_vm1 = vcmp.lt.s32.totalorder %v4806_v56, 97  ;;  %v5554_v29 = vpop.permute.xlu0 %3562 }
  0xaf   :  { %v1200_v42 = vsel %vm8742_vm10, %v8741_v49, %v3550_v20  ;;  %v8745_v13 = vunpack.i.l.bf16 %v5440_v33  ;;  %vm8746_vm5 = vcmp.lt.s32.totalorder %v4806_v56, 96  ;;  %v5492_v49 = vpop.permute.xlu1 %3557  ;;  %v1219_v52 = vrot.slane %v5357_v48, %v4306_v46  ;;  %vm8761_vm10 = vmpackc.low %vm5346_vm6, %vm5409_vm9 }
  0xb0   :  { %v890_v14 = vsel %vm8744_vm1, %v8743_v1, %v3529_v38  ;;  %v462_v35 = vrot.slane %v4925_v11, %v4577_v53  ;;  %v1288_v38 = vsel %vm5455_vm13, %v1200_v42, 0.0  ;;  %vm5504_vm1 = vcmp.eq.s32.totalorder %v150_v39, 1 }
  0xb1   :  { %v1049_v12 = vsel %vm8746_vm5, %v8745_v13, %v3534_v6  ;;  %v8747_v6 = vmov 0  ;;  %vm5508_vm5 = vcmp.eq.s32.totalorder %v305_v62, 1  ;;  %v8750_v13 = vmov 0 }
  0xb2   :  { %v3047_v1 = vpack.c.bf16 %v1049_v12, %v890_v14  ;;  %v8748_v6 = vsel %vm5504_vm1, 4294967295, %v8747_v6  ;;  %v8751_v13 = vsel %vm5508_vm5, 4294967295, %v8750_v13  ;;  %v619_v50 = vrot.slane %v4948_v15, %v4577_v53  ;;  %v3573_v22 = vpop.permute.xlu0 %3572 }
  0xb3   :  { %8749 = vst [vmem:[#allocation89_spill] sm:$0xff] %v8748_v6  ;;  %v3555_v46 = vunpack.i.h.bf16 %v3553_v36  ;;  %v3554_v12 = vunpack.i.l.bf16 %v3553_v36  ;;  %vm5516_vm11 = vcmp.eq.s32.totalorder %v1215_v27, 1  ;;  %v8752_v14 = vmov 0 }
  0xb4   :  { %v8753_v14 = vsel %vm5516_vm11, 4294967295, %v8752_v14  ;;  %vm5520_vm13 = vcmp.eq.s32.totalorder %v146_v17, 1  ;;  %v8755_v39 = vmov 0  ;;  %vm5524_vm3 = vcmp.eq.s32.totalorder %v301_v2, 1  ;;  %3048 = vmatpush1.bf16.msk.msra.mxu0 %vm8761_vm10, %v3047_v1 }
  0xb5   :  { %8754 = vst [vmem:[#allocation90_spill] sm:$0xff] %v8753_v14  ;;  %v8756_v39 = vsel %vm5520_vm13, 4294967295, %v8755_v39  ;;  %v8758_v62 = vmov 0  ;;  %v615_v42 = vrot.slane %v4948_v15, %v4597_v7  ;;  %v3545_v30 = vunpack.i.h.bf16 %v5440_v33  ;;  %v5546_v33 = vpop.permute.xlu1 %3567 }
  0xb6   :  { %8757 = vst [vmem:[#allocation91_spill] sm:$0xff] %v8756_v39  ;;  %v8759_v62 = vsel %vm5524_vm3, 4294967295, %v8758_v62  ;;  %vm5537_vm7 = vcmp.eq.s32.totalorder %v1223_v54, 1  ;;  %v8762_v17 = vmov 0  ;;  %v470_v27 = vrot.slane %v4925_v11, %v4600_v41 }
  0xb7   :  { %8760 = vst [vmem:[#allocation92_spill] sm:$0xff] %v8759_v62  ;;  %v8763_v17 = vsel %vm5537_vm7, 4294967295, %v8762_v17  ;;  %v3480_v36 = vunpack.i.h.bf16 %v4986_v28  ;;  %vm8764_vm4 = vcmp.lt.s32.totalorder %v4806_v56, 95  ;;  %v1368_v40 = vpack.c.bf16 %v1288_v38, %v1288_v38 }
  0xb8   :  { %v1199_v2 = vsel %vm8764_vm4, %v3550_v20, %v3554_v12  ;;  %vm5548_vm8 = vcmp.eq.s32.totalorder %v1219_v52, 1  ;;  %v8765_v25 = vmov 0  ;;  %v3540_v54 = vunpack.i.h.bf16 %v5369_v16  ;;  %vm8767_vm10 = vmmov %vm8764_vm4 }
  0xb9   :  { %v8766_v25 = vsel %vm5548_vm8, 4294967295, %v8765_v25  ;;  %v1289_v37 = vsel %vm5516_vm11, %v1199_v2, 0.0  ;;  %v1198_v45 = vsel %vm8767_vm10, %v3554_v12, %v3555_v46  ;;  %vm5560_vm4 = vcmp.eq.s32.totalorder %v158_v57, 1 }
  0xba   :  { %v8768_v20 = vmov 0  ;;  %vm5564_vm9 = vcmp.eq.s32.totalorder %v313_v32, 1  ;;  %v8770_v52 = vmov 0  ;;  %v3475_v38 = vunpack.i.h.bf16 %v5013_v24 }
  0xbb   :  { %v8769_v20 = vsel %vm5560_vm4, 4294967295, %v8768_v20  ;;  %v8771_v52 = vsel %vm5564_vm9, 4294967295, %v8770_v52  ;;  %v1369_v16 = vpack.c.bf16 %v1289_v37, %v1289_v37  ;;  %vm5570_vm6 = vcmp.eq.s32.totalorder %v154_v5, 1 }
  0xbc   :  { %v8772_v34 = vmov 0  ;;  %vm5574_vm11 = vcmp.eq.s32.totalorder %v309_v0, 1  ;;  %v8774_v2 = vmov 0  ;;  %v627_v57 = vrot.slane %v4948_v15, %v4600_v41 }
  0xbd   :  { %v8773_v34 = vsel %vm5570_vm6, 4294967295, %v8772_v34  ;;  %v8775_v2 = vsel %vm5574_vm11, 4294967295, %v8774_v2  ;;  %v8776_v32 = vunpack.i.h.bf16 %v5380_v10  ;;  %vm8777_vm10 = vcmp.lt.s32.totalorder %v4806_v56, 96 }
  0xbe   :  { %v8778_v14 = vunpack.i.l.bf16 %v5492_v49  ;;  %vm8779_vm15 = vcmp.lt.s32.totalorder %v4806_v56, 97  ;;  %v8780_v5 = vunpack.i.l.bf16 %v5546_v33  ;;  %vm8781_vm6 = vcmp.lt.s32.totalorder %v4806_v56, 95  ;;  %vm8783_vm11 = vmmov %vm8777_vm10 }
  0xbf   :  { %v1047_v12 = vsel %vm8777_vm10, %v8776_v32, %v3545_v30  ;;  %v466_v1 = vrot.slane %v4925_v11, %v4603_v8  ;;  %v8782_v60 = vunpack.i.l.bf16 %v5554_v29  ;;  %vm8784_vm9 = vcmask 1043456   ;;  %v3578_v32 = vpop.permute.xlu1 %3577 }
  0xc0   :  { %v887_v37 = vsel %vm8779_vm15, %v3540_v54, %v8778_v14  ;;  %v1197_v0 = vsel %vm8781_vm6, %v3555_v46, %v8780_v5  ;;  %3049 = vmatprep.subr.msk.bf16.mxu0 %vm8784_vm9, %v1369_v16  ;;  %vm8785_vm10 = vmmov %vm8784_vm9  ;;  %v1290_v14 = vsel %vm5548_vm8, %v1198_v45, 0.0  ;;  %v8786_v5 = vunpack.i.l.bf16 %v4986_v28  ;;  %v5623_v45 = vld [vmem:[%s7980_s3] sm:$0xf] }
  0xc1   :  { %v1046_v10 = vsel %vm8783_vm11, %v3545_v30, %v8782_v60  ;;  %v1390_v61 = vsel %vm8785_vm10, %v1368_v40, 0  ;;  %vm8274_vm15 = vmpackc.low %vm5446_vm14, %vm5442_vm0  ;;  %v1291_v46 = vsel %vm5537_vm7, %v1197_v0, 0.0  ;;  %vm8787_vm6 = vcmp.lt.s32.totalorder %v4806_v56, 32 }
  0xc2   :  { %v267_v60 = vsel %vm8787_vm6, %v8786_v5, %v3480_v36  ;;  %v8788_v30 = vunpack.i.h.bf16 %v5314_v26  ;;  %vm8789_vm11 = vcmp.lt.s32.totalorder %v4806_v56, 97  ;;  %v3579_v16 = vunpack.i.l.bf16 %v3578_v32  ;;  %1446 = vmatpush1.bf16.msra.mxu0 %v1390_v61  ;;  %vm8820_vm8 = vmpackc.low %vm5508_vm5, %vm5504_vm1 }
  0xc3   :  { %v3070_v18 = vpack.c.bf16 %v1046_v10, %v887_v37  ;;  %vm5625_vm10 = vcmp.eq.s32.totalorder %v462_v35, 1  ;;  %v8790_v28 = vmov 0  ;;  %vm5629_vm6 = vcmp.eq.s32.totalorder %v619_v50, 1 }
  0xc4   :  { %v888_v40 = vsel %vm8789_vm11, %v8788_v30, %v3540_v54  ;;  %v8791_v28 = vsel %vm5625_vm10, 4294967295, %v8790_v28  ;;  %v8792_v26 = vmov 0  ;;  %v8794_v61 = vunpack.i.l.bf16 %v5013_v24 }
  0xc5   :  { %v8793_v26 = vsel %vm5629_vm6, 4294967295, %v8792_v26  ;;  %vm8795_vm11 = vcmp.lt.s32.totalorder %v4806_v56, 33  ;;  %v3574_v37 = vunpack.i.l.bf16 %v3573_v22  ;;  %v3073_v0 = vpack.c.bf16 %v1047_v12, %v888_v40  ;;  %3071 = vmatprep.subr.msk.bf16.mxu1 %vm8274_vm15, %v3070_v18  ;;  %v5651_v12 = vpop.permute.xlu1 %3587 }
  0xc6   :  { %v102_v54 = vsel %vm8795_vm11, %v8794_v61, %v3475_v38  ;;  %v1371_v10 = vpack.c.bf16 %v1291_v46, %v1291_v46  ;;  %v3580_v5 = vunpack.i.h.bf16 %v3578_v32  ;;  %vm8796_vm9 = vcmp.lt.s32.totalorder %v4806_v56, 32  ;;  %vm8797_vm7 = vmmov %vm8795_vm11  ;;  %v5673_v46 = vpop.permute.xlu0 %3582 }
  0xc7   :  { %v266_v30 = vsel %vm8796_vm9, %v3480_v36, %v3579_v16  ;;  %v3575_v35 = vunpack.i.h.bf16 %v3573_v22  ;;  %v1370_v50 = vpack.c.bf16 %v1290_v14, %v1290_v14  ;;  %v101_v24 = vsel %vm8797_vm7, %v3475_v38, %v3574_v37  ;;  %vm8798_vm11 = vmpackc.low %vm5463_vm2, %vm5459_vm12 }
  0xc8   :  { %3074 = vmatpush1.bf16.msk.msra.mxu1 %vm8798_vm11, %v3073_v0  ;;  %vm8799_vm0 = vcmask 588800   ;;  %v8800_v18 = vrot.slane %v4925_v11, %v4597_v7  ;;  %v8801_v22 = vmov 0  ;;  %vm5666_vm15 = vcmp.eq.s32.totalorder %v615_v42, 1 }
  0xc9   :  { %3050 = vmatmul.mubr.msk.bf16.vlgmr.msra.gmra.mrb[0].mxu0 %vm8799_vm0, %v5623_v45  ;;  %v8804_v36 = vmov 0  ;;  %v623_v38 = vrot.slane %v4948_v15, %v4603_v8  ;;  %v8282_v32 = vunpack.i.l.bf16 %v5651_v12  ;;  %vm8807_vm11 = vcmask 1043456  }
  0xca   :  { %vm5662_vm7 = vcmp.eq.s32.totalorder %v8800_v18, 1  ;;  %v8805_v36 = vsel %vm5666_vm15, 4294967295, %v8804_v36  ;;  %3075 = vmatprep.subr.msk.bf16.mxu1 %vm8807_vm11, %v1371_v10  ;;  %v3078_v14 = vpack.c.bf16 %v266_v30, %v101_v24  ;;  %vm5680_vm9 = vcmp.eq.s32.totalorder %v470_v27, 1  ;;  %1551 = vmatprep.mubr.bf16.mxu0 %v8593_v63  ;;  %v3593_v24 = vpop.permute.xlu0 %3592 }
  0xcb   :  { %v8802_v22 = vsel %vm5662_vm7, 4294967295, %v8801_v22  ;;  %8806 = vst [vmem:[#allocation94_spill] sm:$0xff] %v8805_v36  ;;  %v8808_v11 = vmov 0  ;;  %vm5684_vm12 = vcmp.eq.s32.totalorder %v627_v57, 1  ;;  %v8811_v42 = vmov 0 }
  0xcc   :  { %8803 = vst [vmem:[#allocation93_spill] sm:$0xff] %v8802_v22  ;;  %v8809_v11 = vsel %vm5680_vm9, 4294967295, %v8808_v11  ;;  %v8812_v42 = vsel %vm5684_vm12, 4294967295, %v8811_v42  ;;  %v770_v15 = vrot.slane %v5156_v31, %v4577_v53  ;;  %v3081_v40 = vpack.c.bf16 %v267_v60, %v102_v54  ;;  %3079 = vmatprep.subr.msk.bf16.mxu0 %vm8820_vm8, %v3078_v14  ;;  %v3598_v54 = vpop.permute.xlu1 %3597 }
  0xcd   :  { %8810 = vst [vmem:[#allocation95_spill] sm:$0xff] %v8809_v11  ;;  %8813 = vst [vmem:[#allocation96_spill] sm:$0xff] %v8812_v42  ;;  %v3510_v61 = vunpack.i.h.bf16 %v5191_v51  ;;  %v3505_v0 = vunpack.i.h.bf16 %v5208_v23  ;;  %v8281_v10 = vunpack.i.l.bf16 %v5673_v46  ;;  %vm5694_vm11 = vcmp.eq.s32.totalorder %v466_v1, 1 }
  0xce   :  { %v8814_v27 = vmov 0  ;;  %vm8817_vm0 = vcmp.lt.s32.totalorder %v4806_v56, 32  ;;  %vm8818_vm2 = vcmp.lt.s32.totalorder %v4806_v56, 33  ;;  %vm8821_vm12 = vcmask 1043456  }
  0xcf   :  { %v8815_v27 = vsel %vm5694_vm11, 4294967295, %v8814_v27  ;;  %v265_v57 = vsel %vm8817_vm0, %v3579_v16, %v3580_v5  ;;  %v100_v30 = vsel %vm8818_vm2, %v3574_v37, %v3575_v35  ;;  %vm8819_vm14 = vmmov %vm8817_vm0  ;;  %v1396_v1 = vsel %vm8821_vm12, %v1370_v50, 0 }
  0xd0   :  { %8816 = vst [vmem:[#allocation97_spill] sm:$0xff] %v8815_v27  ;;  %v264_v60 = vsel %vm8819_vm14, %v3580_v5, %v8282_v32  ;;  %vm8822_vm0 = vmmov %vm8818_vm2  ;;  %1487 = vmatpush1.bf16.msra.mxu1 %v1396_v1  ;;  %vm8824_vm14 = vnez %v8771_v52  ;;  %vm5725_vm1 = vcmp.eq.s32.totalorder %v623_v38, 1  ;;  %v8825_v37 = vmov 0 }
  0xd1   :  { %v99_v16 = vsel %vm8822_vm0, %v3575_v35, %v8281_v10  ;;  %vm8823_vm2 = vmpackc.low %vm5524_vm3, %vm5520_vm13  ;;  %v8826_v37 = vsel %vm5725_vm1, 4294967295, %v8825_v37  ;;  %v778_v5 = vrot.slane %v5156_v31, %v4600_v41  ;;  %v1227_v35 = vrot.slane %v5357_v48, %v4597_v7 }
  0xd2   :  { %3082 = vmatpush1.bf16.msk.msra.mxu0 %vm8823_vm2, %v3081_v40  ;;  %8827 = vst [vmem:[#allocation98_spill] sm:$0xff] %v8826_v37  ;;  %v3599_v50 = vunpack.i.l.bf16 %v3598_v54  ;;  %v3104_v18 = vpack.c.bf16 %v264_v60, %v99_v16  ;;  %vm8828_vm12 = vnez %v8773_v34  ;;  %vm8829_vm0 = vnez %v8775_v2 }
  0xd3   :  { %v766_v38 = vrot.slane %v5156_v31, %v4597_v7  ;;  %v774_v14 = vrot.slane %v5156_v31, %v4603_v8  ;;  %v8830_v40 = vunpack.i.l.bf16 %v5191_v51  ;;  %vm8831_vm8 = vcmp.lt.s32.totalorder %v4806_v56, 1  ;;  %v5769_v51 = vpop.permute.xlu1 %3607 }
  0xd4   :  { %v3107_v10 = vpack.c.bf16 %v265_v57, %v100_v30  ;;  %v3594_v32 = vunpack.i.l.bf16 %v3593_v24  ;;  %vm5745_vm13 = vcmp.eq.s32.totalorder %v770_v15, 1  ;;  %v8832_v60 = vmov 0  ;;  %vm8836_vm3 = vmmov %vm8831_vm8  ;;  %v5785_v57 = vpop.permute.xlu0 %3602 }
  0xd5   :  { %v579_v1 = vsel %vm8831_vm8, %v8830_v40, %v3510_v61  ;;  %v8833_v60 = vsel %vm5745_vm13, 4294967295, %v8832_v60  ;;  %v8834_v16 = vunpack.i.l.bf16 %v5208_v23  ;;  %vm8835_vm2 = vcmp.lt.s32.totalorder %v4806_v56, 31  ;;  %vm8837_vm8 = vmpackc.low %vm8824_vm14, %vm5560_vm4  ;;  %v4062_v40 = vld [vmem:[%s7977_s0 + $0x38] sm:$0xff] }
  0xd6   :  { %v3600_v62 = vunpack.i.h.bf16 %v3598_v54  ;;  %v578_v31 = vsel %vm8836_vm3, %v3510_v61, %v3599_v50  ;;  %v3595_v6 = vunpack.i.h.bf16 %v3593_v24  ;;  %3105 = vmatprep.subr.msk.bf16.mxu1 %vm8837_vm8, %v3104_v18  ;;  %vm8838_vm5 = vcmask 588800   ;;  %vm8839_vm13 = vmmov %vm8835_vm2 }
  0xd7   :  { %v422_v39 = vsel %vm8835_vm2, %v8834_v16, %v3505_v0  ;;  %3076 = vmatmul.mubr.msk.bf16.vlgmr.msra.gmra.mrb[0].mxu1 %vm8838_vm5, %v5623_v45  ;;  %v421_v23 = vsel %vm8839_vm13, %v3505_v0, %v3594_v32  ;;  %vm8840_vm2 = vmpackc.low %vm8829_vm0, %vm8828_vm12  ;;  %vm5775_vm8 = vcmp.eq.s32.totalorder %v778_v5, 1  ;;  %v929_v61 = vrot.slane %v5273_v4, %v4577_v53 }
  0xd8   :  { %3108 = vmatpush1.bf16.msk.msra.mxu1 %vm8840_vm2, %v3107_v10  ;;  %v1080_v0 = vrot.slane %v5185_v3, %v4577_v53  ;;  %1592 = vmatprep.mubr.bf16.mxu1 %v8593_v63  ;;  %v8294_v10 = vunpack.i.l.bf16 %v5769_v51  ;;  %v3084_v30 = vpack.c.bf16 %v578_v31, %v421_v23  ;;  %v925_v54 = vrot.slane %v5273_v4, %v4597_v7  ;;  %vm8848_vm13 = vmmov %vm8836_vm3 }
  0xd9   :  { %vm5793_vm5 = vcmp.eq.s32.totalorder %v1227_v35, 1  ;;  %v8843_v5 = vmov 0  ;;  %v3087_v24 = vpack.c.bf16 %v579_v1, %v422_v39  ;;  %v8293_v18 = vunpack.i.l.bf16 %v5785_v57  ;;  %vm8850_vm12 = vmmov %vm8848_vm13 }
  0xda   :  { %v8844_v5 = vsel %vm5793_vm5, 4294967295, %v8843_v5  ;;  %vm5798_vm2 = vcmp.eq.s32.totalorder %v766_v38, 1  ;;  %v1076_v16 = vrot.slane %v5185_v3, %v4597_v7  ;;  %v3525_v31 = vunpack.i.h.bf16 %v5320_v21  ;;  %vm8851_vm0 = vmpackc.low %vm5629_vm6, %vm5625_vm10 }
  0xdb   :  { %8845 = vst [vmem:[#allocation99_spill] sm:$0xff] %v8844_v5  ;;  %v577_v23 = vsel %vm8848_vm13, %v3599_v50, %v3600_v62  ;;  %vm8849_vm3 = vcmp.lt.s32.totalorder %v4806_v56, 31  ;;  %v576_v39 = vsel %vm8850_vm12, %v3600_v62, %v8294_v10  ;;  %3085 = vmatprep.subr.msk.bf16.mxu0 %vm8851_vm0, %v3084_v30  ;;  %vm8854_vm12 = vnez %v8812_v42 }
  0xdc   :  { %v420_v35 = vsel %vm8849_vm3, %v3594_v32, %v3595_v6  ;;  %vm8852_vm4 = vmmov %vm8849_vm3  ;;  %v5827_v32 = vpop.permute.xlu1 %3617  ;;  %vm5833_vm10 = vcmp.eq.s32.totalorder %v774_v14, 1  ;;  %vm5837_vm0 = vcmp.eq.s32.totalorder %v929_v61, 1  ;;  %v8857_v50 = vmov 0 }
  0xdd   :  { %v419_v38 = vsel %vm8852_vm4, %v3595_v6, %v8293_v18  ;;  %vm8853_vm3 = vmpackc.low %vm5666_vm15, %vm5662_vm7  ;;  %v8858_v50 = vsel %vm5837_vm0, 4294967295, %v8857_v50  ;;  %vm5841_vm4 = vcmp.eq.s32.totalorder %v1080_v0, 1  ;;  %v8859_v6 = vmov 0 }
  0xde   :  { %3088 = vmatpush1.bf16.msk.msra.mxu0 %vm8853_vm3, %v3087_v24  ;;  %v8860_v6 = vsel %vm5841_vm4, 4294967295, %v8859_v6  ;;  %v8303_v30 = vunpack.i.l.bf16 %v5827_v32  ;;  %v3613_v24 = vpop.permute.xlu0 %3612  ;;  %v3110_v18 = vpack.c.bf16 %v576_v39, %v419_v38  ;;  %vm5851_vm13 = vcmp.eq.s32.totalorder %v925_v54, 1  ;;  %vm8869_vm3 = vmpackc.low %vm8854_vm12, %vm5680_vm9 }
  0xdf   :  { %v8861_v14 = vmov 0  ;;  %v3113_v61 = vpack.c.bf16 %v577_v23, %v420_v35  ;;  %v3615_v0 = vunpack.i.h.bf16 %v3613_v24  ;;  %v3614_v10 = vunpack.i.l.bf16 %v3613_v24  ;;  %vm8876_vm9 = vmpackc.low %vm5725_vm1, %vm5694_vm11 }
  0xe0   :  { %v8862_v14 = vsel %vm5851_vm13, 4294967295, %v8861_v14  ;;  %vm5855_vm7 = vcmp.eq.s32.totalorder %v1076_v16, 1  ;;  %v8864_v22 = vmov 0  ;;  %v8867_v1 = vunpack.i.l.bf16 %v5320_v21  ;;  %3111 = vmatprep.subr.msk.bf16.mxu1 %vm8869_vm3, %v3110_v18 }
  0xe1   :  { %8863 = vst [vmem:[#allocation100_spill] sm:$0xff] %v8862_v14  ;;  %v8865_v22 = vsel %vm5855_vm7, 4294967295, %v8864_v22  ;;  %vm8868_vm15 = vcmp.lt.s32.totalorder %v4806_v56, 127  ;;  %v3565_v38 = vunpack.i.h.bf16 %v5554_v29  ;;  %vm8870_vm6 = vmmov 1   ;;  %3114 = vmatpush1.bf16.msk.msra.mxu1 %vm8876_vm9, %v3113_v61  ;;  %v4060_v61 = vld [vmem:[%s7977_s0 + $0x28] sm:$0xff] }
  0xe2   :  { %8866 = vst [vmem:[#allocation101_spill] sm:$0xff] %v8865_v22  ;;  %v735_v39 = vsel %vm8868_vm15, %v8867_v1, %v3525_v31  ;;  %vm8871_vm14 = vnez %v8833_v60  ;;  %v1231_v21 = vrot.slane %v5357_v48, %v4577_v53  ;;  %v1235_v16 = vrot.slane %v5357_v48, %v4603_v8  ;;  %vm8874_vm3 = vmmov %vm8868_vm15  ;;  %v5894_v1 = vpop.permute.xlu1 %3627 }
  0xe3   :  { %vm5872_vm13 = vmpackc.low %vm8871_vm14, %vm8870_vm6  ;;  %v3560_v23 = vunpack.i.h.bf16 %v5492_v49  ;;  %v732_v18 = vsel %vm8868_vm15, %v3615_v0, %v8303_v30  ;;  %v733_v60 = vsel %vm8874_vm3, %v3614_v10, %v3615_v0  ;;  %v8877_v24 = vmov 0  ;;  %v4059_v0 = vld [vmem:[%s7977_s0 + $0x30] sm:$0xff]  ;;  %v3623_v30 = vpop.permute.xlu0 %3622 }
  0xe4   :  { %vm8875_vm14 = vmmov %vm8874_vm3  ;;  %v8881_v37 = vunpack.i.h.bf16 %v5546_v33  ;;  %v8882_v11 = vunpack.i.l.bf16 %v5546_v33  ;;  %v8884_v36 = vmov 0  ;;  %vm8887_vm15 = vcmp.lt.s32.totalorder %v4806_v56, 96 }
  0xe5   :  { %v734_v35 = vsel %vm8875_vm14, %v3525_v31, %v3614_v10  ;;  %vm5899_vm12 = vmpackc.low %vm5775_vm8, %vm8870_vm6  ;;  %v3119_v10 = vpack.c.bf16 %v733_v60, %v4059_v0  ;;  %v3629_v31 = vunpack.i.l.bf16 %v5894_v1  ;;  %vm8883_vm8 = vcmp.lt.s32.totalorder %v4806_v56, 95  ;;  %v4061_v0 = vld [vmem:[%s7977_s0 + $0x20] sm:$0xff] }
  0xe6   :  { %v8878_v24 = vsel %vm5899_vm12, 4294967295, %v8877_v24  ;;  %v3090_v27 = vpack.c.bf16 %v734_v35, %v4060_v61  ;;  %vm5913_vm9 = vmpackc.low %vm5798_vm2, %vm8870_vm6  ;;  %v1196_v60 = vsel %vm8883_vm8, %v8882_v11, %v8881_v37  ;;  %v3093_v42 = vpack.c.bf16 %v735_v39, %v4061_v0 }
  0xe7   :  { %v3624_v35 = vunpack.i.l.bf16 %v3623_v30  ;;  %v3116_v61 = vpack.c.bf16 %v732_v18, %v4062_v40  ;;  %vm5932_vm2 = vmpackc.low %vm5833_vm10, %vm8870_vm6  ;;  %v1239_v11 = vrot.slane %v5357_v48, %v4600_v41  ;;  %v8886_v37 = vunpack.i.l.bf16 %v5554_v29  ;;  %v5958_v29 = vpop.permute.xlu1 %3637 }
  0xe8   :  { %v8885_v36 = vsel %vm5932_vm2, 4294967295, %v8884_v36  ;;  %vm8888_vm3 = vmmov %vm8887_vm15  ;;  %3091 = vmatprep.subr.msk.bf16.mxu0 %vm5872_vm13, %v3090_v27  ;;  %vm5946_vm14 = vcmp.eq.s32.totalorder %v1231_v21, 1  ;;  %v8889_v62 = vmov 0  ;;  %v937_v18 = vrot.slane %v5273_v4, %v4600_v41 }
  0xe9   :  { %v1045_v39 = vsel %vm8887_vm15, %v8886_v37, %v3565_v38  ;;  %v1044_v0 = vsel %vm8888_vm3, %v3565_v38, %v3629_v31  ;;  %v8890_v62 = vsel %vm5946_vm14, 4294967295, %v8889_v62  ;;  %vm8891_vm10 = vcmp.lt.s32.totalorder %v4806_v56, 97  ;;  %3117 = vmatprep.subr.msk.bf16.mxu1 %vm5899_vm12, %v3116_v61  ;;  %3094 = vmatpush1.bf16.msk.msra.mxu0 %vm5913_vm9, %v3093_v42  ;;  %v3633_v61 = vpop.permute.xlu0 %3632 }
  0xea   :  { %v885_v48 = vsel %vm8891_vm10, %v3560_v23, %v3624_v35  ;;  %v1292_v27 = vsel %vm5793_vm5, %v1196_v60, 0.0  ;;  %v1088_v38 = vrot.slane %v5185_v3, %v4600_v41  ;;  %v933_v21 = vrot.slane %v5273_v4, %v4603_v8  ;;  %vm8893_vm15 = vmmov %vm8891_vm10  ;;  %3120 = vmatpush1.bf16.msk.msra.mxu1 %vm5932_vm2, %v3119_v10 }
  0xeb   :  { %v8892_v40 = vunpack.i.l.bf16 %v5492_v49  ;;  %v3096_v37 = vpack.c.bf16 %v1044_v0, %v885_v48  ;;  %vm8894_vm3 = vnez %v8862_v14  ;;  %v1084_v60 = vrot.slane %v5185_v3, %v4603_v8  ;;  %vm8901_vm10 = vmpackc.low %vm5841_vm4, %vm5837_vm0 }
  0xec   :  { %vm5982_vm8 = vcmp.eq.s32.totalorder %v1235_v16, 1  ;;  %v8895_v4 = vmov 0  ;;  %v3635_v5 = vunpack.i.h.bf16 %v3633_v61  ;;  %v3630_v10 = vunpack.i.h.bf16 %v5894_v1  ;;  %vm8907_vm12 = vmpackc.low %vm5855_vm7, %vm8894_vm3 }
  0xed   :  { %v886_v42 = vsel %vm8893_vm15, %v8892_v40, %v3560_v23  ;;  %v8896_v4 = vsel %vm5982_vm8, 4294967295, %v8895_v4  ;;  %v3634_v23 = vunpack.i.l.bf16 %v3633_v61  ;;  %vm5986_vm15 = vcmp.eq.s32.totalorder %v1239_v11, 1  ;;  %3097 = vmatprep.subr.msk.bf16.mxu0 %vm8901_vm10, %v3096_v37 }
  0xee   :  { %8897 = vst [vmem:[#allocation102_spill] sm:$0xff] %v8896_v4  ;;  %v3099_v49 = vpack.c.bf16 %v1045_v39, %v886_v42  ;;  %v8898_v40 = vmov 0  ;;  %v3625_v0 = vunpack.i.h.bf16 %v3623_v30  ;;  %v1372_v3 = vpack.c.bf16 %v1292_v27, %v1292_v27  ;;  %v6010_v30 = vpop.permute.xlu1 %3647  ;;  %v6022_v42 = vpop.permute.xlu0 %3642 }
  0xef   :  { %v8899_v40 = vsel %vm5986_vm15, 4294967295, %v8898_v40  ;;  %vm5996_vm5 = vcmp.eq.s32.totalorder %v937_v18, 1  ;;  %v8902_v16 = vmov 0  ;;  %v8905_v11 = vunpack.i.h.bf16 %v5546_v33 }
  0xf0   :  { %8900 = vst [vmem:[#allocation103_spill] sm:$0xff] %v8899_v40  ;;  %v8903_v16 = vsel %vm5996_vm5, 4294967295, %v8902_v16  ;;  %vm8906_vm2 = vcmp.lt.s32.totalorder %v4806_v56, 95  ;;  %3100 = vmatpush1.bf16.msk.msra.mxu0 %vm8907_vm12, %v3099_v49  ;;  %vm6012_vm10 = vcmp.eq.s32.totalorder %v1088_v38, 1  ;;  %v8908_v1 = vmov 0 }
  0xf1   :  { %8904 = vst [vmem:[#allocation104_spill] sm:$0xff] %v8903_v16  ;;  %v1195_v48 = vsel %vm8906_vm2, %v8905_v11, %v3634_v23  ;;  %v8909_v1 = vsel %vm6012_vm10, 4294967295, %v8908_v1  ;;  %vm6016_vm0 = vcmp.eq.s32.totalorder %v933_v21, 1  ;;  %v8910_v18 = vmov 0  ;;  %vm8913_vm12 = vmmov %vm8906_vm2 }
  0xf2   :  { %v8911_v18 = vsel %vm6016_vm0, 4294967295, %v8910_v18  ;;  %v3590_v33 = vunpack.i.h.bf16 %v5651_v12  ;;  %v1293_v61 = vsel %vm5946_vm14, %v1195_v48, 0.0  ;;  %v1194_v37 = vsel %vm8913_vm12, %v3634_v23, %v3635_v5  ;;  %vm8920_vm4 = vmmov %vm8913_vm12 }
  0xf3   :  { %8912 = vst [vmem:[#allocation105_spill] sm:$0xff] %v8911_v18  ;;  %v3585_v38 = vunpack.i.h.bf16 %v5673_v46  ;;  %v1373_v21 = vpack.c.bf16 %v1293_v61, %v1293_v61  ;;  %vm6030_vm2 = vcmp.eq.s32.totalorder %v1084_v60, 1  ;;  %v8914_v11 = vmov 0  ;;  %v8982_v18 = vld [vmem:[#allocation16_spill] sm:$0xff] }
  0xf4   :  { %v8915_v11 = vsel %vm6030_vm2, 4294967295, %v8914_v11  ;;  %vm8917_vm3 = vcmp.lt.s32.totalorder %v4806_v56, 96  ;;  %vm8918_vm7 = vcmp.lt.s32.totalorder %v4806_v56, 97  ;;  %v8919_v48 = vunpack.i.l.bf16 %v6010_v30 }
  0xf5   :  { %8916 = vst [vmem:[#allocation106_spill] sm:$0xff] %v8915_v11  ;;  %v1043_v39 = vsel %vm8917_vm3, %v3629_v31, %v3630_v10  ;;  %v884_v27 = vsel %vm8918_vm7, %v3624_v35, %v3625_v0  ;;  %vm8921_vm12 = vcmask 1043456   ;;  %v8922_v49 = vunpack.i.l.bf16 %v5958_v29  ;;  %vm8923_vm14 = vmmov %vm8918_vm7  ;;  %v3658_v35 = vpop.permute.xlu1 %3657 }
  0xf6   :  { %v1193_v23 = vsel %vm8920_vm4, %v3635_v5, %v8919_v48  ;;  %v1402_v14 = vsel %vm8921_vm12, %v1372_v3, 0  ;;  %v8924_v61 = vunpack.i.l.bf16 %v6022_v42  ;;  %vm8925_vm11 = vmmov %vm8917_vm3  ;;  %v1294_v3 = vsel %vm5982_vm8, %v1194_v37, 0.0  ;;  %v3653_v48 = vpop.permute.xlu0 %3652 }
  0xf7   :  { %v883_v60 = vsel %vm8923_vm14, %v3625_v0, %v8922_v49  ;;  %vm8926_vm3 = vmmov %vm8921_vm12  ;;  %v1295_v5 = vsel %vm5986_vm15, %v1193_v23, 0.0  ;;  %v8927_v0 = vunpack.i.l.bf16 %v5651_v12  ;;  %vm8928_vm4 = vcmp.lt.s32.totalorder %v4806_v56, 32 }
  0xf8   :  { %v1042_v31 = vsel %vm8925_vm11, %v3630_v10, %v8924_v61  ;;  %3101 = vmatprep.subr.msk.bf16.mxu0 %vm8926_vm3, %v1373_v21  ;;  %vm8324_vm7 = vmpackc.low %vm6012_vm10, %vm5996_vm5  ;;  %v3659_v10 = vunpack.i.l.bf16 %v3658_v35  ;;  %v8929_v61 = vunpack.i.l.bf16 %v5673_v46  ;;  %vm8930_vm14 = vcmp.lt.s32.totalorder %v4806_v56, 33 }
  0xf9   :  { %v263_v49 = vsel %vm8928_vm4, %v8927_v0, %v3590_v33  ;;  %1528 = vmatpush1.bf16.msra.mxu0 %v1402_v14  ;;  %v3122_v21 = vpack.c.bf16 %v1042_v31, %v883_v60  ;;  %vm8323_vm11 = vmpackc.low %vm6030_vm2, %vm6016_vm0  ;;  %v3125_v37 = vpack.c.bf16 %v1043_v39, %v884_v27  ;;  %v3654_v40 = vunpack.i.l.bf16 %v3653_v48  ;;  %v6086_v39 = vpop.permute.xlu1 %3667 }
  0xfa   :  { %v98_v23 = vsel %vm8930_vm14, %v8929_v61, %v3585_v38  ;;  %v1375_v12 = vpack.c.bf16 %v1295_v5, %v1295_v5  ;;  %v3660_v4 = vunpack.i.h.bf16 %v3658_v35  ;;  %vm8931_vm12 = vmmov %vm8928_vm4  ;;  %v3655_v22 = vunpack.i.h.bf16 %v3653_v48  ;;  %v6091_v60 = vpop.permute.xlu0 %3662 }
  0xfb   :  { %v262_v0 = vsel %vm8931_vm12, %v3590_v33, %v3659_v10  ;;  %3123 = vmatprep.subr.msk.bf16.mxu1 %vm8324_vm7, %v3122_v21  ;;  %v1374_v14 = vpack.c.bf16 %v1294_v3, %v1294_v3  ;;  %vm8932_vm3 = vmmov %vm8930_vm14  ;;  %vm8933_vm4 = vcmask 588800   ;;  %v8329_v27 = vunpack.i.l.bf16 %v6086_v39 }
  0xfc   :  { %v97_v46 = vsel %vm8932_vm3, %v3585_v38, %v3654_v40  ;;  %3126 = vmatpush1.bf16.msk.msra.mxu1 %vm8323_vm11, %v3125_v37  ;;  %3102 = vmatmul.mubr.msk.bf16.vlgmr.msra.gmra.mrb[4].mxu0 %vm8933_vm4, %v5623_v45  ;;  %vm8934_vm14 = vcmask 1043456   ;;  %v3133_v38 = vpack.c.bf16 %v263_v49, %v98_v23  ;;  %v3610_v31 = vunpack.i.h.bf16 %v5769_v51  ;;  %vm8935_vm4 = vmmov %vm8931_vm12  ;;  %v8944_v37 = vld [vmem:[#allocation15_spill] sm:$0xff] }
  0xfd   :  { %v3130_v33 = vpack.c.bf16 %v262_v0, %v97_v46  ;;  %3127 = vmatprep.subr.msk.bf16.mxu1 %vm8934_vm14, %v1375_v12  ;;  %1633 = vmatprep.mubr.bf16.mxu0 %v8593_v63  ;;  %v3605_v35 = vunpack.i.h.bf16 %v5785_v57  ;;  %v8328_v5 = vunpack.i.l.bf16 %v6091_v60  ;;  %v261_v3 = vsel %vm8931_vm12, %v3659_v10, %v3660_v4  ;;  %vm8940_vm12 = vmmov %vm8932_vm3 }
  0xfe   :  { %v96_v48 = vsel %vm8932_vm3, %v3654_v40, %v3655_v22  ;;  %v260_v21 = vsel %vm8935_vm4, %v3660_v4, %v8329_v27  ;;  %vm8936_vm14 = vnez %v8415_v58  ;;  %vm8937_vm11 = vnez %v8405_v47  ;;  %v3678_v4 = vpop.permute.xlu1 %3677  ;;  %v3673_v23 = vpop.permute.xlu0 %3672  ;;  %v8966_v27 = vld [vmem:[#allocation4_spill] sm:$0xff] }
  0xff   :  { %vm8938_vm7 = vmpackc.low %vm8936_vm14, %vm8937_vm11  ;;  %vm8939_vm15 = vcmask 1043456   ;;  %v95_v10 = vsel %vm8940_vm12, %v3655_v22, %v8328_v5  ;;  %vm8941_vm3 = vnez %v8418_v59  ;;  %vm8942_vm0 = vnez %v8412_v55  ;;  %v8953_v5 = vld [vmem:[#allocation11_spill] sm:$0xff] }
 0x100   :  { %3131 = vmatprep.subr.msk.bf16.mxu0 %vm8938_vm7, %v3130_v33  ;;  %v1408_v49 = vsel %vm8939_vm15, %v1374_v14, 0  ;;  %vm8943_vm2 = vmpackc.low %vm8941_vm3, %vm8942_vm0  ;;  %v3156_v40 = vpack.c.bf16 %v260_v21, %v95_v10  ;;  %v3679_v61 = vunpack.i.l.bf16 %v3678_v4  ;;  %vm8945_vm7 = vnez %v8944_v37  ;;  %v8948_v33 = vld [vmem:[#allocation17_spill] sm:$0xff] }
 0x101   :  { %1569 = vmatpush1.bf16.msra.mxu1 %v1408_v49  ;;  %3134 = vmatpush1.bf16.msk.msra.mxu0 %vm8943_vm2, %v3133_v38  ;;  %v6124_v12 = vsel %vm8945_vm7, 1, %v8593_v63  ;;  %v8946_v0 = vunpack.i.l.bf16 %v5769_v51  ;;  %vm8947_vm15 = vcmp.lt.s32.totalorder %v4806_v56, 1  ;;  %v3159_v14 = vpack.c.bf16 %v261_v3, %v96_v48  ;;  %v8960_v3 = vld [vmem:[#allocation13_spill] sm:$0xff]  ;;  %v8962_v48 = vld [vmem:[#allocation12_spill] sm:$0xff] }
 0x102   :  { %v3674_v46 = vunpack.i.l.bf16 %v3673_v23  ;;  %vm8949_vm4 = vnez %v8948_v33  ;;  %v8950_v21 = vunpack.i.l.bf16 %v5785_v57  ;;  %vm8951_vm2 = vcmp.lt.s32.totalorder %v4806_v56, 31  ;;  %vm8952_vm12 = vmmov %vm8947_vm15 }
 0x103   :  { %v575_v22 = vsel %vm8947_vm15, %v8946_v0, %v3610_v31  ;;  %v6133_v38 = vsel %vm8949_vm4, 1, %v8593_v63  ;;  %v3680_v10 = vunpack.i.h.bf16 %v3678_v4  ;;  %v574_v37 = vsel %vm8952_vm12, %v3610_v31, %v3679_v61  ;;  %v8955_v0 = vld [vmem:[#allocation10_spill] sm:$0xff]  ;;  %vm8959_vm4 = vmmov %vm8951_vm2  ;;  %v6155_v31 = vpop.permute.xlu1 %3687 }
 0x104   :  { %v418_v49 = vsel %vm8951_vm2, %v8950_v21, %v3605_v35  ;;  %v3675_v51 = vunpack.i.h.bf16 %v3673_v23  ;;  %vm8954_vm7 = vnez %v8953_v5  ;;  %vm8956_vm15 = vnez %v8955_v0  ;;  %v8965_v4 = vld [vmem:[#allocation2_spill] sm:$0xff]  ;;  %v6161_v21 = vpop.permute.xlu0 %3682  ;;  %v8968_v5 = vld [vmem:[#allocation5_spill] sm:$0xff] }
 0x105   :  { %vm8957_vm0 = vmpackc.low %vm8954_vm7, %vm8956_vm15  ;;  %vm8958_vm3 = vcmask 588800   ;;  %v417_v57 = vsel %vm8959_vm4, %v3605_v35, %v3674_v46  ;;  %vm8961_vm11 = vnez %v8960_v3  ;;  %vm8963_vm2 = vnez %v8962_v48  ;;  %v8967_v3 = vld [vmem:[#allocation3_spill] sm:$0xff] }
 0x106   :  { %3157 = vmatprep.subr.msk.bf16.mxu1 %vm8957_vm0, %v3156_v40  ;;  %3128 = vmatmul.mubr.msk.bf16.vlgmr.msra.gmra.mrb[4].mxu1 %vm8958_vm3, %v5623_v45  ;;  %vm8964_vm14 = vmpackc.low %vm8961_vm11, %vm8963_vm2  ;;  %v786_v23 = vrot.slane %v6124_v12, %v8965_v4  ;;  %v3136_v40 = vpack.c.bf16 %v574_v37, %v417_v57  ;;  %v794_v35 = vrot.slane %v6124_v12, %v8966_v27  ;;  %v3620_v37 = vunpack.i.h.bf16 %v5827_v32 }
 0x107   :  { %3160 = vmatpush1.bf16.msk.msra.mxu1 %vm8964_vm14, %v3159_v14  ;;  %1674 = vmatprep.mubr.bf16.mxu1 %v8593_v63  ;;  %v782_v48 = vrot.slane %v6124_v12, %v8967_v3  ;;  %v3139_v0 = vpack.c.bf16 %v575_v22, %v418_v49  ;;  %v790_v55 = vrot.slane %v6124_v12, %v8968_v5  ;;  %vm8969_vm0 = vmmov %vm8952_vm12  ;;  %v8971_v47 = vunpack.i.l.bf16 %v6155_v31  ;;  %v8973_v49 = vld [vmem:[#allocation18_spill] sm:$0xff] }
 0x108   :  { %v1243_v59 = vrot.slane %v6133_v38, %v8967_v3  ;;  %v573_v57 = vsel %vm8969_vm0, %v3679_v61, %v3680_v10  ;;  %vm8970_vm14 = vmmov %vm8959_vm4  ;;  %vm8974_vm12 = vnez %v8973_v49  ;;  %v8975_v14 = vld [vmem:[#allocation14_spill] sm:$0xff]  ;;  %v8978_v3 = vunpack.i.l.bf16 %v6161_v21  ;;  %v8980_v61 = vld [vmem:[#allocation19_spill] sm:$0xff] }
 0x109   :  { %v416_v33 = vsel %vm8970_vm14, %v3674_v46, %v3675_v51  ;;  %vm8972_vm3 = vmmov %vm8969_vm0  ;;  %vm8976_vm4 = vnez %v8975_v14  ;;  %vm8981_vm0 = vnez %v8980_v61  ;;  %v6195_v46 = vpop.permute.xlu1 %716  ;;  %v3693_v14 = vpop.permute.xlu0 %3692  ;;  %v9020_v49 = vmov 0 }
 0x10a   :  { %v572_v22 = vsel %vm8972_vm3, %v3680_v10, %v8971_v47  ;;  %vm8977_vm2 = vmpackc.low %vm8974_vm12, %vm8976_vm4  ;;  %vm820_vm3 = vcmp.eq.s32.totalorder %v786_v23, 1  ;;  %vm6198_vm4 = vcmp.eq.s32.totalorder %v794_v35, 1  ;;  %v8991_v23 = vunpack.i.l.bf16 %v5827_v32  ;;  %v9006_v47 = vld [vmem:[#allocation23_spill] sm:$0xff] }
 0x10b   :  { %3137 = vmatprep.subr.msk.bf16.mxu0 %vm8977_vm2, %v3136_v40  ;;  %vm8979_vm11 = vmmov %vm8970_vm14  ;;  %vm8983_vm14 = vnez %v8982_v18  ;;  %vm6202_vm2 = vcmp.eq.s32.totalorder %v782_v48, 1  ;;  %v3694_v18 = vunpack.i.l.bf16 %v3693_v14  ;;  %v3645_v35 = vunpack.i.h.bf16 %v6022_v42  ;;  %v8995_v48 = vld [vmem:[#allocation20_spill] sm:$0xff] }
 0x10c   :  { %v415_v58 = vsel %vm8979_vm11, %v3675_v51, %v8978_v3  ;;  %vm8984_vm15 = vmpackc.low %vm8981_vm0, %vm8983_vm14  ;;  %v3165_v51 = vpack.c.bf16 %v573_v57, %v416_v33  ;;  %v3695_v3 = vunpack.i.h.bf16 %v3693_v14  ;;  %vm6206_vm11 = vcmp.eq.s32.totalorder %v790_v55, 1 }
 0x10d   :  { %3140 = vmatpush1.bf16.msk.msra.mxu0 %vm8984_vm15, %v3139_v0  ;;  %v3162_v10 = vpack.c.bf16 %v572_v22, %v415_v58  ;;  %vm8992_vm15 = vcmp.lt.s32.totalorder %v4806_v56, 127  ;;  %v8993_v22 = vld [vmem:[#allocation21_spill] sm:$0xff]  ;;  %vm8996_vm0 = vnez %v8995_v48  ;;  %vm6221_vm7 = vmpackc.low %vm820_vm3, %vm8870_vm6  ;;  %v8998_v33 = vmov 0  ;;  %v9008_v48 = vld [vmem:[#allocation22_spill] sm:$0xff]  ;;  %v3698_v40 = vpop.permute.xlu0 %3697 }
 0x10e   :  { %v731_v58 = vsel %vm8992_vm15, %v8991_v23, %v3620_v37  ;;  %vm8994_vm14 = vnez %v8993_v22  ;;  %v8999_v33 = vsel %vm6221_vm7, 4294967295, %v8998_v33  ;;  %v1247_v55 = vrot.slane %v6133_v38, %v8965_v4  ;;  %vm6247_vm8 = vmpackc.low %vm6198_vm4, %vm8870_vm6 }
 0x10f   :  { %vm8997_vm12 = vmpackc.low %vm8994_vm14, %vm8996_vm0  ;;  %9000 = vst [vmem:[#allocation15_spill] sm:$0xff] %v8999_v33  ;;  %vm6227_vm5 = vcmp.eq.s32.totalorder %v1243_v59, 1  ;;  %v9001_v32 = vmov 0  ;;  %v3640_v14 = vunpack.i.h.bf16 %v5958_v29  ;;  %v728_v57 = vsel %vm8992_vm15, %v3695_v3, %v6195_v46  ;;  %v3703_v59 = vpop.permute.xlu1 %3702 }
 0x110   :  { %3163 = vmatprep.subr.msk.bf16.mxu1 %vm8997_vm12, %v3162_v10  ;;  %v9002_v32 = vsel %vm6227_vm5, 4294967295, %v9001_v32  ;;  %vm9004_vm12 = vmmov %vm8992_vm15  ;;  %vm9007_vm0 = vnez %v9006_v47  ;;  %vm9009_vm14 = vnez %v9008_v48  ;;  %v9011_v4 = vmov 0 }
 0x111   :  { %9003 = vst [vmem:[#allocation17_spill] sm:$0xff] %v9002_v32  ;;  %v729_v10 = vsel %vm9004_vm12, %v3694_v18, %v3695_v3  ;;  %vm9005_vm3 = vmmov %vm9004_vm12  ;;  %v9012_v4 = vsel %vm6247_vm8, 4294967295, %v9011_v4  ;;  %v4063_v3 = vld [vmem:[%s7977_s0 + $0x58] sm:$0xff]  ;;  %v9014_v47 = vmov 0  ;;  %vm9019_vm4 = vcmp.lt.s32.totalorder %v4806_v56, 95  ;;  %v9058_v32 = vld [vmem:[#allocation30_spill] sm:$0xff] }
 0x112   :  { %v730_v23 = vsel %vm9005_vm3, %v3620_v37, %v3694_v18  ;;  %vm9010_vm10 = vmpackc.low %vm9007_vm0, %vm9009_vm14  ;;  %9013 = vst [vmem:[#allocation2_spill] sm:$0xff] %v9012_v4  ;;  %v3168_v22 = vpack.c.bf16 %v728_v57, %v4063_v3  ;;  %v4064_v18 = vld [vmem:[%s7977_s0 + $0x48] sm:$0xff]  ;;  %v9017_v57 = vunpack.i.h.bf16 %v6010_v30  ;;  %v9018_v3 = vunpack.i.l.bf16 %v6010_v30 }
 0x113   :  { %3166 = vmatpush1.bf16.msk.msra.mxu1 %vm9010_vm10, %v3165_v51  ;;  %v3142_v37 = vpack.c.bf16 %v730_v23, %v4064_v18  ;;  %v4065_v51 = vld [vmem:[%s7977_s0 + $0x50] sm:$0xff]  ;;  %vm6263_vm10 = vmpackc.low %vm6202_vm2, %vm8870_vm6  ;;  %v4066_v18 = vld [vmem:[%s7977_s0 + $0x40] sm:$0xff]  ;;  %v3699_v61 = vunpack.i.l.bf16 %v3698_v40  ;;  %v1251_v11 = vrot.slane %v6133_v38, %v8968_v5  ;;  %v9023_v16 = vunpack.i.l.bf16 %v6022_v42 }
 0x114   :  { %v3171_v48 = vpack.c.bf16 %v729_v10, %v4065_v51  ;;  %v9015_v47 = vsel %vm6263_vm10, 4294967295, %v9014_v47  ;;  %v1192_v23 = vsel %vm9019_vm4, %v9018_v3, %v9017_v57  ;;  %v3145_v10 = vpack.c.bf16 %v731_v58, %v4066_v18  ;;  %vm6279_vm2 = vmpackc.low %vm6206_vm11, %vm8870_vm6  ;;  %3169 = vmatprep.subr.msk.bf16.mxu1 %vm6247_vm8, %v3168_v22  ;;  %v3708_v18 = vpop.permute.xlu0 %3707 }
 0x115   :  { %9016 = vst [vmem:[#allocation4_spill] sm:$0xff] %v9015_v47  ;;  %v3704_v51 = vunpack.i.l.bf16 %v3703_v59  ;;  %v9021_v49 = vsel %vm6279_vm2, 4294967295, %v9020_v49  ;;  %vm9024_vm15 = vcmp.lt.s32.totalorder %v4806_v56, 96  ;;  %3143 = vmatprep.subr.msk.bf16.mxu0 %vm6221_vm7, %v3142_v37  ;;  %v1255_v0 = vrot.slane %v6133_v38, %v8966_v27 }
 0x116   :  { %9022 = vst [vmem:[#allocation3_spill] sm:$0xff] %v9021_v49  ;;  %v1041_v57 = vsel %vm9024_vm15, %v9023_v16, %v3645_v35  ;;  %v3705_v58 = vunpack.i.h.bf16 %v3703_v59  ;;  %vm9025_vm11 = vmmov %vm9024_vm15  ;;  %vm9026_vm12 = vcmp.lt.s32.totalorder %v4806_v56, 97  ;;  %3146 = vmatpush1.bf16.msk.msra.mxu0 %vm6263_vm10, %v3145_v10  ;;  %v6301_v16 = vpop.permute.xlu1 %867  ;;  %v1296_v42 = vsel %vm6227_vm5, %v1192_v23, 0.0 }
 0x117   :  { %v1040_v3 = vsel %vm9025_vm11, %v3645_v35, %v3704_v51  ;;  %v881_v5 = vsel %vm9026_vm12, %v3640_v14, %v3699_v61  ;;  %v9027_v22 = vunpack.i.l.bf16 %v5958_v29  ;;  %vm9028_vm3 = vmmov %vm9026_vm12  ;;  %v3700_v59 = vunpack.i.h.bf16 %v3698_v40  ;;  %3172 = vmatpush1.bf16.msk.msra.mxu1 %vm6279_vm2, %v3171_v48  ;;  %v9037_v40 = vld [vmem:[#allocation24_spill] sm:$0xff] }
 0x118   :  { %v3148_v37 = vpack.c.bf16 %v1040_v3, %v881_v5  ;;  %vm6311_vm4 = vcmp.eq.s32.totalorder %v1247_v55, 1  ;;  %v9029_v35 = vmov 0  ;;  %v3710_v4 = vunpack.i.h.bf16 %v3708_v18 }
 0x119   :  { %v882_v27 = vsel %vm9028_vm3, %v9027_v22, %v3640_v14  ;;  %v9030_v35 = vsel %vm6311_vm4, 4294967295, %v9029_v35  ;;  %v3709_v47 = vunpack.i.l.bf16 %v3708_v18  ;;  %vm6315_vm15 = vcmp.eq.s32.totalorder %v1251_v11, 1  ;;  %v9035_v14 = vld [vmem:[#allocation28_spill] sm:$0xff] }
 0x11a   :  { %9031 = vst [vmem:[#allocation5_spill] sm:$0xff] %v9030_v35  ;;  %v3151_v10 = vpack.c.bf16 %v1041_v57, %v882_v27  ;;  %v9032_v23 = vmov 0  ;;  %v3670_v29 = vunpack.i.h.bf16 %v6086_v39  ;;  %vm9036_vm11 = vnez %v9035_v14  ;;  %v9047_v27 = vld [vmem:[#allocation29_spill] sm:$0xff] }
 0x11b   :  { %v9033_v23 = vsel %vm6315_vm15, 4294967295, %v9032_v23  ;;  %vm9038_vm12 = vnez %v9037_v40  ;;  %vm6325_vm2 = vcmp.eq.s32.totalorder %v1255_v0, 1  ;;  %v9040_v48 = vmov 0  ;;  %v6354_v40 = vpop.permute.xlu0 %1026 }
 0x11c   :  { %9034 = vst [vmem:[#allocation107_spill] sm:$0xff] %v9033_v23  ;;  %vm9039_vm3 = vmpackc.low %vm9036_vm11, %vm9038_vm12  ;;  %v9041_v48 = vsel %vm6325_vm2, 4294967295, %v9040_v48  ;;  %v1376_v55 = vpack.c.bf16 %v1296_v42, %v1296_v42  ;;  %v802_v57 = vrot.slane %v6124_v12, %v4577_v53  ;;  %v3665_v11 = vunpack.i.h.bf16 %v6091_v60  ;;  %v6345_v42 = vpop.permute.xlu1 %1177 }
 0x11d   :  { %3149 = vmatprep.subr.msk.bf16.mxu0 %vm9039_vm3, %v3148_v37  ;;  %9042 = vst [vmem:[#allocation108_spill] sm:$0xff] %v9041_v48  ;;  %vm9043_vm5 = vcmp.lt.s32.totalorder %v4806_v56, 96  ;;  %vm9044_vm8 = vcmp.lt.s32.totalorder %v4806_v56, 95  ;;  %v9045_v22 = vunpack.i.h.bf16 %v6010_v30  ;;  %vm9048_vm12 = vnez %v9047_v27  ;;  %v9049_v37 = vld [vmem:[#allocation25_spill] sm:$0xff] }
 0x11e   :  { %v1039_v3 = vsel %vm9043_vm5, %v3704_v51, %v3705_v58  ;;  %v1190_v5 = vsel %vm9044_vm8, %v3709_v47, %v3710_v4  ;;  %vm9046_vm3 = vmmov %vm9044_vm8  ;;  %vm9050_vm11 = vnez %v9049_v37  ;;  %vm9052_vm0 = vcmp.lt.s32.totalorder %v4806_v56, 97 }
 0x11f   :  { %v1191_v0 = vsel %vm9046_vm3, %v9045_v22, %v3709_v47  ;;  %vm9051_vm14 = vmpackc.low %vm9048_vm12, %vm9050_vm11  ;;  %v880_v18 = vsel %vm9052_vm0, %v3699_v61, %v3700_v59  ;;  %v1298_v47 = vsel %vm6315_vm15, %v1190_v5, 0.0 }
 0x120   :  { %3152 = vmatpush1.bf16.msk.msra.mxu0 %vm9051_vm14, %v3151_v10  ;;  %v1297_v51 = vsel %vm6311_vm4, %v1191_v0, 0.0  ;;  %vm9053_vm5 = vmmov %vm9046_vm3  ;;  %vm9056_vm14 = vcmask 1043456   ;;  %v3718_v14 = vpop.permute.xlu1 %3717  ;;  %v1378_v23 = vpack.c.bf16 %v1298_v47, %v1298_v47 }
 0x121   :  { %v1189_v30 = vsel %vm9053_vm5, %v3710_v4, %v6345_v42  ;;  %vm9054_vm8 = vmmov %vm9052_vm0  ;;  %vm9055_vm0 = vcmp.lt.s32.totalorder %v4806_v56, 96  ;;  %v1377_v0 = vpack.c.bf16 %v1297_v51, %v1297_v51  ;;  %v3177_v4 = vpack.c.bf16 %v1039_v3, %v880_v18 }
 0x122   :  { %v879_v10 = vsel %vm9054_vm8, %v3700_v59, %v6301_v16  ;;  %v1299_v22 = vsel %vm6325_vm2, %v1189_v30, 0.0  ;;  %v1038_v61 = vsel %vm9055_vm0, %v3705_v58, %v6354_v40  ;;  %vm9057_vm3 = vmmov %vm9056_vm14  ;;  %v810_v59 = vrot.slane %v6124_v12, %v4600_v41  ;;  %v3713_v30 = vpop.permute.xlu0 %3712  ;;  %v9060_v58 = vld [vmem:[#allocation26_spill] sm:$0xff] }
 0x123   :  { %v1379_v37 = vpack.c.bf16 %v1299_v22, %v1299_v22  ;;  %v3174_v27 = vpack.c.bf16 %v1038_v61, %v879_v10  ;;  %3153 = vmatprep.subr.msk.bf16.mxu0 %vm9056_vm14, %v1377_v0  ;;  %v1414_v5 = vsel %vm9057_vm3, %v1376_v55, 0  ;;  %v3720_v49 = vunpack.i.h.bf16 %v3718_v14  ;;  %v9074_v0 = vld [vmem:[#allocation58_spill] sm:$0xff] }
 0x124   :  { %v3719_v48 = vunpack.i.l.bf16 %v3718_v14  ;;  %1610 = vmatpush1.bf16.msra.mxu0 %v1414_v5  ;;  %vm9059_vm5 = vnez %v9058_v32  ;;  %vm9061_vm8 = vnez %v9060_v58  ;;  %vm6375_vm2 = vcmp.eq.s32.totalorder %v802_v57, 1  ;;  %v9071_v57 = vld [vmem:[#allocation27_spill] sm:$0xff] }
 0x125   :  { %vm9062_vm0 = vmpackc.low %vm9059_vm5, %vm9061_vm8  ;;  %v798_v55 = vrot.slane %v6124_v12, %v4597_v7  ;;  %v9065_v18 = vunpack.i.l.bf16 %v6086_v39  ;;  %vm9066_vm14 = vcmp.lt.s32.totalorder %v4806_v56, 32  ;;  %v9067_v51 = vunpack.i.l.bf16 %v6091_v60 }
 0x126   :  { %3175 = vmatprep.subr.msk.bf16.mxu1 %vm9062_vm0, %v3174_v27  ;;  %vm9068_vm3 = vcmp.lt.s32.totalorder %v4806_v56, 33  ;;  %v3715_v10 = vunpack.i.h.bf16 %v3713_v30  ;;  %v3714_v22 = vunpack.i.l.bf16 %v3713_v30  ;;  %v9069_v27 = vld [vmem:[#allocation31_spill] sm:$0xff]  ;;  %vm9072_vm8 = vnez %v9071_v57  ;;  %vm9076_vm11 = vmmov %vm9066_vm14 }
 0x127   :  { %v259_v14 = vsel %vm9066_vm14, %v9065_v18, %v3670_v29  ;;  %v94_v47 = vsel %vm9068_vm3, %v9067_v51, %v3665_v11  ;;  %vm9070_vm0 = vnez %v9069_v27  ;;  %v3690_v61 = vunpack.i.h.bf16 %v6155_v31  ;;  %vm9078_vm12 = vmmov %vm9076_vm11  ;;  %v9079_v51 = vld [vmem:[#allocation48_spill] sm:$0xff] }
 0x128   :  { %vm9073_vm5 = vmpackc.low %vm9070_vm0, %vm9072_vm8  ;;  %v3685_v39 = vunpack.i.h.bf16 %v6161_v21  ;;  %v9075_v5 = vunpack.i.l.bf16 %v9074_v0  ;;  %v258_v18 = vsel %vm9076_vm11, %v3670_v29, %v3719_v48  ;;  %vm9077_vm3 = vcmask 1043456   ;;  %v3728_v0 = vpop.permute.xlu1 %3727 }
 0x129   :  { %3178 = vmatpush1.bf16.msk.msra.mxu1 %vm9073_vm5, %v3177_v4  ;;  %v257_v30 = vsel %vm9078_vm12, %v3719_v48, %v3720_v49  ;;  %v9080_v57 = vunpack.i.l.bf16 %v9079_v51  ;;  %vm9081_vm5 = vcmp.lt.s32.totalorder %v4806_v56, 33  ;;  %vm9083_vm0 = vcmask 588800   ;;  %v3723_v48 = vpop.permute.xlu0 %3722 }
 0x12a   :  { %v256_v60 = vsel %vm9066_vm14, %v3720_v49, %v9075_v5  ;;  %3179 = vmatprep.subr.msk.bf16.mxu1 %vm9077_vm3, %v1379_v37  ;;  %vm9082_vm8 = vmmov %vm9081_vm5  ;;  %3154 = vmatmul.mubr.msk.bf16.vlgmr.msra.gmra.mrb[8].mxu0 %vm9083_vm0, %v5623_v45  ;;  %v3730_v49 = vunpack.i.h.bf16 %v3728_v0  ;;  %v3185_v51 = vpack.c.bf16 %v259_v14, %v94_v47  ;;  %v3725_v32 = vunpack.i.h.bf16 %v3723_v48  ;;  %v9096_v14 = vld [vmem:[#allocation35_spill] sm:$0xff]  ;;  %v9098_v47 = vld [vmem:[#allocation34_spill] sm:$0xff] }
 0x12b   :  { %v91_v4 = vsel %vm9081_vm5, %v3715_v10, %v9080_v57  ;;  %v93_v27 = vsel %vm9082_vm8, %v3665_v11, %v3714_v22  ;;  %vm9084_vm14 = vmmov %vm9077_vm3  ;;  %1715 = vmatprep.mubr.bf16.mxu0 %v8593_v63  ;;  %v3729_v57 = vunpack.i.l.bf16 %v3728_v0  ;;  %v3724_v35 = vunpack.i.l.bf16 %v3723_v48  ;;  %v9105_v48 = vld [vmem:[#allocation70_spill] sm:$0xff] }
 0x12c   :  { %v1420_v5 = vsel %vm9084_vm14, %v1378_v23, 0  ;;  %v3208_v29 = vpack.c.bf16 %v256_v60, %v91_v4  ;;  %vm9085_vm11 = vmmov %vm9081_vm5  ;;  %v3182_v58 = vpack.c.bf16 %v258_v18, %v93_v27  ;;  %v9086_v11 = vunpack.i.l.bf16 %v6155_v31  ;;  %v9088_v23 = vld [vmem:[#allocation68_spill] sm:$0xff]  ;;  %v9147_v31 = vld [vmem:[#allocation45_spill] sm:$0xff] }
 0x12d   :  { %v92_v37 = vsel %vm9085_vm11, %v3714_v22, %v3715_v10  ;;  %1651 = vmatpush1.bf16.msra.mxu1 %v1420_v5  ;;  %vm9087_vm12 = vcmp.lt.s32.totalorder %v4806_v56, 1  ;;  %v9089_v60 = vunpack.i.l.bf16 %v9088_v23  ;;  %v9091_v22 = vld [vmem:[#allocation33_spill] sm:$0xff]  ;;  %v9093_v27 = vld [vmem:[#allocation32_spill] sm:$0xff]  ;;  %vm9097_vm14 = vnez %v9096_v14 }
 0x12e   :  { %v571_v33 = vsel %vm9087_vm12, %v9086_v11, %v3690_v61  ;;  %vm9090_vm8 = vmmov %vm9087_vm12  ;;  %vm9092_vm0 = vnez %v9091_v22  ;;  %vm9094_vm3 = vnez %v9093_v27  ;;  %vm9099_vm11 = vnez %v9098_v47  ;;  %v9110_v23 = vld [vmem:[#allocation36_spill] sm:$0xff] }
 0x12f   :  { %v568_v10 = vsel %vm9090_vm8, %v3730_v49, %v9089_v60  ;;  %vm9095_vm5 = vmpackc.low %vm9092_vm0, %vm9094_vm3  ;;  %vm6435_vm4 = vcmp.eq.s32.totalorder %v810_v59, 1  ;;  %v806_v18 = vrot.slane %v6124_v12, %v4603_v8  ;;  %v9103_v4 = vunpack.i.l.bf16 %v6161_v21  ;;  %v723_v12 = vpop.permute.xlu1 %722  ;;  %v3733_v60 = vpop.permute.xlu0 %3732 }
 0x130   :  { %3183 = vmatprep.subr.msk.bf16.mxu0 %vm9095_vm5, %v3182_v58  ;;  %vm9100_vm15 = vmpackc.low %vm9097_vm14, %vm9099_vm11  ;;  %vm9104_vm12 = vcmp.lt.s32.totalorder %v4806_v56, 31  ;;  %v3211_v5 = vpack.c.bf16 %v257_v30, %v92_v37  ;;  %v570_v58 = vsel %vm9090_vm8, %v3690_v61, %v3729_v57  ;;  %v9106_v11 = vunpack.i.l.bf16 %v9105_v48  ;;  %v9116_v48 = vld [vmem:[#allocation76_spill] sm:$0xff] }
 0x131   :  { %3209 = vmatprep.subr.msk.bf16.mxu1 %vm9100_vm15, %v3208_v29  ;;  %v414_v0 = vsel %vm9104_vm12, %v9103_v4, %v3685_v39  ;;  %vm9107_vm15 = vmmov %vm9104_vm12  ;;  %v9108_v29 = vld [vmem:[#allocation37_spill] sm:$0xff]  ;;  %vm9111_vm11 = vnez %v9110_v23  ;;  %v412_v30 = vsel %vm9104_vm12, %v3724_v35, %v3725_v32  ;;  %v3735_v23 = vunpack.i.h.bf16 %v3733_v60 }
 0x132   :  { %v411_v59 = vsel %vm9107_vm15, %v3725_v32, %v9106_v11  ;;  %vm9109_vm5 = vnez %v9108_v29  ;;  %vm9113_vm3 = vmmov %vm9090_vm8  ;;  %vm9115_vm15 = vcmask 588800   ;;  %v9117_v11 = vunpack.i.l.bf16 %v9116_v48 }
 0x133   :  { %vm9112_vm14 = vmpackc.low %vm9109_vm5, %vm9111_vm11  ;;  %v569_v21 = vsel %vm9113_vm3, %v3729_v57, %v3730_v49  ;;  %v3214_v37 = vpack.c.bf16 %v568_v10, %v411_v59  ;;  %3180 = vmatmul.mubr.msk.bf16.vlgmr.msra.gmra.mrb[8].mxu1 %vm9115_vm15, %v5623_v45  ;;  %v3734_v29 = vunpack.i.l.bf16 %v3733_v60  ;;  %v9119_v49 = vld [vmem:[#allocation39_spill] sm:$0xff]  ;;  %v9121_v57 = vld [vmem:[#allocation38_spill] sm:$0xff]  ;;  %v3191_v32 = vpack.c.bf16 %v571_v33, %v414_v0  ;;  %v3738_v48 = vpop.permute.xlu0 %3737 }
 0x134   :  { %3186 = vmatpush1.bf16.msk.msra.mxu0 %vm9112_vm14, %v3185_v51  ;;  %vm9114_vm8 = vmmov %vm9104_vm12  ;;  %vm9118_vm14 = vcmp.lt.s32.totalorder %v4806_v56, 127  ;;  %vm9120_vm3 = vnez %v9119_v49  ;;  %vm9122_vm12 = vnez %v9121_v57  ;;  %1756 = vmatprep.mubr.bf16.mxu1 %v8593_v63  ;;  %v9129_v10 = vmov 0  ;;  %v9149_v60 = vld [vmem:[#allocation44_spill] sm:$0xff] }
 0x135   :  { %v413_v61 = vsel %vm9114_vm8, %v3685_v39, %v3724_v35  ;;  %v740_v51 = vsel %vm9118_vm14, %v723_v12, %v9117_v11  ;;  %vm9123_vm11 = vmpackc.low %vm9120_vm3, %vm9122_vm12  ;;  %v9124_v35 = vld [vmem:[#allocation43_spill] sm:$0xff]  ;;  %v9126_v39 = vld [vmem:[#allocation42_spill] sm:$0xff]  ;;  %vm6486_vm0 = vcmp.eq.s32.totalorder %v798_v55, 1  ;;  %v1263_v33 = vrot.slane %v6133_v38, %v4577_v53  ;;  %v3743_v53 = vpop.permute.xlu1 %3742 }
 0x136   :  { %v3188_v4 = vpack.c.bf16 %v570_v58, %v413_v61  ;;  %3212 = vmatpush1.bf16.msk.msra.mxu1 %vm9123_vm11, %v3211_v5  ;;  %vm9125_vm8 = vnez %v9124_v35  ;;  %vm9127_vm15 = vnez %v9126_v39  ;;  %vm6482_vm14 = vmpackc.low %vm6375_vm2, %vm8870_vm6  ;;  %vm6492_vm11 = vcmp.eq.s32.totalorder %v806_v18, 1  ;;  %v9139_v61 = vld [vmem:[#allocation41_spill] sm:$0xff]  ;;  %v9152_v39 = vld [vmem:[#allocation47_spill] sm:$0xff] }
 0x137   :  { %vm9128_vm5 = vmpackc.low %vm9125_vm8, %vm9127_vm15  ;;  %v9130_v10 = vsel %vm6482_vm14, 4294967295, %v9129_v10  ;;  %v3217_v5 = vpack.c.bf16 %v569_v21, %v412_v30  ;;  %vm9140_vm8 = vnez %v9139_v61  ;;  %v9144_v18 = vmov 0  ;;  %v4069_v21 = vld [vmem:[%s7977_s0 + $0x60] sm:$0xff] }
 0x138   :  { %3215 = vmatprep.subr.msk.bf16.mxu1 %vm9128_vm5, %v3214_v37  ;;  %9131 = vst [vmem:[#allocation58_spill] sm:$0xff] %v9130_v10  ;;  %vm9136_vm5 = vcmp.lt.s32.totalorder %v4806_v56, 127  ;;  %v9141_v37 = vld [vmem:[#allocation40_spill] sm:$0xff]  ;;  %vm6511_vm10 = vmpackc.low %vm6435_vm4, %vm8870_vm6  ;;  %vm9148_vm4 = vnez %v9147_v31  ;;  %v3744_v11 = vunpack.i.l.bf16 %v3743_v53  ;;  %v9154_v35 = vld [vmem:[#allocation46_spill] sm:$0xff]  ;;  %v9160_v58 = vmov 0 }
 0x139   :  { %v725_v59 = vsel %vm9136_vm5, %v3735_v23, %v723_v12  ;;  %vm9137_vm2 = vmmov %vm9136_vm5  ;;  %vm9142_vm12 = vnez %v9141_v37  ;;  %v9145_v18 = vsel %vm6511_vm10, 4294967295, %v9144_v18  ;;  %vm9153_vm5 = vnez %v9152_v39 }
 0x13a   :  { %v726_v3 = vsel %vm9137_vm2, %v3734_v29, %v3735_v23  ;;  %vm9138_vm15 = vmmov %vm9137_vm2  ;;  %9146 = vst [vmem:[#allocation48_spill] sm:$0xff] %v9145_v18  ;;  %v4067_v23 = vld [vmem:[%s7977_s0 + $0x78] sm:$0xff]  ;;  %vm9155_vm2 = vnez %v9154_v35 }
 0x13b   :  { %v727_v55 = vsel %vm9138_vm15, %v6195_v46, %v3734_v29  ;;  %vm9143_vm3 = vmpackc.low %vm9140_vm8, %vm9142_vm12  ;;  %v3220_v12 = vpack.c.bf16 %v740_v51, %v4067_v23  ;;  %v4068_v46 = vld [vmem:[%s7977_s0 + $0x68] sm:$0xff]  ;;  %v3740_v51 = vunpack.i.h.bf16 %v3738_v48  ;;  %v3739_v23 = vunpack.i.l.bf16 %v3738_v48 }
 0x13c   :  { %3189 = vmatprep.subr.msk.bf16.mxu0 %vm9143_vm3, %v3188_v4  ;;  %v3194_v29 = vpack.c.bf16 %v726_v3, %v4068_v46  ;;  %v3197_v30 = vpack.c.bf16 %v727_v55, %v4069_v21  ;;  %vm9150_vm3 = vnez %v9149_v60  ;;  %v3745_v4 = vunpack.i.h.bf16 %v3743_v53  ;;  %vm9156_vm12 = vmpackc.low %vm9153_vm5, %vm9155_vm2  ;;  %v4070_v55 = vld [vmem:[%s7977_s0 + $0x70] sm:$0xff] }
 0x13d   :  { %vm9151_vm15 = vmpackc.low %vm9148_vm4, %vm9150_vm3  ;;  %3218 = vmatpush1.bf16.msk.msra.mxu1 %vm9156_vm12, %v3217_v5  ;;  %v9157_v3 = vmov 0  ;;  %v3223_v53 = vpack.c.bf16 %v725_v59, %v4070_v55  ;;  %v1271_v5 = vrot.slane %v6133_v38, %v4600_v41  ;;  %vm9163_vm12 = vcmp.lt.s32.totalorder %v4806_v56, 96  ;;  %v3748_v41 = vpop.permute.xlu0 %3747  ;;  %v9185_v55 = vld [vmem:[#allocation81_spill] sm:$0xff] }
 0x13e   :  { %3192 = vmatpush1.bf16.msk.msra.mxu0 %vm9151_vm15, %v3191_v32  ;;  %vm6537_vm8 = vmpackc.low %vm6486_vm0, %vm8870_vm6  ;;  %v1259_v32 = vrot.slane %v6133_v38, %v4597_v7  ;;  %3221 = vmatprep.subr.msk.bf16.mxu1 %vm6511_vm10, %v3220_v12  ;;  %v1267_v7 = vrot.slane %v6133_v38, %v4603_v8  ;;  %v1036_v59 = vsel %vm9163_vm12, %v3744_v11, %v3745_v4  ;;  %vm9165_vm10 = vcmp.lt.s32.totalorder %v4806_v56, 97 }
 0x13f   :  { %v9158_v3 = vsel %vm6537_vm8, 4294967295, %v9157_v3  ;;  %3195 = vmatprep.subr.msk.bf16.mxu0 %vm6482_vm14, %v3194_v29  ;;  %vm6553_vm0 = vmpackc.low %vm6492_vm11, %vm8870_vm6  ;;  %v877_v0 = vsel %vm9165_vm10, %v3739_v23, %v3740_v51  ;;  %v874_v29 = vpop.permute.xlu1 %873  ;;  %vm6573_vm11 = vcmp.eq.s32.totalorder %v1263_v33, 1  ;;  %v9167_v38 = vmov 0 }
 0x140   :  { %9159 = vst [vmem:[#allocation68_spill] sm:$0xff] %v9158_v3  ;;  %v9161_v58 = vsel %vm6553_vm0, 4294967295, %v9160_v58  ;;  %vm9164_vm15 = vmmov %vm9163_vm12  ;;  %v3200_v21 = vpack.c.bf16 %v1036_v59, %v877_v0  ;;  %v9168_v38 = vsel %vm6573_vm11, 4294967295, %v9167_v38  ;;  %v3750_v48 = vunpack.i.h.bf16 %v3748_v41 }
 0x141   :  { %9162 = vst [vmem:[#allocation70_spill] sm:$0xff] %v9161_v58  ;;  %v1037_v12 = vsel %vm9164_vm15, %v6354_v40, %v3744_v11  ;;  %vm9166_vm6 = vmmov %vm9165_vm10  ;;  %v3749_v40 = vunpack.i.l.bf16 %v3748_v41  ;;  %3224 = vmatpush1.bf16.msk.msra.mxu1 %vm6553_vm0, %v3223_v53  ;;  %vm6579_vm10 = vcmp.eq.s32.totalorder %v1259_v32, 1  ;;  %v9170_v11 = vmov 0  ;;  %v9203_v58 = vld [vmem:[#allocation65_spill] sm:$0xff] }
 0x142   :  { %v878_v46 = vsel %vm9166_vm6, %v6301_v16, %v3739_v23  ;;  %3198 = vmatpush1.bf16.msk.msra.mxu0 %vm6537_vm8, %v3197_v30  ;;  %9169 = vst [vmem:[#allocation76_spill] sm:$0xff] %v9168_v38  ;;  %v9171_v11 = vsel %vm6579_vm10, 4294967295, %v9170_v11  ;;  %v9173_v16 = vld [vmem:[#allocation56_spill] sm:$0xff]  ;;  %v9175_v23 = vld [vmem:[#allocation55_spill] sm:$0xff]  ;;  %vm6588_vm8 = vcmp.eq.s32.totalorder %v1267_v7, 1  ;;  %v9178_v33 = vmov 0 }
 0x143   :  { %v3203_v8 = vpack.c.bf16 %v1037_v12, %v878_v46  ;;  %9172 = vst [vmem:[#allocation109_spill] sm:$0xff] %v9171_v11  ;;  %vm9174_vm12 = vnez %v9173_v16  ;;  %vm9176_vm15 = vnez %v9175_v23  ;;  %v9179_v33 = vsel %vm6588_vm8, 4294967295, %v9178_v33  ;;  %v1184_v0 = vpop.permute.xlu1 %1183  ;;  %v9190_v46 = vld [vmem:[#allocation61_spill] sm:$0xff] }
 0x144   :  { %vm9177_vm6 = vmpackc.low %vm9174_vm12, %vm9176_vm15  ;;  %9180 = vst [vmem:[#allocation110_spill] sm:$0xff] %v9179_v33  ;;  %vm6592_vm14 = vcmp.eq.s32.totalorder %v1271_v5, 1  ;;  %v9181_v30 = vmov 0  ;;  %vm9184_vm0 = vcmp.lt.s32.totalorder %v4806_v56, 97  ;;  %v9186_v53 = vunpack.i.l.bf16 %v9185_v55 }
 0x145   :  { %3201 = vmatprep.subr.msk.bf16.mxu0 %vm9177_vm6, %v3200_v21  ;;  %v9182_v30 = vsel %vm6592_vm14, 4294967295, %v9181_v30  ;;  %v876_v32 = vsel %vm9184_vm0, %v3740_v51, %v874_v29  ;;  %vm9187_vm2 = vmmov %vm9184_vm0  ;;  %vm9188_vm5 = vcmp.lt.s32.totalorder %v4806_v56, 95  ;;  %vm9191_vm15 = vnez %v9190_v46  ;;  %v9192_v21 = vld [vmem:[#allocation60_spill] sm:$0xff] }
 0x146   :  { %9183 = vst [vmem:[#allocation111_spill] sm:$0xff] %v9182_v30  ;;  %v891_v59 = vsel %vm9187_vm2, %v874_v29, %v9186_v53  ;;  %v1187_v12 = vsel %vm9188_vm5, %v3749_v40, %v3750_v48  ;;  %vm9189_vm6 = vmmov %vm9188_vm5  ;;  %vm9193_vm0 = vnez %v9192_v21  ;;  %v9196_v29 = vld [vmem:[#allocation86_spill] sm:$0xff]  ;;  %v1033_v53 = vpop.permute.xlu0 %1032  ;;  %vm9199_vm2 = vcmp.lt.s32.totalorder %v4806_v56, 96  ;;  %v9200_v21 = vld [vmem:[#allocation87_spill] sm:$0xff] }
 0x147   :  { %v1188_v7 = vsel %vm9189_vm6, %v6345_v42, %v3749_v40  ;;  %v1301_v5 = vsel %vm6573_vm11, %v1187_v12, 0.0  ;;  %vm9194_vm12 = vmpackc.low %vm9191_vm15, %vm9193_vm0  ;;  %v9197_v41 = vunpack.i.l.bf16 %v9196_v29  ;;  %vm9217_vm11 = vcmask 588800  }
 0x148   :  { %3204 = vmatpush1.bf16.msk.msra.mxu0 %vm9194_vm12, %v3203_v8  ;;  %vm9195_vm3 = vmmov %vm9188_vm5  ;;  %v1300_v42 = vsel %vm6579_vm10, %v1188_v7, 0.0  ;;  %v1035_v8 = vsel %vm9199_vm2, %v3745_v4, %v1033_v53  ;;  %v1381_v23 = vpack.c.bf16 %v1301_v5, %v1301_v5  ;;  %vm9204_vm12 = vnez %v9203_v58 }
 0x149   :  { %v1186_v51 = vsel %vm9195_vm3, %v3750_v48, %v1184_v0  ;;  %vm9198_vm5 = vmmov %vm9195_vm3  ;;  %v9201_v48 = vunpack.i.l.bf16 %v9200_v21  ;;  %v1380_v16 = vpack.c.bf16 %v1300_v42, %v1300_v42  ;;  %v9210_v21 = vld [vmem:[#allocation67_spill] sm:$0xff] }
 0x14a   :  { %v1201_v55 = vsel %vm9198_vm5, %v1184_v0, %v9197_v41  ;;  %v1302_v40 = vsel %vm6588_vm8, %v1186_v51, 0.0  ;;  %vm9202_vm3 = vmmov %vm9199_vm2  ;;  %v3229_v41 = vpack.c.bf16 %v1035_v8, %v876_v32  ;;  %v9205_v51 = vld [vmem:[#allocation64_spill] sm:$0xff]  ;;  %vm9211_vm8 = vnez %v9210_v21 }
 0x14b   :  { %v1303_v12 = vsel %vm6592_vm14, %v1201_v55, 0.0  ;;  %v1050_v29 = vsel %vm9202_vm3, %v1033_v53, %v9201_v48  ;;  %v1382_v7 = vpack.c.bf16 %v1302_v40, %v1302_v40  ;;  %vm9206_vm6 = vnez %v9205_v51  ;;  %v9212_v55 = vld [vmem:[#allocation66_spill] sm:$0xff] }
 0x14c   :  { %v1383_v46 = vpack.c.bf16 %v1303_v12, %v1303_v12  ;;  %v3226_v0 = vpack.c.bf16 %v1050_v29, %v891_v59  ;;  %vm9207_vm5 = vmpackc.low %vm9204_vm12, %vm9206_vm6  ;;  %vm9208_vm14 = vcmask 1043456   ;;  %vm9213_vm3 = vnez %v9212_v55 }
 0x14d   :  { %3205 = vmatprep.subr.msk.bf16.mxu0 %vm9208_vm14, %v1381_v23  ;;  %vm9209_vm2 = vmmov %vm9208_vm14 }
 0x14e   :  { %3227 = vmatprep.subr.msk.bf16.mxu1 %vm9207_vm5, %v3226_v0  ;;  %v1426_v4 = vsel %vm9209_vm2, %v1380_v16, 0  ;;  %vm9214_vm0 = vmpackc.low %vm9211_vm8, %vm9213_vm3 }
 0x14f   :  { %3230 = vmatpush1.bf16.msk.msra.mxu1 %vm9214_vm0, %v3229_v41  ;;  %1692 = vmatpush1.bf16.msra.mxu0 %v1426_v4  ;;  %vm9215_vm15 = vmmov %vm9209_vm2 }
 0x150   :  { %3231 = vmatprep.subr.msk.bf16.mxu1 %vm9215_vm15, %v1383_v46  ;;  %vm9216_vm10 = vmmov %vm9209_vm2 }
 0x151   :  { %v1432_v32 = vsel %vm9216_vm10, %v1382_v7, 0  ;;  %vm9218_vm14 = vmmov %vm9217_vm11  ;;  %vm9225_vm10 = vcmp.lt.s32.totalorder %v4806_v56, 32 }
 0x152   :  { %3206 = vmatmul.mubr.msk.bf16.vlgmr.msra.gmra.mrb[12].mxu0 %vm9217_vm11, %v5623_v45  ;;  %vm9224_vm11 = vcmp.lt.s32.totalorder %v4806_v56, 33 }
 0x153   :  { %1733 = vmatpush1.bf16.msra.mxu1 %v1432_v32  ;;  %2576 = vmatprep.mubr.bf16.mxu0 %v8593_v63  ;;  %vm9232_vm2 = vmmov %vm9224_vm11 }
 0x156   :  { %3232 = vmatmul.mubr.msk.bf16.vlgmr.msra.gmra.mrb[12].mxu1 %vm9218_vm14, %v5623_v45  ;;  %vm9233_vm14 = vmmov %vm9225_vm10 }
 0x157   :  { %2617 = vmatprep.mubr.bf16.mxu1 %v8593_v63 }
 0x19c   :  { %v6652_v16 = vpop.f32.mrb[0].mxu0 }
 0x19d   :  { %v1783_v23 = vmul.f32 %v6652_v16, %v6652_v16  ;;  %v6656_v59 = vpop.f32.mrb[1].mxu0 }
 0x19e   :  { %v1765_v5 = vadd.f32 %v6656_v59, %v6652_v16  ;;  %v1784_v46 = vmul.f32 %v6656_v59, %v6656_v59  ;;  %v1475_v53 = vpop.f32.mrb[2].mxu0 }
 0x19f   :  { %v1476_v42 = vpop.f32.mrb[3].mxu0 }
 0x1a0   :  { %v1799_v40 = vadd.f32 %v1784_v46, %v1783_v23 }
 0x1aa   :  { %v6662_v12 = vpop.f32.mrb[0].mxu1 }
 0x1ab   :  { %v1766_v45 = vadd.f32 %v1765_v5, %v6662_v12  ;;  %v1785_v8 = vmul.f32 %v6662_v12, %v6662_v12  ;;  %v6667_v48 = vpop.f32.mrb[1].mxu1 }
 0x1ac   :  { %v1786_v29 = vmul.f32 %v6667_v48, %v6667_v48  ;;  %v1516_v0 = vpop.f32.mrb[2].mxu1 }
 0x1ad   :  { %v1800_v41 = vadd.f32 %v1799_v40, %v1785_v8  ;;  %v1767_v7 = vadd.f32 %v1766_v45, %v6667_v48  ;;  %v1517_v4 = vpop.f32.mrb[3].mxu1 }
 0x1af   :  { %v1801_v32 = vadd.f32 %v1800_v41, %v1786_v29 }
 0x1cf   :  { %v6672_v53 = vpop.f32.mrb[4].mxu0 }
 0x1d0   :  { %v1768_v23 = vadd.f32 %v1767_v7, %v6672_v53  ;;  %v1787_v5 = vmul.f32 %v6672_v53, %v6672_v53  ;;  %v6677_v46 = vpop.f32.mrb[5].mxu0 }
 0x1d1   :  { %v1788_v42 = vmul.f32 %v6677_v46, %v6677_v46  ;;  %v1557_v30 = vpop.f32.mrb[6].mxu0 }
 0x1d2   :  { %v1802_v33 = vadd.f32 %v1801_v32, %v1787_v5  ;;  %v1769_v40 = vadd.f32 %v1768_v23, %v6677_v46  ;;  %v1558_v8 = vpop.f32.mrb[7].mxu0 }
 0x1d4   :  { %v1803_v45 = vadd.f32 %v1802_v33, %v1788_v42 }
 0x1d9   :  { %v6682_v0 = vpop.f32.mrb[4].mxu1 }
 0x1da   :  { %v1770_v29 = vadd.f32 %v1769_v40, %v6682_v0  ;;  %v1789_v41 = vmul.f32 %v6682_v0, %v6682_v0  ;;  %v6687_v7 = vpop.f32.mrb[5].mxu1 }
 0x1db   :  { %v1790_v4 = vmul.f32 %v6687_v7, %v6687_v7  ;;  %v1598_v55 = vpop.f32.mrb[6].mxu1 }
 0x1dc   :  { %v1804_v21 = vadd.f32 %v1803_v45, %v1789_v41  ;;  %v1771_v30 = vadd.f32 %v1770_v29, %v6687_v7  ;;  %v1599_v32 = vpop.f32.mrb[7].mxu1 }
 0x1de   :  { %v1805_v23 = vadd.f32 %v1804_v21, %v1790_v4 }
 0x1fd   :  { %v6692_v5 = vpop.f32.mrb[8].mxu0 }
 0x1fe   :  { %v1772_v33 = vadd.f32 %v1771_v30, %v6692_v5  ;;  %v1791_v42 = vmul.f32 %v6692_v5, %v6692_v5  ;;  %v6697_v40 = vpop.f32.mrb[9].mxu0 }
 0x1ff   :  { %v1792_v8 = vmul.f32 %v6697_v40, %v6697_v40  ;;  %v1639_v51 = vpop.f32.mrb[10].mxu0 }
 0x200   :  { %v1806_v58 = vadd.f32 %v1805_v23, %v1791_v42  ;;  %v1773_v55 = vadd.f32 %v1772_v33, %v6697_v40  ;;  %v1640_v45 = vpop.f32.mrb[11].mxu0 }
 0x202   :  { %v1807_v29 = vadd.f32 %v1806_v58, %v1792_v8 }
 0x206   :  { %v6702_v41 = vpop.f32.mrb[8].mxu1 }
 0x207   :  { %v1774_v21 = vadd.f32 %v1773_v55, %v6702_v41  ;;  %v1793_v4 = vmul.f32 %v6702_v41, %v6702_v41  ;;  %v6707_v30 = vpop.f32.mrb[9].mxu1 }
 0x208   :  { %v1794_v32 = vmul.f32 %v6707_v30, %v6707_v30  ;;  %v1680_v3 = vpop.f32.mrb[10].mxu1 }
 0x209   :  { %v1808_v11 = vadd.f32 %v1807_v29, %v1793_v4  ;;  %v1775_v51 = vadd.f32 %v1774_v21, %v6707_v30  ;;  %v1681_v23 = vpop.f32.mrb[11].mxu1 }
 0x20b   :  { %v1809_v33 = vadd.f32 %v1808_v11, %v1794_v32 }
 0x225   :  { %v6712_v42 = vpop.f32.mrb[12].mxu0 }
 0x226   :  { %v1776_v58 = vadd.f32 %v1775_v51, %v6712_v42  ;;  %v1795_v8 = vmul.f32 %v6712_v42, %v6712_v42  ;;  %v6717_v55 = vpop.f32.mrb[13].mxu0 }
 0x227   :  { %v1796_v45 = vmul.f32 %v6717_v55, %v6717_v55  ;;  %v1721_v38 = vpop.f32.mrb[14].mxu0 }
 0x228   :  { %v1810_v18 = vadd.f32 %v1809_v33, %v1795_v8  ;;  %v1777_v3 = vadd.f32 %v1776_v58, %v6717_v55  ;;  %v1722_v29 = vpop.f32.mrb[15].mxu0 }
 0x229   :  { %v6722_v21 = vpop.f32.mrb[12].mxu1 }
 0x22a   :  { %v1797_v11 = vmul.f32 %v6722_v21, %v6722_v21  ;;  %v1760_v4 = vpop.f32.mrb[13].mxu1  ;;  %v1778_v51 = vadd.f32 %v1777_v3, %v6722_v21  ;;  %v1811_v10 = vadd.f32 %v1810_v18, %v1796_v45  ;;  %v54_v3 = vld [vmem:[%s7981_s4] sm:$0xff] }
 0x22b   :  { %v1762_v32 = vpop.f32.mrb[14].mxu1  ;;  %v1798_v23 = vmul.f32 %v1760_v4, %v1760_v4 }
 0x22c   :  { %v1763_v35 = vpop.f32.mrb[15].mxu1  ;;  %v1779_v39 = vadd.f32 %v1778_v51, %v1760_v4  ;;  %v1812_v60 = vadd.f32 %v1811_v10, %v1797_v11 }
 0x22d   :  { %v55_v35 = vld [vmem:[%s7982_s5] sm:$0xff] }
 0x22e   :  { %1780 = vadd.xlane.f32.xlu0 %v1779_v39  ;;  %v1813_v38 = vadd.f32 %v1812_v60, %v1798_v23 }
 0x230   :  { %1814 = vadd.xlane.f32.xlu1 %v1813_v38 }
 0x2bb   :  { %v1781_v33 = vpop.xlane.xlu0 %1780 }
 0x2bc   :  { %v1782_v58 = vmul.f32 0.00048828125, %v1781_v33 }
 0x2bd   :  { %v1815_v8 = vpop.xlane.xlu1 %1814 }
 0x2be   :  { %v1817_v29 = vmul.f32 %v1782_v58, %v1782_v58  ;;  %v1816_v31 = vmul.f32 0.00048828125, %v1815_v8 }
 0x2c0   :  { %v1818_v37 = vsub.f32 %v1816_v31, %v1817_v29 }
 0x2c2   :  { %v1819_v61 = vadd.f32 1e-05, %v1818_v37 }
 0x2c4   :  { %4053 = vrsqrt.f32 %v1819_v61 }
 0x2ce   :  { %v4054_v32 = vpop.eup %4053 }
 0x2cf   :  { %v1821_v18 = vmul.f32 %v4054_v32, %v54_v3 }
 0x2d1   :  { %1826 = vperm.xlu0 %3751, %v1821_v18   ;;  %v1822_v39 = vmul.f32 %v1821_v18, %v1782_v58 }
 0x2d3   :  { %v1823_v10 = vsub.f32 %v55_v35, %v1822_v39 }
 0x2d5   :  { %1847 = vperm.xlu1 %3752, %v1823_v10  }
 0x350   :  { %v6733_v60 = vpop.permute.xlu0 %1826 }
 0x351   :  { %v1829_v37 = vmul.f32 %v6733_v60, %v6652_v16  ;;  %v1830_v61 = vmul.f32 %v6733_v60, %v6656_v59  ;;  %v1831_v31 = vmul.f32 %v6733_v60, %v6662_v12  ;;  %v1844_v45 = vmul.f32 %v6733_v60, %v1760_v4 }
 0x352   :  { %v1832_v51 = vmul.f32 %v6733_v60, %v6667_v48  ;;  %v1833_v23 = vmul.f32 %v6733_v60, %v6672_v53 }
 0x354   :  { %v6742_v11 = vpop.permute.xlu1 %1847 }
 0x355   :  { %v1850_v38 = vadd.f32 %v6742_v11, %v1829_v37  ;;  %v1851_v16 = vadd.f32 %v6742_v11, %v1830_v61  ;;  %v1852_v33 = vadd.f32 %v6742_v11, %v1831_v31  ;;  %v1865_v59 = vadd.f32 %v6742_v11, %v1844_v45 }
 0x356   :  { %v1853_v12 = vadd.f32 %v6742_v11, %v1832_v51  ;;  %v1854_v4 = vadd.f32 %v6742_v11, %v1833_v23  ;;  %v1834_v37 = vmul.f32 %v6733_v60, %v6677_v46 }
 0x357   :  { %v1866_v58 = vmul.f32 0.2, %v1850_v38  ;;  %v1867_v8 = vmul.f32 0.2, %v1851_v16  ;;  %v1868_v29 = vmul.f32 0.2, %v1852_v33 }
 0x358   :  { %v1881_v3 = vmul.f32 0.2, %v1865_v59  ;;  %v1869_v53 = vmul.f32 0.2, %v1853_v12  ;;  %v1870_v18 = vmul.f32 0.2, %v1854_v4  ;;  %v1855_v61 = vadd.f32 %v6742_v11, %v1834_v37 }
 0x359   :  { %v6754_v48 = vmax.f32 %v1850_v38, %v1866_v58  ;;  %v6756_v32 = vmax.f32 %v1851_v16, %v1867_v8  ;;  %v6760_v39 = vmax.f32 %v1852_v33, %v1868_v29  ;;  %v1836_v58 = vmul.f32 %v6733_v60, %v6687_v7 }
 0x35a   :  { %v6762_v10 = vmax.f32 %v1865_v59, %v1881_v3  ;;  %v6771_v45 = vmax.f32 %v1853_v12, %v1869_v53  ;;  %v6773_v51 = vmax.f32 %v1854_v4, %v1870_v18  ;;  %v1871_v23 = vmul.f32 0.2, %v1855_v61 }
 0x35b   :  { %v3783_v35 = vpack.i.bf16 %v6756_v32, %v6754_v48  ;;  %v3813_v38 = vpack.i.bf16 %v6760_v39, %v6756_v32  ;;  %v1835_v59 = vmul.f32 %v6733_v60, %v6682_v0  ;;  %v1837_v8 = vmul.f32 %v6733_v60, %v6692_v5 }
 0x35c   :  { %9219 = vst [vmem:[#allocation81_spill] sm:$0xff] %v6762_v10  ;;  %v3793_v31 = vpack.i.bf16 %v6760_v39, %v6762_v10  ;;  %v3803_v46 = vpack.i.bf16 %v6773_v51, %v6771_v45  ;;  %v6783_v16 = vmax.f32 %v1855_v61, %v1871_v23  ;;  %v3843_v12 = vpack.i.bf16 %v6771_v45, %v6754_v48 }
 0x35d   :  { %3784 = vrot.lane.b32.xlu0 %v3783_v35, %s4075_s24  ;;  %3754 = vrot.lane.b32.xlu1 %v3783_v35, %s4072_s17  ;;  %v1856_v4 = vadd.f32 %v6742_v11, %v1835_v59  ;;  %v1857_v29 = vadd.f32 %v6742_v11, %v1836_v58  ;;  %v3853_v0 = vpack.i.bf16 %v6771_v45, %v6760_v39 }
 0x35e   :  { %v3823_v33 = vpack.i.bf16 %v6783_v16, %v6773_v51  ;;  %v1858_v53 = vadd.f32 %v6742_v11, %v1837_v8 }
 0x35f   :  { %v1872_v3 = vmul.f32 0.2, %v1856_v4  ;;  %v1873_v7 = vmul.f32 0.2, %v1857_v29 }
 0x360   :  { %v1874_v37 = vmul.f32 0.2, %v1858_v53 }
 0x361   :  { %3794 = vrot.lane.b32.xlu0 %v3793_v31, %s4075_s24  ;;  %3759 = vrot.lane.b32.xlu1 %v3783_v35, %s4073_s22  ;;  %v6810_v18 = vmax.f32 %v1856_v4, %v1872_v3  ;;  %v6816_v61 = vmax.f32 %v1857_v29, %v1873_v7 }
 0x362   :  { %v6818_v23 = vmax.f32 %v1858_v53, %v1874_v37 }
 0x363   :  { %v3873_v5 = vpack.i.bf16 %v6810_v18, %v6783_v16  ;;  %v3913_v59 = vpack.i.bf16 %v6816_v61, %v6810_v18 }
 0x365   :  { %3804 = vrot.lane.b32.xlu0 %v3803_v46, %s4075_s24  ;;  %3764 = vrot.lane.b32.xlu1 %v3793_v31, %s4072_s17 }
 0x369   :  { %3814 = vrot.lane.b32.xlu0 %v3813_v38, %s4076_s27  ;;  %3769 = vrot.lane.b32.xlu1 %v3793_v31, %s4073_s22 }
 0x36d   :  { %3824 = vrot.lane.b32.xlu0 %v3823_v33, %s4076_s27  ;;  %3774 = vrot.lane.b32.xlu1 %v3803_v46, %s4072_s17 }
 0x371   :  { %3834 = vrot.lane.b32.xlu0 %v3813_v38, %s4078_s29  ;;  %3779 = vrot.lane.b32.xlu1 %v3803_v46, %s4073_s22 }
 0x375   :  { %3844 = vrot.lane.b32.xlu0 %v3843_v12, %s4078_s29  ;;  %3789 = vrot.lane.b32.xlu1 %v3783_v35, %s4074_s23 }
 0x379   :  { %3854 = vrot.lane.b32.xlu0 %v3853_v0, %s4079_s30  ;;  %3799 = vrot.lane.b32.xlu1 %v3793_v31, %s4074_s23  ;;  %v3883_v31 = vpack.i.bf16 %v6818_v23, %v6816_v61 }
 0x37d   :  { %3864 = vrot.lane.b32.xlu0 %v3823_v33, %s4078_s29  ;;  %3809 = vrot.lane.b32.xlu1 %v3803_v46, %s4074_s23  ;;  %v1838_v46 = vmul.f32 %v6733_v60, %v6697_v40  ;;  %v1840_v40 = vmul.f32 %v6733_v60, %v6707_v30 }
 0x37f   :  { %v1859_v4 = vadd.f32 %v6742_v11, %v1838_v46  ;;  %v1861_v0 = vadd.f32 %v6742_v11, %v1840_v40 }
 0x381   :  { %3874 = vrot.lane.b32.xlu0 %v3873_v5, %s4072_s17  ;;  %3819 = vrot.lane.b32.xlu1 %v3843_v12, %s4076_s27  ;;  %v1877_v30 = vmul.f32 0.2, %v1861_v0 }
 0x383   :  { %v6860_v7 = vmax.f32 %v1861_v0, %v1877_v30 }
 0x385   :  { %3884 = vrot.lane.b32.xlu0 %v3883_v31, %s4072_s17  ;;  %3829 = vrot.lane.b32.xlu1 %v3813_v38, %s4077_s28  ;;  %v1839_v38 = vmul.f32 %v6733_v60, %v6702_v41 }
 0x387   :  { %v1860_v58 = vadd.f32 %v6742_v11, %v1839_v38 }
 0x389   :  { %3894 = vrot.lane.b32.xlu0 %v3873_v5, %s4075_s24  ;;  %3839 = vrot.lane.b32.xlu1 %v3843_v12, %s4077_s28  ;;  %v1875_v12 = vmul.f32 0.2, %v1859_v4  ;;  %v1876_v29 = vmul.f32 0.2, %v1860_v58 }
 0x38b   :  { %v6846_v8 = vmax.f32 %v1859_v4, %v1875_v12  ;;  %v6854_v3 = vmax.f32 %v1860_v58, %v1876_v29 }
 0x38d   :  { %3904 = vrot.lane.b32.xlu0 %v3883_v31, %s4075_s24  ;;  %3849 = vrot.lane.b32.xlu1 %v3783_v35, %s4079_s30  ;;  %v1841_v35 = vmul.f32 %v6733_v60, %v6712_v42  ;;  %v3953_v42 = vpack.i.bf16 %v6854_v3, %v6846_v8  ;;  %v3993_v4 = vpack.i.bf16 %v6860_v7, %v6854_v3 }
 0x38f   :  { %v1862_v41 = vadd.f32 %v6742_v11, %v1841_v35 }
 0x391   :  { %3914 = vrot.lane.b32.xlu0 %v3913_v59, %s4076_s27  ;;  %3859 = vrot.lane.b32.xlu1 %v3823_v33, %s4077_s28  ;;  %v1878_v53 = vmul.f32 0.2, %v1862_v41 }
 0x393   :  { %v6862_v37 = vmax.f32 %v1862_v41, %v1878_v53 }
 0x395   :  { %3924 = vrot.lane.b32.xlu0 %v3913_v59, %s4077_s28  ;;  %3869 = vrot.lane.b32.xlu1 %v3823_v33, %s4079_s30  ;;  %v3943_v33 = vpack.i.bf16 %v6846_v8, %v6818_v23  ;;  %9220 = vst [vmem:[#allocation86_spill] sm:$0xff] %v6862_v37  ;;  %v3963_v46 = vpack.i.bf16 %v6862_v37, %v6860_v7 }
 0x399   :  { %3934 = vrot.lane.b32.xlu0 %v3913_v59, %s4079_s30  ;;  %3879 = vrot.lane.b32.xlu1 %v3873_v5, %s4073_s22 }
 0x39d   :  { %3944 = vrot.lane.b32.xlu0 %v3943_v33, %s4078_s29  ;;  %3889 = vrot.lane.b32.xlu1 %v3883_v31, %s4073_s22 }
 0x3a1   :  { %3954 = vrot.lane.b32.xlu0 %v3953_v42, %s4072_s17  ;;  %3899 = vrot.lane.b32.xlu1 %v3873_v5, %s4074_s23  ;;  %v1842_v5 = vmul.f32 %v6733_v60, %v6717_v55 }
 0x3a3   :  { %v1863_v38 = vadd.f32 %v6742_v11, %v1842_v5 }
 0x3a5   :  { %3964 = vrot.lane.b32.xlu0 %v3963_v46, %s4072_s17  ;;  %3909 = vrot.lane.b32.xlu1 %v3883_v31, %s4074_s23  ;;  %v1843_v31 = vmul.f32 %v6733_v60, %v6722_v21 }
 0x3a7   :  { %v1864_v12 = vadd.f32 %v6742_v11, %v1843_v31  ;;  %v9226_v31 = vld [vmem:[#allocation52_spill] sm:$0xff] }
 0x3a8   :  { %vm9227_vm15 = vnez %v9226_v31 }
 0x3a9   :  { %3974 = vrot.lane.b32.xlu0 %v3953_v42, %s4075_s24  ;;  %3919 = vrot.lane.b32.xlu1 %v3943_v33, %s4076_s27  ;;  %v1880_v58 = vmul.f32 0.2, %v1864_v12 }
 0x3ab   :  { %v6890_v55 = vmax.f32 %v1864_v12, %v1880_v58 }
 0x3ad   :  { %3984 = vrot.lane.b32.xlu0 %v3963_v46, %s4075_s24  ;;  %3929 = vrot.lane.b32.xlu1 %v3913_v59, %s4078_s29  ;;  %v1879_v59 = vmul.f32 0.2, %v1863_v38  ;;  %9222 = vst [vmem:[#allocation112_spill] sm:$0xff] %v6890_v55 }
 0x3af   :  { %v6888_v40 = vmax.f32 %v1863_v38, %v1879_v59  ;;  %v9228_v38 = vld [vmem:[#allocation49_spill] sm:$0xff] }
 0x3b0   :  { %vm9229_vm0 = vnez %v9228_v38 }
 0x3b1   :  { %3994 = vrot.lane.b32.xlu0 %v3993_v4, %s4076_s27  ;;  %3939 = vrot.lane.b32.xlu1 %v3943_v33, %s4077_s28  ;;  %9221 = vst [vmem:[#allocation87_spill] sm:$0xff] %v6888_v40  ;;  %v4013_v21 = vpack.i.bf16 %v6890_v55, %v6888_v40  ;;  %vm9230_vm5 = vmpackc.low %vm9227_vm15, %vm9229_vm0  ;;  %v9234_v55 = vld [vmem:[#allocation53_spill] sm:$0xff] }
 0x3b2   :  { %vm9239_vm0 = vmmov %vm9233_vm14 }
 0x3b5   :  { %3999 = vrot.lane.b32.xlu0 %v3993_v4, %s4077_s28  ;;  %3949 = vrot.lane.b32.xlu1 %v3943_v33, %s4079_s30 }
 0x3b9   :  { %4009 = vrot.lane.b32.xlu0 %v3993_v4, %s4079_s30  ;;  %3959 = vrot.lane.b32.xlu1 %v3953_v42, %s4073_s22 }
 0x3bd   :  { %2309 = vrot.lane.b32.xlu0 %v6862_v37, %s4078_s29  ;;  %3969 = vrot.lane.b32.xlu1 %v3963_v46, %s4073_s22 }
 0x3c1   :  { %4014 = vrot.lane.b32.xlu0 %v4013_v21, %s4072_s17  ;;  %3979 = vrot.lane.b32.xlu1 %v3953_v42, %s4074_s23 }
 0x3c5   :  { %4024 = vrot.lane.b32.xlu0 %v4013_v21, %s4075_s24  ;;  %3989 = vrot.lane.b32.xlu1 %v3963_v46, %s4074_s23 }
 0x3c9   :  { %4034 = vrot.lane.b32.xlu0 %v4013_v21, %s4076_s27  ;;  %2181 = vrot.lane.b32.xlu1 %v6862_v37, %s4076_s27 }
 0x3cd   :  { %4039 = vrot.lane.b32.xlu0 %v4013_v21, %s4077_s28  ;;  %4004 = vrot.lane.b32.xlu1 %v3993_v4, %s4078_s29 }
 0x3cf   :  { %v6906_v60 = vpop.permute.xlu0 %3784  ;;  %v3755_v11 = vpop.permute.xlu1 %3754 }
 0x3d0   :  { %v3757_v35 = vunpack.i.h.bf16 %v3755_v11  ;;  %v3756_v29 = vunpack.i.l.bf16 %v3755_v11 }
 0x3d1   :  { %4049 = vrot.lane.b32.xlu0 %v4013_v21, %s4079_s30  ;;  %2245 = vrot.lane.b32.xlu1 %v6862_v37, %s4077_s28 }
 0x3d2   :  { %v1947_v53 = vsel %vm9224_vm11, %v3756_v29, %v3757_v35  ;;  %vm9235_vm11 = vnez %v9234_v55  ;;  %v3787_v55 = vunpack.i.h.bf16 %v6906_v60 }
 0x3d3   :  { %v6911_v0 = vpop.permute.xlu0 %3794  ;;  %v3760_v41 = vpop.permute.xlu1 %3759 }
 0x3d4   :  { %9223 = vst [vmem:[#allocation113_spill] sm:$0xff] %v6911_v0  ;;  %v3762_v33 = vunpack.i.h.bf16 %v3760_v41  ;;  %v3761_v30 = vunpack.i.l.bf16 %v3760_v41 }
 0x3d5   :  { %2315 = vrot.lane.b32.xlu0 %v6762_v10, %s4078_s29  ;;  %2373 = vrot.lane.b32.xlu1 %v6862_v37, %s4079_s30  ;;  %v9236_v37 = vld [vmem:[#allocation50_spill] sm:$0xff] }
 0x3d6   :  { %v2011_v42 = vsel %vm9225_vm10, %v3761_v30, %v3762_v33  ;;  %vm9237_vm10 = vnez %v9236_v37  ;;  %v3786_v37 = vunpack.i.l.bf16 %v6906_v60 }
 0x3d7   :  { %v3234_v46 = vpack.c.bf16 %v2011_v42, %v1947_v53  ;;  %v6921_v4 = vpop.permute.xlu0 %3804  ;;  %v6923_v5 = vpop.permute.xlu1 %3764  ;;  %vm9238_vm15 = vmpackc.low %vm9235_vm11, %vm9237_vm10 }
 0x3d8   :  { %v8374_v12 = vunpack.i.l.bf16 %v6923_v5 }
 0x3d9   :  { %4019 = vrot.lane.b32.xlu1 %v4013_v21, %s4073_s22  ;;  %3235 = vmatprep.subr.msk.bf16.mxu0 %vm9230_vm5, %v3234_v46  ;;  %vm9240_vm5 = vmmov %vm9232_vm2 }
 0x3da   :  { %v1948_v41 = vsel %vm9232_vm2, %v8374_v12, %v3756_v29  ;;  %vm9241_vm2 = vmmov %vm9239_vm0 }
 0x3db   :  { %v6932_v59 = vpop.permute.xlu0 %3814  ;;  %v6934_v58 = vpop.permute.xlu1 %3769 }
 0x3dc   :  { %9231 = vst [vmem:[#allocation52_spill] sm:$0xff] %v6934_v58  ;;  %v8373_v11 = vunpack.i.l.bf16 %v6934_v58  ;;  %v3772_v38 = vunpack.i.h.bf16 %v6934_v58  ;;  %v3817_v27 = vunpack.i.h.bf16 %v6932_v59  ;;  %v3816_v22 = vunpack.i.l.bf16 %v6932_v59  ;;  %v9253_v59 = vld [vmem:[#allocation54_spill] sm:$0xff] }
 0x3dd   :  { %4029 = vrot.lane.b32.xlu1 %v4013_v21, %s4074_s23 }
 0x3de   :  { %v2012_v53 = vsel %vm9233_vm14, %v8373_v11, %v3761_v30  ;;  %v3767_v30 = vunpack.i.h.bf16 %v6923_v5  ;;  %v2010_v12 = vsel %vm9239_vm0, %v3762_v33, %v3772_v38  ;;  %vm9242_vm14 = vmmov %vm9240_vm5  ;;  %vm9249_vm0 = vcmp.lt.s32.totalorder %v4806_v56, 31 }
 0x3df   :  { %v3237_v42 = vpack.c.bf16 %v2012_v53, %v1948_v41  ;;  %v6946_v46 = vpop.permute.xlu0 %3824  ;;  %v6948_v31 = vpop.permute.xlu1 %3774 }
 0x3e0   :  { %v8376_v29 = vunpack.i.l.bf16 %v6948_v31  ;;  %v1946_v57 = vsel %vm9242_vm14, %v3757_v35, %v3767_v30  ;;  %vm9254_vm14 = vnez %v9253_v59  ;;  %v9260_v59 = vld [vmem:[#allocation62_spill] sm:$0xff] }
 0x3e1   :  { %2187 = vrot.lane.b32.xlu1 %v6762_v10, %s4076_s27  ;;  %3238 = vmatpush1.bf16.msk.msra.mxu0 %vm9238_vm15, %v3237_v42  ;;  %v3263_v47 = vpack.c.bf16 %v2010_v12, %v1946_v57  ;;  %v8380_v57 = vunpack.i.l.bf16 %v6911_v0  ;;  %v9251_v12 = vld [vmem:[#allocation59_spill] sm:$0xff] }
 0x3e2   :  { %v1945_v42 = vsel %vm9240_vm5, %v3767_v30, %v8376_v29  ;;  %v9244_v29 = vld [vmem:[#allocation57_spill] sm:$0xff]  ;;  %vm9250_vm5 = vcmp.lt.s32.totalorder %v4806_v56, 1 }
 0x3e3   :  { %v6960_v41 = vpop.permute.xlu0 %3834  ;;  %v6962_v53 = vpop.permute.xlu1 %3779  ;;  %vm9245_vm11 = vnez %v9244_v29 }
 0x3e4   :  { %v8377_v11 = vunpack.i.l.bf16 %v6962_v53 }
 0x3e5   :  { %4044 = vrot.lane.b32.xlu1 %v4013_v21, %s4078_s29 }
 0x3e6   :  { %v2009_v40 = vsel %vm9241_vm2, %v3772_v38, %v8377_v11  ;;  %v9246_v38 = vld [vmem:[#allocation51_spill] sm:$0xff]  ;;  %vm9252_vm2 = vnez %v9251_v12  ;;  %v3797_v11 = vunpack.i.h.bf16 %v6911_v0  ;;  %v9276_v0 = vld [vmem:[#allocation73_spill] sm:$0xff] }
 0x3e7   :  { %v3260_v33 = vpack.c.bf16 %v2009_v40, %v1945_v42  ;;  %v6980_v49 = vpop.permute.xlu0 %3844  ;;  %v3790_v21 = vpop.permute.xlu1 %3789  ;;  %vm9247_vm10 = vnez %v9246_v38  ;;  %v2075_v40 = vsel %vm9249_vm0, %v3786_v37, %v3787_v55  ;;  %vm9255_vm3 = vmpackc.low %vm9252_vm2, %vm9254_vm14  ;;  %v9258_v12 = vld [vmem:[#allocation63_spill] sm:$0xff] }
 0x3e8   :  { %9243 = vst [vmem:[#allocation49_spill] sm:$0xff] %v6980_v49  ;;  %v3792_v14 = vunpack.i.h.bf16 %v3790_v21  ;;  %v3791_v60 = vunpack.i.l.bf16 %v3790_v21  ;;  %vm9248_vm15 = vmpackc.low %vm9245_vm11, %vm9247_vm10  ;;  %vm9257_vm11 = vcmp.lt.s32.totalorder %v4806_v56, 127  ;;  %vm9259_vm10 = vnez %v9258_v12 }
 0x3e9   :  { %2251 = vrot.lane.b32.xlu1 %v6762_v10, %s4077_s28  ;;  %3261 = vmatprep.subr.msk.bf16.mxu1 %vm9248_vm15, %v3260_v33  ;;  %v2202_v21 = vsel %vm9257_vm11, %v3816_v22, %v3817_v27  ;;  %vm9261_vm15 = vnez %v9260_v59  ;;  %vm9263_vm2 = vmmov %vm9250_vm5 }
 0x3ea   :  { %v2139_v35 = vsel %vm9250_vm5, %v3791_v60, %v3792_v14  ;;  %3264 = vmatpush1.bf16.msk.msra.mxu1 %vm9255_vm3, %v3263_v47  ;;  %vm9262_vm3 = vmpackc.low %vm9259_vm10, %vm9261_vm15  ;;  %v2076_v47 = vsel %vm9249_vm0, %v8380_v57, %v3786_v37  ;;  %v9264_v57 = vld [vmem:[#allocation71_spill] sm:$0xff] }
 0x3eb   :  { %v3240_v30 = vpack.c.bf16 %v2139_v35, %v2075_v40  ;;  %v7001_v29 = vpop.permute.xlu0 %3854  ;;  %v7003_v42 = vpop.permute.xlu1 %3799  ;;  %vm9265_vm14 = vnez %v9264_v57  ;;  %v9266_v40 = vld [vmem:[#allocation69_spill] sm:$0xff]  ;;  %vm9270_vm15 = vmmov %vm9249_vm0 }
 0x3ec   :  { %9256 = vst [vmem:[#allocation53_spill] sm:$0xff] %v7003_v42  ;;  %v8381_v33 = vunpack.i.l.bf16 %v7003_v42  ;;  %v3802_v38 = vunpack.i.h.bf16 %v7003_v42  ;;  %vm9267_vm11 = vnez %v9266_v40 }
 0x3ed   :  { %2379 = vrot.lane.b32.xlu1 %v6762_v10, %s4079_s30  ;;  %3241 = vmatprep.subr.msk.bf16.mxu0 %vm9262_vm3, %v3240_v30  ;;  %v3246_v30 = vpack.c.bf16 %v2202_v21, %v6756_v32  ;;  %vm9268_vm10 = vmpackc.low %vm9265_vm14, %vm9267_vm11  ;;  %v9272_v21 = vld [vmem:[#allocation77_spill] sm:$0xff] }
 0x3ee   :  { %v2140_v35 = vsel %vm9250_vm5, %v8381_v33, %v3791_v60  ;;  %v2138_v37 = vsel %vm9263_vm2, %v3792_v14, %v3802_v38  ;;  %v9269_v60 = vunpack.i.l.bf16 %v6921_v4  ;;  %vm9271_vm3 = vmmov %vm9263_vm2  ;;  %vm9273_vm0 = vnez %v9272_v21 }
 0x3ef   :  { %v3243_v10 = vpack.c.bf16 %v2140_v35, %v2076_v47  ;;  %v7026_v12 = vpop.permute.xlu0 %3864  ;;  %v7028_v59 = vpop.permute.xlu1 %3809  ;;  %vm9274_vm5 = vmmov %vm9270_vm15  ;;  %v8387_v35 = vunpack.i.l.bf16 %v6946_v46  ;;  %vm9277_vm2 = vnez %v9276_v0  ;;  %v3836_v0 = vunpack.i.l.bf16 %v6960_v41 }
 0x3f0   :  { %v8388_v58 = vunpack.i.l.bf16 %v7028_v59  ;;  %v2073_v47 = vsel %vm9270_vm15, %v3797_v11, %v9269_v60  ;;  %v2074_v14 = vsel %vm9274_vm5, %v3787_v55, %v3797_v11  ;;  %v3837_v11 = vunpack.i.h.bf16 %v6960_v41  ;;  %v9291_v41 = vld [vmem:[#allocation78_spill] sm:$0xff] }
 0x3f1   :  { %3244 = vmatpush1.bf16.msk.msra.mxu0 %vm9268_vm10, %v3243_v10  ;;  %v3269_v33 = vpack.c.bf16 %v2138_v37, %v2074_v14  ;;  %vm9281_vm10 = vcmp.lt.s32.totalorder %v4806_v56, 127  ;;  %v9283_v37 = vld [vmem:[#allocation75_spill] sm:$0xff] }
 0x3f2   :  { %v2137_v32 = vsel %vm9271_vm3, %v3802_v38, %v8388_v58  ;;  %3247 = vmatprep.subr.msk.bf16.mxu0 %vm9273_vm0, %v3246_v30  ;;  %v9278_v38 = vld [vmem:[#allocation72_spill] sm:$0xff]  ;;  %vm9282_vm15 = vmmov %vm9281_vm10  ;;  %vm9284_vm3 = vnez %v9283_v37 }
 0x3f3   :  { %v3266_v57 = vpack.c.bf16 %v2137_v32, %v2073_v47  ;;  %v7051_v40 = vpop.permute.xlu0 %3874  ;;  %v7053_v10 = vpop.permute.xlu1 %3819  ;;  %vm9279_vm14 = vnez %v9278_v38  ;;  %v9285_v47 = vld [vmem:[#allocation74_spill] sm:$0xff] }
 0x3f4   :  { %9275 = vst [vmem:[#allocation50_spill] sm:$0xff] %v7053_v10  ;;  %v3822_v60 = vunpack.i.h.bf16 %v7053_v10  ;;  %v8386_v42 = vunpack.i.l.bf16 %v7053_v10  ;;  %vm9280_vm11 = vmpackc.low %vm9277_vm2, %vm9279_vm14  ;;  %vm9286_vm0 = vnez %v9285_v47  ;;  %v9289_v47 = vld [vmem:[#allocation82_spill] sm:$0xff] }
 0x3f5   :  { %3267 = vmatprep.subr.msk.bf16.mxu1 %vm9280_vm11, %v3266_v57  ;;  %vm9287_vm5 = vmpackc.low %vm9284_vm3, %vm9286_vm0  ;;  %vm9290_vm14 = vnez %v9289_v47  ;;  %vm9292_vm11 = vnez %v9291_v41  ;;  %vm9296_vm3 = vcmp.lt.s32.totalorder %v4806_v56, 97 }
 0x3f6   :  { %v2200_v55 = vsel %vm9281_vm10, %v3822_v60, %v8387_v35  ;;  %v2201_v30 = vsel %vm9282_vm15, %v3817_v27, %v3822_v60  ;;  %3270 = vmatpush1.bf16.msk.msra.mxu1 %vm9287_vm5, %v3269_v33  ;;  %vm9288_vm2 = vmmov %vm9281_vm10  ;;  %vm9295_vm15 = vcmp.lt.s32.totalorder %v4806_v56, 96 }
 0x3f7   :  { %v3272_v32 = vpack.c.bf16 %v2200_v55, %v6771_v45  ;;  %v3275_v21 = vpack.c.bf16 %v2201_v30, %v6760_v39  ;;  %v2203_v14 = vsel %vm9288_vm2, %v8386_v42, %v3816_v22  ;;  %v7082_v57 = vpop.permute.xlu0 %3884  ;;  %v3830_v27 = vpop.permute.xlu1 %3829  ;;  %v9293_v45 = vld [vmem:[#allocation83_spill] sm:$0xff]  ;;  %v2330_v39 = vsel %vm9295_vm15, %v3836_v0, %v3837_v11 }
 0x3f8   :  { %v3249_v60 = vpack.c.bf16 %v2203_v14, %v6754_v48  ;;  %v3832_v38 = vunpack.i.h.bf16 %v3830_v27  ;;  %v3831_v37 = vunpack.i.l.bf16 %v3830_v27  ;;  %vm9294_vm10 = vnez %v9293_v45  ;;  %v9298_v14 = vld [vmem:[#allocation79_spill] sm:$0xff]  ;;  %v9300_v27 = vld [vmem:[#allocation84_spill] sm:$0xff] }
 0x3f9   :  { %3273 = vmatprep.subr.msk.bf16.mxu1 %vm9290_vm14, %v3272_v32  ;;  %v8385_v22 = vunpack.i.l.bf16 %v6980_v49  ;;  %vm9299_vm0 = vnez %v9298_v14  ;;  %vm9301_vm5 = vnez %v9300_v27  ;;  %vm9303_vm14 = vmmov %vm9295_vm15  ;;  %v3856_v45 = vunpack.i.l.bf16 %v7001_v29 }
 0x3fa   :  { %3250 = vmatpush1.bf16.msk.msra.mxu0 %vm9292_vm11, %v3249_v60  ;;  %3276 = vmatpush1.bf16.msk.msra.mxu1 %vm9294_vm10, %v3275_v21  ;;  %v2266_v33 = vsel %vm9296_vm3, %v3831_v37, %v3832_v38  ;;  %vm9302_vm2 = vmpackc.low %vm9299_vm0, %vm9301_vm5  ;;  %vm9306_vm10 = vcmp.lt.s32.totalorder %v4806_v56, 95 }
 0x3fb   :  { %v7096_v48 = vpop.permute.xlu0 %3894  ;;  %v7098_v55 = vpop.permute.xlu1 %3839  ;;  %v3252_v30 = vpack.c.bf16 %v2330_v39, %v2266_v33  ;;  %v2331_v21 = vsel %vm9303_vm14, %v8385_v22, %v3836_v0  ;;  %vm9304_vm11 = vmmov %vm9296_vm3  ;;  %v9309_v22 = vld [vmem:[#allocation85_spill] sm:$0xff] }
 0x3fc   :  { %9297 = vst [vmem:[#allocation57_spill] sm:$0xff] %v7098_v55  ;;  %v8384_v32 = vunpack.i.l.bf16 %v7098_v55  ;;  %v3842_v14 = vunpack.i.h.bf16 %v7098_v55  ;;  %vm9310_vm3 = vnez %v9309_v22 }
 0x3fd   :  { %3253 = vmatprep.subr.msk.bf16.mxu0 %vm9302_vm2, %v3252_v30  ;;  %v3857_v30 = vunpack.i.h.bf16 %v7001_v29  ;;  %vm9314_vm2 = vmmov %vm9306_vm10 }
 0x3fe   :  { %v2267_v60 = vsel %vm9304_vm11, %v8384_v32, %v3831_v37  ;;  %v9307_v32 = vld [vmem:[#allocation80_spill] sm:$0xff]  ;;  %vm9315_vm14 = vmmov %vm9314_vm2 }
 0x3ff   :  { %v7114_v47 = vpop.permute.xlu0 %3904  ;;  %v7116_v41 = vpop.permute.xlu1 %3849  ;;  %v3255_v39 = vpack.c.bf16 %v2331_v21, %v2267_v60  ;;  %vm9308_vm15 = vnez %v9307_v32  ;;  %v3847_v21 = vunpack.i.h.bf16 %v6980_v49  ;;  %v9312_v60 = vld [vmem:[#allocation90_spill] sm:$0xff]  ;;  %v2393_v22 = vsel %vm9315_vm14, %v3856_v45, %v3857_v30 }
 0x400   :  { %9305 = vst [vmem:[#allocation51_spill] sm:$0xff] %v7116_v41  ;;  %v3852_v33 = vunpack.i.h.bf16 %v7116_v41  ;;  %v8389_v0 = vunpack.i.l.bf16 %v7116_v41  ;;  %vm9311_vm0 = vmpackc.low %vm9308_vm15, %vm9310_vm3  ;;  %vm9313_vm5 = vnez %v9312_v60  ;;  %vm9324_vm14 = vnez %v8732_v43 }
 0x401   :  { %3256 = vmatpush1.bf16.msk.msra.mxu0 %vm9311_vm0, %v3255_v39  ;;  %v2265_v39 = vsel %vm9304_vm11, %v3832_v38, %v3842_v14  ;;  %vm9318_vm15 = vmmov %vm9304_vm11  ;;  %vm9325_vm11 = vnez %v8730_v9 }
 0x402   :  { %v2394_v37 = vsel %vm9306_vm10, %v3852_v33, %v3856_v45  ;;  %v2395_v42 = vsel %vm9314_vm2, %v8389_v0, %v3852_v33  ;;  %vm9317_vm10 = vcmp.lt.s32.totalorder %v4806_v56, 96  ;;  %v9319_v0 = vld [vmem:[#allocation88_spill] sm:$0xff]  ;;  %vm9323_vm2 = vnez %v8766_v25 }
 0x403   :  { %v2398_v29 = vsel %vm9313_vm5, %v2394_v37, 0.0  ;;  %v7138_v35 = vpop.permute.xlu0 %3914  ;;  %v7140_v58 = vpop.permute.xlu1 %3859  ;;  %v9316_v37 = vunpack.i.l.bf16 %v7026_v12  ;;  %vm9320_vm3 = vnez %v9319_v0  ;;  %vm9321_vm0 = vmmov %vm9317_vm10  ;;  %vm9322_vm5 = vcmask 1043456  }
 0x404   :  { %v3861_v32 = vunpack.i.l.bf16 %v7140_v58  ;;  %v2478_v27 = vpack.c.bf16 %v2398_v29, %v2398_v29  ;;  %v2397_v41 = vsel %vm9320_vm3, %v2395_v42, 0.0  ;;  %v2329_v45 = vsel %vm9321_vm0, %v3837_v11, %v3847_v21 }
 0x405   :  { %v2328_v60 = vsel %vm9317_vm10, %v3847_v21, %v9316_v37  ;;  %v3281_v49 = vpack.c.bf16 %v2329_v45, %v2265_v39  ;;  %v2399_v10 = vsel %vm9323_vm2, %v2393_v22, 0.0  ;;  %v2477_v0 = vpack.c.bf16 %v2397_v41, %v2397_v41  ;;  %vm9326_vm10 = vmpackc.low %vm9324_vm14, %vm9325_vm11 }
 0x406   :  { %v2264_v33 = vsel %vm9318_vm15, %v3842_v14, %v3861_v32  ;;  %3257 = vmatprep.subr.msk.bf16.mxu0 %vm9322_vm5, %v2478_v27  ;;  %v3782_v14 = vunpack.i.h.bf16 %v6962_v53  ;;  %v3876_v42 = vunpack.i.l.bf16 %v7051_v40  ;;  %vm9327_vm15 = vcmp.lt.s32.totalorder %v4806_v56, 95 }
 0x407   :  { %v3278_v55 = vpack.c.bf16 %v2328_v60, %v2264_v33  ;;  %v7160_v38 = vpop.permute.xlu0 %3924  ;;  %v7162_v29 = vpop.permute.xlu1 %3869  ;;  %vm9328_vm3 = vnez %v8739_v44  ;;  %vm9329_vm0 = vnez %v8737_v19  ;;  %v3777_v25 = vunpack.i.h.bf16 %v6948_v31  ;;  %v7192_v44 = vld [vmem:[%s7983_s6] sm:$0xf] }
 0x408   :  { %v3871_v37 = vunpack.i.l.bf16 %v7162_v29  ;;  %vm9330_vm5 = vmpackc.low %vm9328_vm3, %vm9329_vm0  ;;  %vm9331_vm2 = vnez %v8763_v17  ;;  %vm9332_vm14 = vcmask 1043456   ;;  %v2479_v27 = vpack.c.bf16 %v2399_v10, %v2399_v10 }
 0x409   :  { %3279 = vmatprep.subr.msk.bf16.mxu1 %vm9326_vm10, %v3278_v55  ;;  %v2497_v9 = vsel %vm9332_vm14, %v2477_v0, 0  ;;  %v9333_v19 = vunpack.i.l.bf16 %v6962_v53  ;;  %vm9334_vm11 = vcmp.lt.s32.totalorder %v4806_v56, 32  ;;  %vm9335_vm10 = vcmp.lt.s32.totalorder %v4806_v56, 33  ;;  %vm9339_vm0 = vmmov %vm9332_vm14 }
 0x40a   :  { %v2392_v11 = vsel %vm9327_vm15, %v3857_v30, %v3871_v37  ;;  %3282 = vmatpush1.bf16.msk.msra.mxu1 %vm9330_vm5, %v3281_v49  ;;  %2553 = vmatpush1.bf16.msra.mxu0 %v2497_v9  ;;  %v1943_v22 = vsel %vm9335_vm10, %v3777_v25, %v3876_v42  ;;  %v3886_v39 = vunpack.i.l.bf16 %v7082_v57  ;;  %vm9336_vm15 = vmmov %vm9334_vm11  ;;  %v9337_v60 = vunpack.i.l.bf16 %v6948_v31 }
 0x40b   :  { %v2400_v43 = vsel %vm9331_vm2, %v2392_v11, 0.0  ;;  %v7187_v55 = vpop.permute.xlu0 %3934  ;;  %v3880_v41 = vpop.permute.xlu1 %3879  ;;  %v2008_v49 = vsel %vm9334_vm11, %v9333_v19, %v3782_v14  ;;  %vm9338_vm3 = vmmov %vm9335_vm10  ;;  %v3877_v53 = vunpack.i.h.bf16 %v7051_v40  ;;  %vm9341_vm2 = vcmask 588800  }
 0x40c   :  { %v3881_v21 = vunpack.i.l.bf16 %v3880_v41  ;;  %v3882_v17 = vunpack.i.h.bf16 %v3880_v41  ;;  %v2480_v30 = vpack.c.bf16 %v2400_v43, %v2400_v43  ;;  %v1944_v33 = vsel %vm9338_vm3, %v9337_v60, %v3777_v25  ;;  %vm9340_vm5 = vmmov %vm9339_vm0  ;;  %v9344_v41 = vld [vmem:[#allocation89_spill] sm:$0xff] }
 0x40d   :  { %v2503_v43 = vsel %vm9340_vm5, %v2479_v27, 0  ;;  %3258 = vmatmul.mubr.msk.bf16.vlgmr.msra.gmra.mrb[16].mxu0 %vm9341_vm2, %v7192_v44  ;;  %v3812_v40 = vunpack.i.h.bf16 %v7028_v59  ;;  %v3896_v25 = vunpack.i.l.bf16 %v7096_v48  ;;  %vm9342_vm14 = vmmov %vm9334_vm11  ;;  %vm9343_vm11 = vnez %v8751_v13 }
 0x40e   :  { %v2007_v10 = vsel %vm9336_vm15, %v3782_v14, %v3881_v21  ;;  %3283 = vmatprep.subr.msk.bf16.mxu1 %vm9339_vm0, %v2480_v30  ;;  %v3289_v14 = vpack.c.bf16 %v2008_v49, %v1944_v33  ;;  %2658 = vmatprep.mubr.bf16.mxu0 %v8593_v63  ;;  %v2006_v9 = vsel %vm9342_vm14, %v3881_v21, %v3882_v17  ;;  %v3916_v19 = vunpack.i.l.bf16 %v7138_v35  ;;  %vm9347_vm0 = vmmov %vm9342_vm14  ;;  %v9348_v30 = vld [vmem:[#allocation92_spill] sm:$0xff]  ;;  %v9350_v21 = vld [vmem:[#allocation91_spill] sm:$0xff] }
 0x40f   :  { %v3286_v45 = vpack.c.bf16 %v2007_v10, %v1943_v22  ;;  %v7209_v0 = vpop.permute.xlu0 %3944  ;;  %v7211_v11 = vpop.permute.xlu1 %3889  ;;  %2594 = vmatpush1.bf16.msra.mxu1 %v2503_v43  ;;  %vm9345_vm10 = vnez %v9344_v41  ;;  %v1941_v27 = vsel %vm9338_vm3, %v3877_v53, %v3886_v39  ;;  %vm9349_vm5 = vnez %v9348_v30 }
 0x410   :  { %v3891_v31 = vunpack.i.l.bf16 %v7211_v11  ;;  %vm9346_vm15 = vmpackc.low %vm9343_vm11, %vm9345_vm10  ;;  %vm9351_vm2 = vnez %v9350_v21  ;;  %v3807_v13 = vunpack.i.h.bf16 %v6921_v4  ;;  %vm9354_vm10 = vcmask 588800  }
 0x411   :  { %3287 = vmatprep.subr.msk.bf16.mxu0 %vm9346_vm15, %v3286_v45  ;;  %vm9352_vm14 = vmpackc.low %vm9349_vm5, %vm9351_vm2  ;;  %vm9356_vm15 = vcmp.lt.s32.totalorder %v4806_v56, 1  ;;  %vm9359_vm5 = vnez %v8769_v20 }
 0x412   :  { %v2005_v49 = vsel %vm9347_vm0, %v3882_v17, %v3891_v31  ;;  %3290 = vmatpush1.bf16.msk.msra.mxu0 %vm9352_vm14, %v3289_v14  ;;  %vm9353_vm11 = vmmov %vm9338_vm3  ;;  %3284 = vmatmul.mubr.msk.bf16.vlgmr.msra.gmra.mrb[16].mxu1 %vm9354_vm10, %v7192_v44  ;;  %v3827_v17 = vunpack.i.h.bf16 %v6946_v46  ;;  %v9355_v14 = vunpack.i.l.bf16 %v7028_v59  ;;  %vm9357_vm3 = vcmp.lt.s32.totalorder %v4806_v56, 31 }
 0x413   :  { %v1942_v22 = vsel %vm9353_vm11, %v3876_v42, %v3877_v53  ;;  %v3312_v10 = vpack.c.bf16 %v2005_v49, %v1941_v27  ;;  %v7244_v60 = vpop.permute.xlu0 %3954  ;;  %v3900_v33 = vpop.permute.xlu1 %3899  ;;  %2699 = vmatprep.mubr.bf16.mxu1 %v8593_v63  ;;  %v2071_v42 = vsel %vm9357_vm3, %v3807_v13, %v3896_v25  ;;  %vm9358_vm0 = vnez %v8771_v52  ;;  %vm9362_vm11 = vmmov %vm9356_vm15 }
 0x414   :  { %v3315_v45 = vpack.c.bf16 %v2006_v9, %v1942_v22  ;;  %v3901_v43 = vunpack.i.l.bf16 %v3900_v33  ;;  %v2136_v41 = vsel %vm9356_vm15, %v9355_v14, %v3812_v40  ;;  %vm9360_vm2 = vmpackc.low %vm9358_vm0, %vm9359_vm5  ;;  %v3906_v53 = vunpack.i.l.bf16 %v7114_v47 }
 0x415   :  { %3313 = vmatprep.subr.msk.bf16.mxu1 %vm9360_vm2, %v3312_v10  ;;  %vm9361_vm14 = vcmp.lt.s32.totalorder %v4806_v56, 127  ;;  %v3902_v27 = vunpack.i.h.bf16 %v3900_v33  ;;  %vm9363_vm10 = vnez %v8775_v2  ;;  %vm9364_vm15 = vnez %v8773_v34 }
 0x416   :  { %v2198_v9 = vsel %vm9361_vm14, %v3827_v17, %v3916_v19  ;;  %v2135_v59 = vsel %vm9362_vm11, %v3812_v40, %v3901_v43  ;;  %vm9365_vm3 = vmpackc.low %vm9363_vm10, %vm9364_vm15  ;;  %v9366_v52 = vunpack.i.l.bf16 %v6921_v4  ;;  %vm9367_vm0 = vcmp.lt.s32.totalorder %v4806_v56, 31 }
 0x417   :  { %3316 = vmatpush1.bf16.msk.msra.mxu1 %vm9365_vm3, %v3315_v45  ;;  %v3292_v49 = vpack.c.bf16 %v2135_v59, %v2071_v42  ;;  %v7275_v30 = vpop.permute.xlu0 %3964  ;;  %v7277_v21 = vpop.permute.xlu1 %3909  ;;  %v9368_v22 = vunpack.i.l.bf16 %v6946_v46  ;;  %vm9369_vm5 = vmmov %vm9361_vm14  ;;  %v3897_v34 = vunpack.i.h.bf16 %v7096_v48  ;;  %v3298_v4 = vpack.c.bf16 %v2198_v9, %v6783_v16 }
 0x418   :  { %v2072_v20 = vsel %vm9367_vm0, %v9366_v52, %v3807_v13  ;;  %v3911_v10 = vunpack.i.l.bf16 %v7277_v21  ;;  %vm9370_vm2 = vnez %v8793_v26  ;;  %vm9371_vm14 = vnez %v8791_v28  ;;  %vm9373_vm10 = vmmov %vm9367_vm0  ;;  %v9376_v26 = vld [vmem:[#allocation94_spill] sm:$0xff]  ;;  %v9378_v28 = vld [vmem:[#allocation93_spill] sm:$0xff] }
 0x419   :  { %v2199_v40 = vsel %vm9369_vm5, %v9368_v22, %v3827_v17  ;;  %v3295_v2 = vpack.c.bf16 %v2136_v41, %v2072_v20  ;;  %vm9372_vm11 = vmpackc.low %vm9370_vm2, %vm9371_vm14  ;;  %v2069_v46 = vsel %vm9373_vm10, %v3897_v34, %v3906_v53  ;;  %v3917_v13 = vunpack.i.h.bf16 %v7138_v35  ;;  %v9390_v22 = vld [vmem:[#allocation97_spill] sm:$0xff] }
 0x41a   :  { %3293 = vmatprep.subr.msk.bf16.mxu0 %vm9372_vm11, %v3292_v49  ;;  %vm9374_vm15 = vcmp.lt.s32.totalorder %v4806_v56, 1  ;;  %vm9377_vm0 = vnez %v9376_v26  ;;  %vm9379_vm5 = vnez %v9378_v28  ;;  %v3301_v33 = vpack.c.bf16 %v2199_v40, %v6773_v51  ;;  %vm9381_vm14 = vmmov %vm9373_vm10  ;;  %v9384_v51 = vld [vmem:[#allocation95_spill] sm:$0xff] }
 0x41b   :  { %v2134_v48 = vsel %vm9374_vm15, %v3901_v43, %v3902_v27  ;;  %vm9375_vm3 = vmmov %vm9374_vm15  ;;  %v7308_v45 = vpop.permute.xlu0 %3974  ;;  %v7310_v35 = vpop.permute.xlu1 %3919  ;;  %v2070_v43 = vsel %vm9381_vm14, %v3896_v25, %v3897_v34  ;;  %v3872_v14 = vunpack.i.h.bf16 %v7162_v29  ;;  %v3936_v41 = vunpack.i.l.bf16 %v7187_v55 }
 0x41c   :  { %v2133_v16 = vsel %vm9375_vm3, %v3902_v27, %v3911_v10  ;;  %vm9380_vm2 = vmpackc.low %vm9377_vm0, %vm9379_vm5  ;;  %v3921_v42 = vunpack.i.l.bf16 %v7310_v35  ;;  %v3321_v9 = vpack.c.bf16 %v2134_v48, %v2070_v43  ;;  %v9382_v27 = vld [vmem:[#allocation96_spill] sm:$0xff]  ;;  %vm9385_vm10 = vnez %v9384_v51 }
 0x41d   :  { %3296 = vmatpush1.bf16.msk.msra.mxu0 %vm9380_vm2, %v3295_v2  ;;  %v3318_v17 = vpack.c.bf16 %v2133_v16, %v2069_v46  ;;  %vm9383_vm11 = vnez %v9382_v27  ;;  %vm9387_vm3 = vcmp.lt.s32.totalorder %v4806_v56, 127  ;;  %v3862_v59 = vunpack.i.h.bf16 %v7140_v58  ;;  %v9401_v58 = vld [vmem:[#allocation99_spill] sm:$0xff]  ;;  %v9412_v27 = vld [vmem:[#allocation101_spill] sm:$0xff]  ;;  %v9414_v51 = vld [vmem:[#allocation100_spill] sm:$0xff] }
 0x41e   :  { %3299 = vmatprep.subr.msk.bf16.mxu0 %vm5872_vm13, %v3298_v4  ;;  %vm9386_vm15 = vmpackc.low %vm9383_vm11, %vm9385_vm10  ;;  %v2197_v54 = vsel %vm9387_vm3, %v3916_v19, %v3917_v13  ;;  %v3926_v52 = vunpack.i.l.bf16 %v7160_v38  ;;  %vm9391_vm0 = vnez %v9390_v22  ;;  %v3867_v2 = vunpack.i.h.bf16 %v7026_v12 }
 0x41f   :  { %3319 = vmatprep.subr.msk.bf16.mxu1 %vm9386_vm15, %v3318_v17  ;;  %vm9388_vm13 = vmmov %vm9387_vm3  ;;  %v7340_v19 = vpop.permute.xlu0 %3984  ;;  %v3930_v40 = vpop.permute.xlu1 %3929  ;;  %vm9393_vm2 = vcmp.lt.s32.totalorder %v4806_v56, 95  ;;  %v3327_v4 = vpack.c.bf16 %v2197_v54, %v6810_v18  ;;  %v3937_v46 = vunpack.i.h.bf16 %v7187_v55  ;;  %vm9396_vm14 = vcmp.lt.s32.totalorder %v4806_v56, 97 }
 0x420   :  { %v2196_v25 = vsel %vm9388_vm13, %v3917_v13, %v3921_v42  ;;  %vm9392_vm5 = vmpackc.low %vm5725_vm1, %vm9391_vm0  ;;  %v2391_v15 = vsel %vm9393_vm2, %v3871_v37, %v3872_v14  ;;  %vm9395_vm1 = vnez %v8878_v24  ;;  %v2263_v13 = vsel %vm9396_vm14, %v3861_v32, %v3862_v59 }
 0x421   :  { %3302 = vmatpush1.bf16.msk.msra.mxu0 %vm5913_vm9, %v3301_v33  ;;  %v3324_v20 = vpack.c.bf16 %v2196_v25, %v6816_v61  ;;  %3322 = vmatpush1.bf16.msk.msra.mxu1 %vm9392_vm5, %v3321_v9  ;;  %vm9394_vm9 = vmmov %vm9393_vm2  ;;  %v3931_v61 = vunpack.i.l.bf16 %v3930_v40  ;;  %v3932_v29 = vunpack.i.h.bf16 %v3930_v40  ;;  %vm9398_vm10 = vnez %v8890_v62  ;;  %v9419_v25 = vld [vmem:[#allocation102_spill] sm:$0xff] }
 0x422   :  { %v2390_v34 = vsel %vm9394_vm9, %v3872_v14, %v3936_v41  ;;  %vm9397_vm11 = vmmov %vm9396_vm14  ;;  %vm9399_vm15 = vcmp.lt.s32.totalorder %v4806_v56, 96  ;;  %vm9400_vm3 = vnez %v8885_v36  ;;  %vm9402_vm13 = vnez %v9401_v58 }
 0x423   :  { %3325 = vmatprep.subr.msk.bf16.mxu1 %vm9395_vm1, %v3324_v20  ;;  %v2262_v37 = vsel %vm9397_vm11, %v3862_v59, %v3926_v52  ;;  %v2402_v48 = vsel %vm9398_vm10, %v2390_v34, 0.0  ;;  %v2326_v18 = vsel %vm9399_vm15, %v3867_v2, %v3931_v61  ;;  %v7365_v24 = vpop.permute.xlu0 %3994  ;;  %v7367_v55 = vpop.permute.xlu1 %3939  ;;  %v2401_v32 = vsel %vm9402_vm13, %v2391_v15, 0.0  ;;  %vm9404_vm0 = vmmov %vm9399_vm15 }
 0x424   :  { %v9403_v16 = vunpack.i.l.bf16 %v7026_v12  ;;  %v3927_v62 = vunpack.i.h.bf16 %v7160_v38  ;;  %v3304_v28 = vpack.c.bf16 %v2326_v18, %v2262_v37  ;;  %vm9405_vm5 = vmmov %vm9393_vm2  ;;  %v3946_v17 = vunpack.i.l.bf16 %v7209_v0 }
 0x425   :  { %3328 = vmatpush1.bf16.msk.msra.mxu1 %vm9400_vm3, %v3327_v4  ;;  %v2389_v36 = vsel %vm9405_vm5, %v3936_v41, %v3937_v46  ;;  %v3941_v43 = vunpack.i.l.bf16 %v7367_v55  ;;  %vm9406_vm2 = vmmov %vm9404_vm0  ;;  %vm9407_vm9 = vnez %v8860_v6  ;;  %vm9408_vm1 = vnez %v8858_v50  ;;  %v9429_v4 = vld [vmem:[#allocation105_spill] sm:$0xff] }
 0x426   :  { %v2327_v26 = vsel %vm9404_vm0, %v9403_v16, %v3867_v2  ;;  %v2325_v14 = vsel %vm9406_vm2, %v3931_v61, %v3932_v29  ;;  %vm9409_vm14 = vmpackc.low %vm9407_vm9, %vm9408_vm1  ;;  %v2482_v12 = vpack.c.bf16 %v2402_v48, %v2402_v48  ;;  %v2481_v38 = vpack.c.bf16 %v2401_v32, %v2401_v32  ;;  %v9422_v2 = vld [vmem:[#allocation104_spill] sm:$0xff]  ;;  %v9427_v61 = vld [vmem:[#allocation106_spill] sm:$0xff] }
 0x427   :  { %v3307_v33 = vpack.c.bf16 %v2327_v26, %v2263_v13  ;;  %3305 = vmatprep.subr.msk.bf16.mxu0 %vm9409_vm14, %v3304_v28  ;;  %vm9410_vm11 = vmmov %vm9404_vm0  ;;  %vm9411_vm10 = vcmp.lt.s32.totalorder %v4806_v56, 97  ;;  %vm9413_vm15 = vnez %v9412_v27  ;;  %vm9415_vm3 = vnez %v9414_v51  ;;  %v7400_v50 = vpop.permute.xlu0 %3999  ;;  %v7402_v6 = vpop.permute.xlu1 %3949  ;;  %v9432_v48 = vld [vmem:[#allocation103_spill] sm:$0xff]  ;;  %v9443_v27 = vld [vmem:[#allocation8_spill] sm:$0xff] }
 0x428   :  { %v2324_v41 = vsel %vm9410_vm11, %v3932_v29, %v3946_v17  ;;  %v2260_v9 = vsel %vm9411_vm10, %v3927_v62, %v3941_v43  ;;  %vm9416_vm13 = vmpackc.low %vm9413_vm15, %vm9415_vm3  ;;  %vm9418_vm5 = vcmask 1043456   ;;  %vm9420_vm2 = vnez %v9419_v25  ;;  %v9445_v51 = vld [vmem:[#allocation6_spill] sm:$0xff] }
 0x429   :  { %3308 = vmatpush1.bf16.msk.msra.mxu0 %vm9416_vm13, %v3307_v33  ;;  %vm9417_vm0 = vmmov %vm9411_vm10  ;;  %v3330_v59 = vpack.c.bf16 %v2324_v41, %v2260_v9  ;;  %v2403_v20 = vsel %vm9420_vm2, %v2389_v36, 0.0  ;;  %v3951_v22 = vunpack.i.l.bf16 %v7402_v6  ;;  %v3892_v40 = vunpack.i.h.bf16 %v7211_v11 }
 0x42a   :  { %v2261_v54 = vsel %vm9417_vm0, %v3926_v52, %v3927_v62  ;;  %3309 = vmatprep.subr.msk.bf16.mxu0 %vm9418_vm5, %v2482_v12  ;;  %vm9421_vm9 = vnez %v8909_v1  ;;  %vm9423_vm1 = vnez %v9422_v2  ;;  %vm9425_vm11 = vmmov %vm9418_vm5  ;;  %v3956_v52 = vunpack.i.l.bf16 %v7244_v60 }
 0x42b   :  { %v3333_v49 = vpack.c.bf16 %v2325_v14, %v2261_v54  ;;  %vm9424_vm14 = vmpackc.low %vm9421_vm9, %vm9423_vm1  ;;  %v2509_v15 = vsel %vm9425_vm11, %v2481_v38, 0  ;;  %vm9426_vm10 = vcmp.lt.s32.totalorder %v4806_v56, 95  ;;  %vm9428_vm15 = vnez %v9427_v61  ;;  %v7427_v1 = vpop.permute.xlu0 %4009  ;;  %v3960_v13 = vpop.permute.xlu1 %3959 }
 0x42c   :  { %3331 = vmatprep.subr.msk.bf16.mxu1 %vm9424_vm14, %v3330_v59  ;;  %v2388_v34 = vsel %vm9426_vm10, %v3937_v46, %v3951_v22  ;;  %vm9430_vm3 = vnez %v9429_v4  ;;  %v2483_v29 = vpack.c.bf16 %v2403_v20, %v2403_v20  ;;  %v3887_v37 = vunpack.i.h.bf16 %v7082_v57  ;;  %vm9438_vm14 = vmmov %vm9425_vm11  ;;  %v9455_v4 = vld [vmem:[#allocation11_spill] sm:$0xff] }
 0x42d   :  { %2635 = vmatpush1.bf16.msra.mxu0 %v2509_v15  ;;  %vm9431_vm13 = vmpackc.low %vm9428_vm15, %vm9430_vm3  ;;  %vm9433_vm0 = vnez %v9432_v48  ;;  %v3962_v58 = vunpack.i.h.bf16 %v3960_v13  ;;  %v3961_v32 = vunpack.i.l.bf16 %v3960_v13  ;;  %vm9434_vm5 = vcmp.lt.s32.totalorder %v4806_v56, 32  ;;  %v9457_v13 = vld [vmem:[#allocation10_spill] sm:$0xff]  ;;  %v9461_v48 = vld [vmem:[#allocation13_spill] sm:$0xff] }
 0x42e   :  { %3334 = vmatpush1.bf16.msk.msra.mxu1 %vm9431_vm13, %v3333_v49  ;;  %v2404_v18 = vsel %vm9433_vm0, %v2388_v34, 0.0  ;;  %v2004_v46 = vsel %vm9434_vm5, %v3891_v31, %v3892_v40  ;;  %v3966_v26 = vunpack.i.l.bf16 %v7275_v30  ;;  %vm9435_vm2 = vcmask 588800   ;;  %vm9437_vm1 = vmmov %vm9434_vm5  ;;  %v9449_v49 = vld [vmem:[#allocation9_spill] sm:$0xff] }
 0x42f   :  { %v2484_v16 = vpack.c.bf16 %v2404_v18, %v2404_v18  ;;  %v3957_v62 = vunpack.i.h.bf16 %v7244_v60  ;;  %vm9436_vm9 = vcmp.lt.s32.totalorder %v4806_v56, 33  ;;  %v2003_v33 = vsel %vm9437_vm1, %v3892_v40, %v3961_v32  ;;  %v7445_v36 = vpop.permute.xlu1 %3969  ;;  %vm9440_vm15 = vmmov %vm9437_vm1  ;;  %v7456_v41 = vpop.permute.xlu0 %2309  ;;  %v9451_v40 = vld [vmem:[#allocation7_spill] sm:$0xff]  ;;  %v9463_v18 = vld [vmem:[#allocation12_spill] sm:$0xff] }
 0x430   :  { %3310 = vmatmul.mubr.msk.bf16.vlgmr.msra.gmra.mrb[20].mxu0 %vm9435_vm2, %v7192_v44  ;;  %v1939_v28 = vsel %vm9436_vm9, %v3887_v37, %v3956_v52  ;;  %v2515_v11 = vsel %vm9425_vm11, %v2483_v29, 0  ;;  %vm9439_vm10 = vmmov %vm9436_vm9  ;;  %v3971_v14 = vunpack.i.l.bf16 %v7445_v36  ;;  %v2002_v38 = vsel %vm9440_vm15, %v3961_v32, %v3962_v58 }
 0x431   :  { %3335 = vmatprep.subr.msk.bf16.mxu1 %vm9438_vm14, %v2484_v16  ;;  %2740 = vmatprep.mubr.bf16.mxu0 %v8593_v63  ;;  %v1940_v31 = vsel %vm9439_vm10, %v3886_v39, %v3887_v37  ;;  %v3338_v60 = vpack.c.bf16 %v2003_v33, %v1939_v28  ;;  %vm9441_vm3 = vmmov %vm9436_vm9  ;;  %v3912_v57 = vunpack.i.h.bf16 %v7277_v21  ;;  %vm9444_vm0 = vnez %v9443_v27 }
 0x432   :  { %2676 = vmatpush1.bf16.msra.mxu1 %v2515_v11  ;;  %v3341_v12 = vpack.c.bf16 %v2004_v46, %v1940_v31  ;;  %v1937_v9 = vsel %vm9441_vm3, %v3957_v62, %v3966_v26  ;;  %vm9442_vm13 = vmmov %vm9437_vm1  ;;  %vm9446_vm5 = vnez %v9445_v51  ;;  %v3976_v59 = vunpack.i.l.bf16 %v7308_v45 }
 0x433   :  { %v2001_v39 = vsel %vm9442_vm13, %v3962_v58, %v3971_v14  ;;  %vm9447_vm2 = vmpackc.low %vm9444_vm0, %vm9446_vm5  ;;  %v3996_v25 = vunpack.i.l.bf16 %v7365_v24  ;;  %vm9450_vm1 = vnez %v9449_v49  ;;  %vm9452_vm14 = vnez %v9451_v40  ;;  %v3980_v2 = vpop.permute.xlu1 %3979  ;;  %v7505_v46 = vpop.permute.xlu0 %4014 }
 0x434   :  { %3339 = vmatprep.subr.msk.bf16.mxu0 %vm9447_vm2, %v3338_v60  ;;  %vm9448_vm9 = vmmov %vm9441_vm3  ;;  %v3364_v20 = vpack.c.bf16 %v2001_v39, %v1937_v9  ;;  %vm9454_vm10 = vcmask 588800   ;;  %v3907_v15 = vunpack.i.h.bf16 %v7114_v47  ;;  %v3981_v61 = vunpack.i.l.bf16 %v3980_v2  ;;  %v9472_v9 = vld [vmem:[#allocation18_spill] sm:$0xff] }
 0x435   :  { %v1938_v54 = vsel %vm9448_vm9, %v3956_v52, %v3957_v62  ;;  %vm9453_vm11 = vmpackc.low %vm9450_vm1, %vm9452_vm14  ;;  %3336 = vmatmul.mubr.msk.bf16.vlgmr.msra.gmra.mrb[20].mxu1 %vm9454_vm10, %v7192_v44  ;;  %v3922_v52 = vunpack.i.h.bf16 %v7310_v35  ;;  %vm9456_vm15 = vnez %v9455_v4  ;;  %vm9458_vm3 = vnez %v9457_v13  ;;  %v9489_v4 = vld [vmem:[#allocation20_spill] sm:$0xff] }
 0x436   :  { %3342 = vmatpush1.bf16.msk.msra.mxu0 %vm9453_vm11, %v3341_v12  ;;  %v3367_v34 = vpack.c.bf16 %v2002_v38, %v1938_v54  ;;  %2781 = vmatprep.mubr.bf16.mxu1 %v8593_v63  ;;  %vm9459_vm13 = vmpackc.low %vm9456_vm15, %vm9458_vm3  ;;  %vm9460_vm0 = vcmp.lt.s32.totalorder %v4806_v56, 1  ;;  %v3982_v37 = vunpack.i.h.bf16 %v3980_v2  ;;  %vm9462_vm5 = vnez %v9461_v48 }
 0x437   :  { %3365 = vmatprep.subr.msk.bf16.mxu1 %vm9459_vm13, %v3364_v20  ;;  %v2132_v29 = vsel %vm9460_vm0, %v3911_v10, %v3912_v57  ;;  %vm9464_vm2 = vnez %v9463_v18  ;;  %vm9466_vm1 = vcmp.lt.s32.totalorder %v4806_v56, 31  ;;  %v3986_v32 = vunpack.i.l.bf16 %v7340_v19  ;;  %vm9468_vm11 = vmmov %vm9460_vm0  ;;  %v7509_v10 = vpop.permute.xlu1 %3989 }
 0x438   :  { %vm9465_vm9 = vmpackc.low %vm9462_vm5, %vm9464_vm2  ;;  %v2067_v58 = vsel %vm9466_vm1, %v3907_v15, %v3976_v59  ;;  %vm9467_vm14 = vcmp.lt.s32.totalorder %v4806_v56, 127  ;;  %v2131_v21 = vsel %vm9468_vm11, %v3912_v57, %v3981_v61  ;;  %v3977_v28 = vunpack.i.h.bf16 %v7308_v45  ;;  %v9481_v57 = vld [vmem:[#allocation16_spill] sm:$0xff] }
 0x439   :  { %3368 = vmatpush1.bf16.msk.msra.mxu1 %vm9465_vm9, %v3367_v34  ;;  %v2194_v16 = vsel %vm9467_vm14, %v3922_v52, %v3996_v25  ;;  %vm9469_vm10 = vmmov %vm9466_vm1  ;;  %v3344_v33 = vpack.c.bf16 %v2131_v21, %v2067_v58  ;;  %v3991_v60 = vunpack.i.l.bf16 %v7509_v10  ;;  %v3997_v12 = vunpack.i.h.bf16 %v7365_v24  ;;  %v9479_v24 = vld [vmem:[#allocation19_spill] sm:$0xff] }
 0x43a   :  { %v2068_v62 = vsel %vm9469_vm10, %v3906_v53, %v3907_v15  ;;  %vm9470_vm15 = vmmov %vm9467_vm14  ;;  %v3350_v38 = vpack.c.bf16 %v2194_v16, %v6846_v8  ;;  %vm9473_vm13 = vnez %v9472_v9  ;;  %v9474_v53 = vld [vmem:[#allocation14_spill] sm:$0xff]  ;;  %v3952_v35 = vunpack.i.h.bf16 %v7402_v6  ;;  %v7554_v15 = vpop.permute.xlu0 %4024 }
 0x43b   :  { %v3347_v11 = vpack.c.bf16 %v2132_v29, %v2068_v62  ;;  %v2195_v31 = vsel %vm9470_vm15, %v3921_v42, %v3922_v52  ;;  %vm9471_vm3 = vmmov %vm9460_vm0  ;;  %vm9475_vm0 = vnez %v9474_v53  ;;  %v4011_v42 = vunpack.i.l.bf16 %v7427_v1  ;;  %v7545_v39 = vpop.permute.xlu1 %2181  ;;  %v9487_v52 = vld [vmem:[#allocation21_spill] sm:$0xff]  ;;  %v9494_v29 = vld [vmem:[#allocation4_spill] sm:$0xff] }
 0x43c   :  { %v2130_v47 = vsel %vm9471_vm3, %v3981_v61, %v3982_v37  ;;  %vm9476_vm5 = vmpackc.low %vm9473_vm13, %vm9475_vm0  ;;  %vm9482_vm14 = vnez %v9481_v57  ;;  %v3353_v51 = vpack.c.bf16 %v2195_v31, %v6818_v23  ;;  %v3942_v49 = vunpack.i.h.bf16 %v7367_v55  ;;  %v9501_v16 = vld [vmem:[#allocation2_spill] sm:$0xff]  ;;  %v9522_v57 = vld [vmem:[#allocation24_spill] sm:$0xff] }
 0x43d   :  { %3345 = vmatprep.subr.msk.bf16.mxu0 %vm9476_vm5, %v3344_v33  ;;  %vm9477_vm2 = vmmov %vm9466_vm1  ;;  %vm9480_vm1 = vnez %v9479_v24  ;;  %v4012_v40 = vunpack.i.h.bf16 %v7427_v1  ;;  %v2192_v34 = vsel %vm9470_vm15, %v3997_v12, %v7545_v39  ;;  %v4001_v23 = vunpack.i.l.bf16 %v7400_v50  ;;  %v9506_v33 = vld [vmem:[#allocation5_spill] sm:$0xff]  ;;  %v9520_v24 = vld [vmem:[#allocation28_spill] sm:$0xff] }
 0x43e   :  { %v2065_v45 = vsel %vm9477_vm2, %v3977_v28, %v3986_v32  ;;  %vm9478_vm9 = vmmov %vm9471_vm3  ;;  %v3376_v61 = vpack.c.bf16 %v2192_v34, %v6860_v7  ;;  %vm9490_vm13 = vnez %v9489_v4  ;;  %v3947_v1 = vunpack.i.h.bf16 %v7209_v0  ;;  %v9496_v7 = vld [vmem:[#allocation23_spill] sm:$0xff]  ;;  %v9533_v4 = vld [vmem:[#allocation26_spill] sm:$0xff] }
 0x43f   :  { %v2129_v8 = vsel %vm9478_vm9, %v3982_v37, %v3991_v60  ;;  %vm9483_vm11 = vmpackc.low %vm9480_vm1, %vm9482_vm14  ;;  %vm9492_vm5 = vcmp.lt.s32.totalorder %v4806_v56, 95  ;;  %vm9495_vm9 = vnez %v9494_v29  ;;  %vm9497_vm1 = vnez %v9496_v7  ;;  %v9498_v37 = vld [vmem:[#allocation22_spill] sm:$0xff]  ;;  %v4005_v48 = vpop.permute.xlu1 %4004  ;;  %v9539_v29 = vld [vmem:[#allocation27_spill] sm:$0xff] }
 0x440   :  { %3348 = vmatpush1.bf16.msk.msra.mxu0 %vm9483_vm11, %v3347_v11  ;;  %vm9484_vm10 = vmmov %vm9477_vm2  ;;  %v3370_v54 = vpack.c.bf16 %v2129_v8, %v2065_v45  ;;  %v2387_v13 = vsel %vm9492_vm5, %v3951_v22, %v3952_v35  ;;  %vm9499_vm14 = vnez %v9498_v37  ;;  %v4007_v18 = vunpack.i.h.bf16 %v4005_v48 }
 0x441   :  { %v2066_v27 = vsel %vm9484_vm10, %v3976_v59, %v3977_v28  ;;  %3351 = vmatprep.subr.msk.bf16.mxu0 %vm6221_vm7, %v3350_v38  ;;  %vm9486_vm3 = vmmov %vm9470_vm15  ;;  %vm9488_vm7 = vnez %v9487_v52  ;;  %v4006_v58 = vunpack.i.l.bf16 %v4005_v48  ;;  %vm9502_vm10 = vnez %v9501_v16  ;;  %v9531_v52 = vld [vmem:[#allocation30_spill] sm:$0xff]  ;;  %v9542_v48 = vld [vmem:[#allocation108_spill] sm:$0xff] }
 0x442   :  { %v3373_v2 = vpack.c.bf16 %v2130_v47, %v2066_v27  ;;  %v2193_v59 = vsel %vm9486_vm3, %v3996_v25, %v3997_v12  ;;  %vm9491_vm0 = vmpackc.low %vm9488_vm7, %vm9490_vm13  ;;  %vm9503_vm15 = vcmp.lt.s32.totalorder %v4806_v56, 97  ;;  %v4002_v21 = vunpack.i.h.bf16 %v7400_v50  ;;  %v7604_v50 = vpop.permute.xlu0 %4034  ;;  %v9513_v47 = vld [vmem:[#allocation3_spill] sm:$0xff] }
 0x443   :  { %3371 = vmatprep.subr.msk.bf16.mxu1 %vm9491_vm0, %v3370_v54  ;;  %vm9493_vm2 = vmmov %vm9492_vm5  ;;  %v3379_v6 = vpack.c.bf16 %v2193_v59, %v6854_v3  ;;  %v2259_v22 = vsel %vm9503_vm15, %v3941_v43, %v3942_v49  ;;  %vm9507_vm13 = vnez %v9506_v33  ;;  %vm9508_vm0 = vcmp.lt.s32.totalorder %v4806_v56, 96  ;;  %v9509_v3 = vld [vmem:[#allocation17_spill] sm:$0xff]  ;;  %v7610_v9 = vpop.permute.xlu1 %2245 }
 0x444   :  { %v2386_v25 = vsel %vm9493_vm2, %v3952_v35, %v4011_v42  ;;  %3354 = vmatpush1.bf16.msk.msra.mxu0 %vm9495_vm9, %v3353_v51  ;;  %vm9500_vm11 = vmpackc.low %vm9497_vm1, %vm9499_vm14  ;;  %v2322_v31 = vsel %vm9508_vm0, %v3947_v1, %v4006_v58  ;;  %vm9510_vm5 = vnez %v9509_v3  ;;  %vm9514_vm1 = vnez %v9513_v47 }
 0x445   :  { %3374 = vmatpush1.bf16.msk.msra.mxu1 %vm9500_vm11, %v3373_v2  ;;  %vm9504_vm3 = vmmov %vm9493_vm2  ;;  %v2406_v11 = vsel %vm9507_vm13, %v2386_v25, 0.0  ;;  %v2405_v55 = vsel %vm9510_vm5, %v2387_v13, 0.0  ;;  %v3967_v54 = vunpack.i.h.bf16 %v7275_v30  ;;  %v9527_v2 = vld [vmem:[#allocation25_spill] sm:$0xff]  ;;  %v3987_v34 = vunpack.i.h.bf16 %v7340_v19  ;;  %v9537_v25 = vld [vmem:[#allocation31_spill] sm:$0xff] }
 0x446   :  { %3377 = vmatprep.subr.msk.bf16.mxu1 %vm9502_vm10, %v3376_v61  ;;  %v2385_v62 = vsel %vm9504_vm3, %v4011_v42, %v4012_v40  ;;  %vm9505_vm7 = vmmov %vm9503_vm15  ;;  %vm9521_vm3 = vnez %v9520_v24  ;;  %v2486_v27 = vpack.c.bf16 %v2406_v11, %v2406_v11  ;;  %v2485_v51 = vpack.c.bf16 %v2405_v55, %v2405_v55  ;;  %v7653_v37 = vpop.permute.xlu0 %4039  ;;  %v9555_v11 = vld [vmem:[#allocation52_spill] sm:$0xff] }
 0x447   :  { %v2258_v28 = vsel %vm9505_vm7, %v3942_v49, %v4001_v23  ;;  %vm9511_vm2 = vmmov %vm9508_vm0  ;;  %v9525_v49 = vld [vmem:[#allocation29_spill] sm:$0xff]  ;;  %vm9528_vm5 = vnez %v9527_v2  ;;  %v3972_v59 = vunpack.i.h.bf16 %v7445_v36  ;;  %v7636_v61 = vpop.permute.xlu1 %2373  ;;  %v4016_v7 = vunpack.i.l.bf16 %v7505_v46  ;;  %v9574_v2 = vld [vmem:[#allocation34_spill] sm:$0xff] }
 0x448   :  { %v2323_v43 = vsel %vm9511_vm2, %v3946_v17, %v3947_v1  ;;  %vm9512_vm9 = vmmov %vm9508_vm0  ;;  %v3356_v38 = vpack.c.bf16 %v2322_v31, %v2258_v28  ;;  %v9517_v17 = vld [vmem:[#allocation107_spill] sm:$0xff]  ;;  %v4026_v19 = vunpack.i.l.bf16 %v7554_v15  ;;  %v9556_v31 = vunpack.i.l.bf16 %v9555_v11 }
 0x449   :  { %v2321_v12 = vsel %vm9512_vm9, %v4006_v58, %v4007_v18  ;;  %3380 = vmatpush1.bf16.msk.msra.mxu1 %vm9514_vm1, %v3379_v6  ;;  %v3359_v53 = vpack.c.bf16 %v2323_v43, %v2259_v22  ;;  %vm9515_vm14 = vmmov %vm9505_vm7  ;;  %vm9518_vm10 = vnez %v9517_v17  ;;  %vm9530_vm9 = vcmask 1043456  }
 0x44a   :  { %v2256_v45 = vsel %vm9515_vm14, %v4002_v21, %v7610_v9  ;;  %vm9516_vm11 = vmmov %vm9508_vm0  ;;  %v2407_v35 = vsel %vm9518_vm10, %v2385_v62, 0.0  ;;  %vm9526_vm0 = vnez %v9525_v49  ;;  %vm9532_vm1 = vnez %v9531_v52  ;;  %v9572_v49 = vld [vmem:[#allocation35_spill] sm:$0xff] }
 0x44b   :  { %v2320_v0 = vsel %vm9516_vm11, %v4007_v18, %v7456_v41  ;;  %vm9519_vm15 = vmmov %vm9505_vm7  ;;  %vm9523_vm7 = vnez %v9522_v57  ;;  %vm9534_vm14 = vnez %v9533_v4  ;;  %v2487_v1 = vpack.c.bf16 %v2407_v35, %v2407_v35  ;;  %v9582_v4 = vld [vmem:[#allocation37_spill] sm:$0xff] }
 0x44c   :  { %v2257_v42 = vsel %vm9519_vm15, %v4001_v23, %v4002_v21  ;;  %v3382_v8 = vpack.c.bf16 %v2320_v0, %v2256_v45  ;;  %vm9524_vm13 = vmpackc.low %vm9521_vm3, %vm9523_vm7  ;;  %v4017_v23 = vunpack.i.h.bf16 %v7505_v46  ;;  %vm9536_vm10 = vcmp.lt.s32.totalorder %v4806_v56, 95  ;;  %v4020_v21 = vpop.permute.xlu1 %4019  ;;  %v9560_v0 = vld [vmem:[#allocation113_spill] sm:$0xff] }
 0x44d   :  { %3357 = vmatprep.subr.msk.bf16.mxu0 %vm9524_vm13, %v3356_v38  ;;  %v3385_v20 = vpack.c.bf16 %v2321_v12, %v2257_v42  ;;  %vm9529_vm2 = vmpackc.low %vm9526_vm0, %vm9528_vm5  ;;  %v2384_v13 = vsel %vm9536_vm10, %v4012_v40, %v7636_v61  ;;  %vm9538_vm15 = vnez %v9537_v25  ;;  %vm9540_vm3 = vnez %v9539_v29  ;;  %v7696_v12 = vpop.permute.xlu0 %4049  ;;  %v9589_v25 = vld [vmem:[#allocation38_spill] sm:$0xff] }
 0x44e   :  { %3360 = vmatpush1.bf16.msk.msra.mxu0 %vm9529_vm2, %v3359_v53  ;;  %vm9535_vm11 = vmpackc.low %vm9532_vm1, %vm9534_vm14  ;;  %vm9543_vm13 = vnez %v9542_v48  ;;  %vm9545_vm5 = vcmp.lt.s32.totalorder %v4806_v56, 33  ;;  %vm9546_vm2 = vcmp.lt.s32.totalorder %v4806_v56, 31  ;;  %v9548_v22 = vunpack.i.l.bf16 %v6923_v5 }
 0x44f   :  { %3361 = vmatprep.subr.msk.bf16.mxu0 %vm9530_vm9, %v2486_v27  ;;  %3383 = vmatprep.subr.msk.bf16.mxu1 %vm9535_vm11, %v3382_v8  ;;  %vm9541_vm7 = vmpackc.low %vm9538_vm15, %vm9540_vm3  ;;  %v2408_v18 = vsel %vm9543_vm13, %v2384_v13, 0.0  ;;  %v1936_v40 = vsel %vm9545_vm5, %v3966_v26, %v3967_v54  ;;  %v2064_v6 = vsel %vm9546_vm2, %v3986_v32, %v3987_v34  ;;  %v4027_v62 = vunpack.i.h.bf16 %v7554_v15  ;;  %v9587_v13 = vld [vmem:[#allocation39_spill] sm:$0xff] }
 0x450   :  { %3386 = vmatpush1.bf16.msk.msra.mxu1 %vm9541_vm7, %v3385_v20  ;;  %vm9544_vm0 = vmmov %vm9530_vm9  ;;  %v2488_v16 = vpack.c.bf16 %v2408_v18, %v2408_v18  ;;  %vm9547_vm9 = vcmp.lt.s32.totalorder %v4806_v56, 32  ;;  %v4022_v28 = vunpack.i.h.bf16 %v4020_v21  ;;  %v4021_v33 = vunpack.i.l.bf16 %v4020_v21  ;;  %v4030_v45 = vpop.permute.xlu1 %4029  ;;  %v9569_v20 = vld [vmem:[#allocation32_spill] sm:$0xff] }
 0x451   :  { %v2521_v58 = vsel %vm9544_vm0, %v2485_v51, 0  ;;  %v2000_v46 = vsel %vm9547_vm9, %v3971_v14, %v3972_v59  ;;  %vm9549_vm1 = vmmov %vm9545_vm5  ;;  %v3992_v14 = vunpack.i.h.bf16 %v7509_v10  ;;  %v4037_v5 = vunpack.i.h.bf16 %v7604_v50 }
 0x452   :  { %2717 = vmatpush1.bf16.msra.mxu0 %v2521_v58  ;;  %v1933_v30 = vsel %vm9549_vm1, %v4017_v23, %v9548_v22  ;;  %vm9550_vm14 = vmmov %vm9544_vm0  ;;  %v4036_v32 = vunpack.i.l.bf16 %v7604_v50  ;;  %vm9553_vm15 = vcmask 588800   ;;  %v3393_v50 = vpack.c.bf16 %v2000_v46, %v1936_v40 }
 0x453   :  { %v2527_v26 = vsel %vm9550_vm14, %v2487_v1, 0  ;;  %vm9551_vm11 = vmmov %vm9544_vm0  ;;  %v9561_v17 = vunpack.i.l.bf16 %v9560_v0  ;;  %v2062_v42 = vsel %vm9546_vm2, %v4026_v19, %v4027_v62  ;;  %v4032_v8 = vunpack.i.h.bf16 %v4030_v45  ;;  %v9584_v1 = vld [vmem:[#allocation36_spill] sm:$0xff] }
 0x454   :  { %3387 = vmatprep.subr.msk.bf16.mxu1 %vm9551_vm11, %v2488_v16  ;;  %vm9552_vm10 = vmmov %vm9549_vm1  ;;  %v4031_v24 = vunpack.i.l.bf16 %v4030_v45  ;;  %vm9565_vm14 = vcmp.lt.s32.totalorder %v4806_v56, 1  ;;  %vm9566_vm11 = vcmp.lt.s32.totalorder %v4806_v56, 127  ;;  %v4052_v10 = vunpack.i.h.bf16 %v7696_v12  ;;  %v2188_v58 = vpop.permute.xlu1 %2187  ;;  %v9592_v16 = vld [vmem:[#allocation87_spill] sm:$0xff] }
 0x455   :  { %v1934_v36 = vsel %vm9552_vm10, %v4016_v7, %v4017_v23  ;;  %3362 = vmatmul.mubr.msk.bf16.vlgmr.msra.gmra.mrb[24].mxu0 %vm9553_vm15, %v7192_v44  ;;  %2758 = vmatpush1.bf16.msra.mxu1 %v2527_v26  ;;  %vm9554_vm3 = vmmov %vm9549_vm1  ;;  %v2128_v27 = vsel %vm9565_vm14, %v3991_v60, %v3992_v14  ;;  %v2190_v51 = vsel %vm9566_vm11, %v4036_v32, %v4037_v5  ;;  %v4051_v29 = vunpack.i.l.bf16 %v7696_v12 }
 0x456   :  { %v1935_v15 = vsel %vm9554_vm3, %v3967_v54, %v4016_v7  ;;  %vm9557_vm7 = vmmov %vm9547_vm9  ;;  %2822 = vmatprep.mubr.bf16.mxu0 %v8593_v63  ;;  %v9567_v54 = vld [vmem:[#allocation33_spill] sm:$0xff]  ;;  %v3399_v40 = vpack.c.bf16 %v2128_v27, %v2064_v6  ;;  %v3402_v46 = vpack.c.bf16 %v2190_v51, %v9592_v16  ;;  %v9634_v51 = vld [vmem:[#allocation68_spill] sm:$0xff] }
 0x457   :  { %v1997_v3 = vsel %vm9557_vm7, %v4022_v28, %v9556_v31  ;;  %vm9558_vm13 = vmmov %vm9557_vm7  ;;  %vm9568_vm10 = vnez %v9567_v54  ;;  %v9636_v54 = vld [vmem:[#allocation70_spill] sm:$0xff] }
 0x458   :  { %v1998_v55 = vsel %vm9558_vm13, %v4021_v33, %v4022_v28  ;;  %vm9559_vm0 = vmmov %vm9557_vm7  ;;  %v3416_v47 = vpack.c.bf16 %v1997_v3, %v1933_v30  ;;  %vm9573_vm7 = vnez %v9572_v49  ;;  %vm9575_vm13 = vnez %v9574_v2  ;;  %v9594_v30 = vld [vmem:[#allocation50_spill] sm:$0xff]  ;;  %v4045_v3 = vpop.permute.xlu1 %4044  ;;  %v9638_v2 = vld [vmem:[#allocation49_spill] sm:$0xff] }
 0x459   :  { %v1999_v43 = vsel %vm9559_vm0, %v3972_v59, %v4021_v33  ;;  %v3419_v53 = vpack.c.bf16 %v1998_v55, %v1934_v36  ;;  %vm9562_vm5 = vmmov %vm9546_vm2  ;;  %v9595_v21 = vunpack.i.l.bf16 %v9594_v30  ;;  %v9599_v33 = vld [vmem:[#allocation41_spill] sm:$0xff]  ;;  %v9601_v36 = vld [vmem:[#allocation40_spill] sm:$0xff]  ;;  %v4046_v45 = vunpack.i.l.bf16 %v4045_v3 }
 0x45a   :  { %v3390_v38 = vpack.c.bf16 %v1999_v43, %v1935_v15  ;;  %v2061_v35 = vsel %vm9562_vm5, %v4027_v62, %v9561_v17  ;;  %vm9563_vm9 = vmmov %vm9553_vm15  ;;  %vm9570_vm15 = vnez %v9569_v20  ;;  %v4042_v62 = vunpack.i.h.bf16 %v7653_v37  ;;  %v9615_v15 = vld [vmem:[#allocation46_spill] sm:$0xff]  ;;  %v9622_v43 = vld [vmem:[#allocation48_spill] sm:$0xff]  ;;  %v2316_v17 = vpop.permute.xlu0 %2315 }
 0x45b   :  { %3388 = vmatmul.mubr.msk.bf16.vlgmr.msra.gmra.mrb[24].mxu1 %vm9563_vm9, %v7192_v44  ;;  %vm9564_vm1 = vmmov %vm9546_vm2  ;;  %v9620_v55 = vld [vmem:[#allocation58_spill] sm:$0xff]  ;;  %v9661_v30 = vld [vmem:[#allocation51_spill] sm:$0xff] }
 0x45c   :  { %v2063_v57 = vsel %vm9564_vm1, %v3987_v34, %v4026_v19  ;;  %vm9571_vm3 = vmpackc.low %vm9568_vm10, %vm9570_vm15  ;;  %v9577_v34 = vld [vmem:[#allocation53_spill] sm:$0xff]  ;;  %vm9583_vm1 = vnez %v9582_v4  ;;  %vm9588_vm10 = vnez %v9587_v13  ;;  %vm9590_vm15 = vnez %v9589_v25  ;;  %2863 = vmatprep.mubr.bf16.mxu1 %v8593_v63  ;;  %v2252_v49 = vpop.permute.xlu1 %2251 }
 0x45d   :  { %3391 = vmatprep.subr.msk.bf16.mxu0 %vm9571_vm3, %v3390_v38  ;;  %vm9576_vm0 = vmpackc.low %vm9573_vm7, %vm9575_vm13  ;;  %v9578_v59 = vunpack.i.l.bf16 %v9577_v34  ;;  %vm9593_vm7 = vcmp.lt.s32.totalorder %v4806_v56, 127  ;;  %v4041_v19 = vunpack.i.l.bf16 %v7653_v37  ;;  %v9598_v63 = vld [vmem:[#allocation81_spill] sm:$0xff]  ;;  %v9610_v37 = vld [vmem:[#allocation44_spill] sm:$0xff]  ;;  %v9639_v34 = vunpack.i.l.bf16 %v9638_v2 }
 0x45e   :  { %3417 = vmatprep.subr.msk.bf16.mxu1 %vm9576_vm0, %v3416_v47  ;;  %vm9579_vm5 = vmmov %vm9565_vm14  ;;  %vm9585_vm14 = vnez %v9584_v1  ;;  %v2191_v22 = vsel %vm9593_vm7, %v7545_v39, %v4036_v32  ;;  %v9604_v39 = vld [vmem:[#allocation43_spill] sm:$0xff]  ;;  %v9625_v38 = vld [vmem:[#allocation112_spill] sm:$0xff] }
 0x45f   :  { %v2125_v60 = vsel %vm9579_vm5, %v4032_v8, %v9578_v59  ;;  %vm9580_vm2 = vmmov %vm9579_vm5  ;;  %vm9600_vm5 = vnez %v9599_v33 }
 0x460   :  { %v2126_v23 = vsel %vm9580_vm2, %v4031_v24, %v4032_v8  ;;  %vm9581_vm9 = vmmov %vm9580_vm2  ;;  %v3422_v48 = vpack.c.bf16 %v2125_v60, %v2061_v35  ;;  %vm9602_vm2 = vnez %v9601_v36  ;;  %v9628_v35 = vld [vmem:[#allocation76_spill] sm:$0xff]  ;;  %v9630_v8 = vld [vmem:[#allocation109_spill] sm:$0xff] }
 0x461   :  { %v2127_v52 = vsel %vm9581_vm9, %v3992_v14, %v4031_v24  ;;  %vm9586_vm11 = vmpackc.low %vm9583_vm1, %vm9585_vm14  ;;  %v3425_v18 = vpack.c.bf16 %v2126_v23, %v2062_v42  ;;  %vm9605_vm1 = vnez %v9604_v39  ;;  %v9606_v14 = vld [vmem:[#allocation42_spill] sm:$0xff]  ;;  %v9642_v23 = vld [vmem:[#allocation57_spill] sm:$0xff] }
 0x462   :  { %3394 = vmatpush1.bf16.msk.msra.mxu0 %vm9586_vm11, %v3393_v50  ;;  %vm9591_vm3 = vmpackc.low %vm9588_vm10, %vm9590_vm15  ;;  %v3396_v7 = vpack.c.bf16 %v2127_v52, %v2063_v57  ;;  %vm9607_vm14 = vnez %v9606_v14  ;;  %vm9611_vm10 = vnez %v9610_v37  ;;  %v9624_v50 = vld [vmem:[#allocation86_spill] sm:$0xff]  ;;  %v9643_v52 = vunpack.i.l.bf16 %v9642_v23 }
 0x463   :  { %3420 = vmatpush1.bf16.msk.msra.mxu1 %vm9591_vm3, %v3419_v53  ;;  %vm9596_vm13 = vmmov %vm9593_vm7  ;;  %v3405_v12 = vpack.c.bf16 %v2191_v22, %v9624_v50  ;;  %v4047_v53 = vunpack.i.h.bf16 %v4045_v3 }
 0x464   :  { %v2204_v26 = vsel %vm9596_vm13, %v2188_v58, %v9595_v21  ;;  %vm9597_vm0 = vmmov %vm9593_vm7  ;;  %vm9616_vm7 = vnez %v9615_v15  ;;  %v9662_v21 = vunpack.i.l.bf16 %v9661_v30 }
 0x465   :  { %v2189_v28 = vsel %vm9597_vm0, %v4037_v5, %v2188_v58  ;;  %v3428_v6 = vpack.c.bf16 %v2204_v26, %v9598_v63  ;;  %vm9603_vm9 = vmpackc.low %vm9600_vm5, %vm9602_vm2  ;;  %v9613_v5 = vld [vmem:[#allocation47_spill] sm:$0xff]  ;;  %vm9618_vm0 = vcmp.lt.s32.totalorder %v4806_v56, 95  ;;  %vm9621_vm2 = vnez %v9620_v55  ;;  %v9653_v58 = vld [vmem:[#allocation60_spill] sm:$0xff] }
 0x466   :  { %3397 = vmatprep.subr.msk.bf16.mxu0 %vm9603_vm9, %v3396_v7  ;;  %vm9608_vm11 = vmpackc.low %vm9605_vm1, %vm9607_vm14  ;;  %vm9614_vm3 = vnez %v9613_v5  ;;  %v2382_v11 = vsel %vm9618_vm0, %v4051_v29, %v4052_v10  ;;  %v3431_v47 = vpack.c.bf16 %v2189_v28, %v9625_v38  ;;  %vm9626_vm9 = vcmp.lt.s32.totalorder %v4806_v56, 97  ;;  %v9648_v7 = vld [vmem:[#allocation55_spill] sm:$0xff]  ;;  %v9668_v28 = vld [vmem:[#allocation110_spill] sm:$0xff] }
 0x467   :  { %3423 = vmatprep.subr.msk.bf16.mxu1 %vm9608_vm11, %v3422_v48  ;;  %vm9612_vm15 = vmpackc.low %vm9148_vm4, %vm9611_vm10  ;;  %vm9623_vm4 = vnez %v9622_v43  ;;  %v2254_v0 = vsel %vm9626_vm9, %v4041_v19, %v4042_v62  ;;  %vm9629_vm14 = vnez %v9628_v35  ;;  %vm9631_vm11 = vnez %v9630_v8 }
 0x468   :  { %3400 = vmatpush1.bf16.msk.msra.mxu0 %vm9612_vm15, %v3399_v40  ;;  %vm9617_vm13 = vmpackc.low %vm9614_vm3, %vm9616_vm7  ;;  %v2410_v42 = vsel %vm9629_vm14, %v2382_v11, 0.0  ;;  %vm9632_vm10 = vcmp.lt.s32.totalorder %v4806_v56, 96  ;;  %vm9635_vm3 = vnez %v9634_v51  ;;  %vm9637_vm7 = vnez %v9636_v54  ;;  %v2380_v40 = vpop.permute.xlu1 %2379 }
 0x469   :  { %3426 = vmatpush1.bf16.msk.msra.mxu1 %vm9617_vm13, %v3425_v18  ;;  %vm9619_vm5 = vmmov %vm9618_vm0  ;;  %3403 = vmatprep.subr.msk.bf16.mxu0 %vm9621_vm2, %v3402_v46  ;;  %v2318_v57 = vsel %vm9632_vm10, %v4046_v45, %v4047_v53  ;;  %v2490_v48 = vpack.c.bf16 %v2410_v42, %v2410_v42  ;;  %v9651_v18 = vld [vmem:[#allocation61_spill] sm:$0xff] }
 0x46a   :  { %v2383_v31 = vsel %vm9619_vm5, %v7636_v61, %v4051_v29  ;;  %3429 = vmatprep.subr.msk.bf16.mxu1 %vm9623_vm4, %v3428_v6  ;;  %vm9627_vm1 = vmmov %vm9626_vm9  ;;  %v9646_v29 = vld [vmem:[#allocation56_spill] sm:$0xff]  ;;  %vm9649_vm9 = vnez %v9648_v7  ;;  %vm9652_vm14 = vnez %v9651_v18  ;;  %v9670_v6 = vld [vmem:[#allocation111_spill] sm:$0xff] }
 0x46b   :  { %v2255_v61 = vsel %vm9627_vm1, %v7610_v9, %v4041_v19  ;;  %v2409_v24 = vsel %vm9631_vm11, %v2383_v31, 0.0  ;;  %vm9633_vm15 = vmmov %vm9632_vm10  ;;  %v3408_v9 = vpack.c.bf16 %v2318_v57, %v2254_v0  ;;  %vm9647_vm4 = vnez %v9646_v29  ;;  %v9665_v19 = vld [vmem:[#allocation66_spill] sm:$0xff] }
 0x46c   :  { %v2319_v27 = vsel %vm9633_vm15, %v7456_v41, %v4046_v45  ;;  %3406 = vmatpush1.bf16.msk.msra.mxu0 %vm9635_vm3, %v3405_v12  ;;  %vm9640_vm13 = vmmov %vm9632_vm10  ;;  %v2489_v1 = vpack.c.bf16 %v2409_v24, %v2409_v24  ;;  %vm9654_vm11 = vnez %v9653_v58  ;;  %vm9656_vm15 = vcmask 1043456  }
 0x46d   :  { %3432 = vmatpush1.bf16.msk.msra.mxu1 %vm9637_vm7, %v3431_v47  ;;  %v3411_v20 = vpack.c.bf16 %v2319_v27, %v2255_v61  ;;  %v2332_v59 = vsel %vm9640_vm13, %v2316_v17, %v9639_v34  ;;  %vm9641_vm0 = vmmov %vm9627_vm1  ;;  %vm9660_vm7 = vcmp.lt.s32.totalorder %v4806_v56, 95 }
 0x46e   :  { %v2253_v60 = vsel %vm9641_vm0, %v4042_v62, %v2252_v49  ;;  %vm9644_vm5 = vmmov %vm9641_vm0  ;;  %v2381_v22 = vsel %vm9660_vm7, %v4052_v10, %v2380_v40  ;;  %vm9666_vm0 = vnez %v9665_v19 }
 0x46f   :  { %v2268_v41 = vsel %vm9644_vm5, %v2252_v49, %v9643_v52  ;;  %vm9645_vm2 = vmmov %vm9632_vm10 }
 0x470   :  { %v2317_v4 = vsel %vm9645_vm2, %v4047_v53, %v2316_v17  ;;  %v3434_v13 = vpack.c.bf16 %v2332_v59, %v2268_v41  ;;  %vm9650_vm1 = vmpackc.low %vm9647_vm4, %vm9649_vm9  ;;  %vm9669_vm2 = vnez %v9668_v28 }
 0x471   :  { %v3437_v25 = vpack.c.bf16 %v2317_v4, %v2253_v60  ;;  %3409 = vmatprep.subr.msk.bf16.mxu0 %vm9650_vm1, %v3408_v9  ;;  %vm9655_vm10 = vmpackc.low %vm9652_vm14, %vm9654_vm11  ;;  %v2411_v63 = vsel %vm9669_vm2, %v2381_v22, 0.0  ;;  %vm9675_vm1 = vcmask 588800  }
 0x472   :  { %3412 = vmatpush1.bf16.msk.msra.mxu0 %vm9655_vm10, %v3411_v20  ;;  %vm9659_vm3 = vmpackc.low %vm9204_vm12, %vm9206_vm6  ;;  %vm9671_vm12 = vnez %v9670_v6  ;;  %v2491_v10 = vpack.c.bf16 %v2411_v63, %v2411_v63 }
 0x473   :  { %3413 = vmatprep.subr.msk.bf16.mxu0 %vm9656_vm15, %v2490_v48  ;;  %3435 = vmatprep.subr.msk.bf16.mxu1 %vm9659_vm3, %v3434_v13  ;;  %vm9663_vm13 = vmmov %vm9660_vm7 }
 0x474   :  { %v2396_v26 = vsel %vm9663_vm13, %v2380_v40, %v9662_v21  ;;  %vm9667_vm5 = vmpackc.low %vm9211_vm8, %vm9666_vm0 }
 0x475   :  { %3438 = vmatpush1.bf16.msk.msra.mxu1 %vm9667_vm5, %v3437_v25  ;;  %v2412_v33 = vsel %vm9671_vm12, %v2396_v26, 0.0  ;;  %vm9672_vm6 = vmmov %vm9656_vm15 }
 0x476   :  { %v2533_v36 = vsel %vm9672_vm6, %v2489_v1, 0  ;;  %v2492_v39 = vpack.c.bf16 %v2412_v33, %v2412_v33  ;;  %vm9673_vm4 = vmmov %vm9672_vm6 }
 0x477   :  { %2799 = vmatpush1.bf16.msra.mxu0 %v2533_v36  ;;  %vm9674_vm9 = vmmov %vm9673_vm4 }
 0x478   :  { %3439 = vmatprep.subr.msk.bf16.mxu1 %vm9673_vm4, %v2492_v39  ;;  %v2539_v56 = vsel %vm9674_vm9, %v2491_v10, 0  ;;  %vm9676_vm8 = vmmov %vm9675_vm1 }
 0x479   :  { %2840 = vmatpush1.bf16.msra.mxu1 %v2539_v56 }
 0x47a   :  { %3414 = vmatmul.mubr.msk.bf16.vlgmr.msra.gmra.mrb[28].mxu0 %vm9675_vm1, %v7192_v44 }
 0x47c   :  { %3440 = vmatmul.mubr.msk.bf16.vlgmr.msra.gmra.mrb[28].mxu1 %vm9676_vm8, %v7192_v44 }
 0x4e0   :  { %v7857_v14 = vpop.f32.mrb[16].mxu0 }
 0x4e1   :  { %v2890_v32 = vmul.f32 %v7857_v14, %v7857_v14  ;;  %v7861_v37 = vpop.f32.mrb[17].mxu0 }
 0x4e2   :  { %v2872_v5 = vadd.f32 %v7861_v37, %v7857_v14  ;;  %v2891_v15 = vmul.f32 %v7861_v37, %v7861_v37  ;;  %v2582_v11 = vpop.f32.mrb[18].mxu0 }
 0x4e3   :  { %v2583_v31 = vpop.f32.mrb[19].mxu0 }
 0x4e4   :  { %v2906_v3 = vadd.f32 %v2891_v15, %v2890_v32 }
 0x4e5   :  { %v7867_v55 = vpop.f32.mrb[16].mxu1 }
 0x4e6   :  { %v2873_v44 = vadd.f32 %v2872_v5, %v7867_v55  ;;  %v2892_v43 = vmul.f32 %v7867_v55, %v7867_v55  ;;  %v7872_v50 = vpop.f32.mrb[17].mxu1 }
 0x4e7   :  { %v2893_v12 = vmul.f32 %v7872_v50, %v7872_v50  ;;  %v2623_v38 = vpop.f32.mrb[18].mxu1 }
 0x4e8   :  { %v2907_v47 = vadd.f32 %v2906_v3, %v2892_v43  ;;  %v2874_v53 = vadd.f32 %v2873_v44, %v7872_v50  ;;  %v2624_v45 = vpop.f32.mrb[19].mxu1 }
 0x4ea   :  { %v2908_v0 = vadd.f32 %v2907_v47, %v2893_v12 }
 0x503   :  { %v7877_v61 = vpop.f32.mrb[20].mxu0 }
 0x504   :  { %v2875_v17 = vadd.f32 %v2874_v53, %v7877_v61  ;;  %v2894_v35 = vmul.f32 %v7877_v61, %v7877_v61  ;;  %v7882_v42 = vpop.f32.mrb[21].mxu0 }
 0x505   :  { %v2895_v8 = vmul.f32 %v7882_v42, %v7882_v42  ;;  %v2664_v24 = vpop.f32.mrb[22].mxu0 }
 0x506   :  { %v2909_v57 = vadd.f32 %v2908_v0, %v2894_v35  ;;  %v2876_v27 = vadd.f32 %v2875_v17, %v7882_v42  ;;  %v2665_v51 = vpop.f32.mrb[23].mxu0 }
 0x508   :  { %v2910_v54 = vadd.f32 %v2909_v57, %v2895_v8  ;;  %v7887_v9 = vpop.f32.mrb[20].mxu1 }
 0x509   :  { %v2877_v20 = vadd.f32 %v2876_v27, %v7887_v9  ;;  %v2896_v49 = vmul.f32 %v7887_v9, %v7887_v9  ;;  %v7892_v2 = vpop.f32.mrb[21].mxu1 }
 0x50a   :  { %v2897_v34 = vmul.f32 %v7892_v2, %v7892_v2  ;;  %v2705_v59 = vpop.f32.mrb[22].mxu1 }
 0x50b   :  { %v2911_v60 = vadd.f32 %v2910_v54, %v2896_v49  ;;  %v2878_v23 = vadd.f32 %v2877_v20, %v7892_v2  ;;  %v2706_v52 = vpop.f32.mrb[23].mxu1  ;;  %v1899_v54 = vld [vmem:[%s7984_s7] sm:$0xff] }
 0x50d   :  { %v2912_v41 = vadd.f32 %v2911_v60, %v2897_v34  ;;  %v1900_v34 = vld [vmem:[%s7985_s8] sm:$0xff] }
 0x528   :  { %v7897_v4 = vpop.f32.mrb[24].mxu0 }
 0x529   :  { %v2879_v1 = vadd.f32 %v2878_v23, %v7897_v4  ;;  %v2898_v13 = vmul.f32 %v7897_v4, %v7897_v4  ;;  %v7902_v25 = vpop.f32.mrb[25].mxu0 }
 0x52a   :  { %v2899_v29 = vmul.f32 %v7902_v25, %v7902_v25  ;;  %v2746_v7 = vpop.f32.mrb[26].mxu0 }
 0x52b   :  { %v2913_v48 = vadd.f32 %v2912_v41, %v2898_v13  ;;  %v2880_v18 = vadd.f32 %v2879_v1, %v7902_v25  ;;  %v2747_v40 = vpop.f32.mrb[27].mxu0 }
 0x52d   :  { %v2914_v22 = vadd.f32 %v2913_v48, %v2899_v29 }
 0x52e   :  { %v7907_v58 = vpop.f32.mrb[24].mxu1 }
 0x52f   :  { %v2900_v16 = vmul.f32 %v7907_v58, %v7907_v58  ;;  %v2785_v46 = vpop.f32.mrb[25].mxu1  ;;  %v2881_v30 = vadd.f32 %v2880_v18, %v7907_v58 }
 0x530   :  { %v2901_v21 = vmul.f32 %v2785_v46, %v2785_v46  ;;  %v2787_v26 = vpop.f32.mrb[26].mxu1 }
 0x531   :  { %v2788_v62 = vpop.f32.mrb[27].mxu1  ;;  %v2915_v19 = vadd.f32 %v2914_v22, %v2900_v16  ;;  %v2882_v28 = vadd.f32 %v2881_v30, %v2785_v46 }
 0x533   :  { %v2916_v63 = vadd.f32 %v2915_v19, %v2901_v21 }
 0x54d   :  { %v2824_v6 = vpop.f32.mrb[28].mxu0 }
 0x54e   :  { %v2883_v33 = vadd.f32 %v2882_v28, %v2824_v6  ;;  %v2902_v36 = vmul.f32 %v2824_v6, %v2824_v6  ;;  %v2826_v10 = vpop.f32.mrb[29].mxu0 }
 0x54f   :  { %v2903_v39 = vmul.f32 %v2826_v10, %v2826_v10  ;;  %v2828_v56 = vpop.f32.mrb[30].mxu0  ;;  %v2865_v11 = vpop.f32.mrb[28].mxu1 }
 0x550   :  { %v2917_v32 = vadd.f32 %v2916_v63, %v2902_v36  ;;  %v2884_v5 = vadd.f32 %v2883_v33, %v2826_v10  ;;  %v2829_v15 = vpop.f32.mrb[31].mxu0  ;;  %v2904_v31 = vmul.f32 %v2865_v11, %v2865_v11  ;;  %v2867_v3 = vpop.f32.mrb[29].mxu1 }
 0x551   :  { %v2869_v12 = vpop.f32.mrb[30].mxu1  ;;  %v2905_v45 = vmul.f32 %v2867_v3, %v2867_v3 }
 0x552   :  { %v2918_v44 = vadd.f32 %v2917_v32, %v2903_v39  ;;  %v2885_v43 = vadd.f32 %v2884_v5, %v2865_v11  ;;  %v2870_v38 = vpop.f32.mrb[31].mxu1 }
 0x554   :  { %v2919_v47 = vadd.f32 %v2918_v44, %v2904_v31  ;;  %v2886_v53 = vadd.f32 %v2885_v43, %v2867_v3 }
 0x556   :  { %2887 = vadd.xlane.f32.xlu0 %v2886_v53  ;;  %v2920_v0 = vadd.f32 %v2919_v47, %v2905_v45 }
 0x558   :  { %2921 = vadd.xlane.f32.xlu1 %v2920_v0 }
 0x5e3   :  { %v2888_v17 = vpop.xlane.xlu0 %2887 }
 0x5e4   :  { %v2889_v35 = vmul.f32 0.00048828125, %v2888_v17 }
 0x5e5   :  { %v2922_v8 = vpop.xlane.xlu1 %2921 }
 0x5e6   :  { %v2924_v24 = vmul.f32 %v2889_v35, %v2889_v35  ;;  %v2923_v57 = vmul.f32 0.00048828125, %v2922_v8 }
 0x5e8   :  { %v2925_v27 = vsub.f32 %v2923_v57, %v2924_v24 }
 0x5ea   :  { %v2926_v51 = vadd.f32 1e-05, %v2925_v27 }
 0x5ec   :  { %4055 = vrsqrt.f32 %v2926_v51 }
 0x5f6   :  { %v4056_v20 = vpop.eup %4055 }
 0x5f7   :  { %v2928_v49 = vmul.f32 %v4056_v20, %v1899_v54 }
 0x5f9   :  { %2933 = vperm.xlu0 %3751, %v2928_v49   ;;  %v2929_v59 = vmul.f32 %v2928_v49, %v2889_v35 }
 0x5fb   :  { %v2930_v60 = vsub.f32 %v1900_v34, %v2929_v59 }
 0x5fd   :  { %2954 = vperm.xlu1 %3752, %v2930_v60  }
 0x678   :  { %v2934_v23 = vpop.permute.xlu0 %2933 }
 0x679   :  { %v2936_v52 = vmul.f32 %v2934_v23, %v7857_v14  ;;  %v2937_v41 = vmul.f32 %v2934_v23, %v7861_v37  ;;  %v2938_v1 = vmul.f32 %v2934_v23, %v7867_v55  ;;  %v2939_v13 = vmul.f32 %v2934_v23, %v7872_v50 }
 0x67a   :  { %v2940_v29 = vmul.f32 %v2934_v23, %v7877_v61  ;;  %v2941_v7 = vmul.f32 %v2934_v23, %v7882_v42  ;;  %v2942_v48 = vmul.f32 %v2934_v23, %v7887_v9  ;;  %v2943_v18 = vmul.f32 %v2934_v23, %v7892_v2 }
 0x67b   :  { %v2944_v40 = vmul.f32 %v2934_v23, %v7897_v4  ;;  %v2945_v16 = vmul.f32 %v2934_v23, %v7902_v25  ;;  %v2946_v14 = vmul.f32 %v2934_v23, %v7907_v58  ;;  %v2947_v22 = vmul.f32 %v2934_v23, %v2785_v46 }
 0x67c   :  { %v2948_v37 = vmul.f32 %v2934_v23, %v2824_v6  ;;  %v2949_v30 = vmul.f32 %v2934_v23, %v2826_v10  ;;  %v2955_v55 = vpop.permute.xlu1 %2954  ;;  %v2950_v21 = vmul.f32 %v2934_v23, %v2865_v11  ;;  %v2951_v62 = vmul.f32 %v2934_v23, %v2867_v3 }
 0x67d   :  { %v2957_v50 = vadd.f32 %v2955_v55, %v2936_v52  ;;  %v2958_v26 = vadd.f32 %v2955_v55, %v2937_v41  ;;  %v2959_v61 = vadd.f32 %v2955_v55, %v2938_v1  ;;  %v2960_v42 = vadd.f32 %v2955_v55, %v2939_v13 }
 0x67e   :  { %v2961_v19 = vadd.f32 %v2955_v55, %v2940_v29  ;;  %v2962_v9 = vadd.f32 %v2955_v55, %v2941_v7  ;;  %v2963_v28 = vadd.f32 %v2955_v55, %v2942_v48  ;;  %v2964_v2 = vadd.f32 %v2955_v55, %v2943_v18 }
 0x67f   :  { %v2965_v63 = vadd.f32 %v2955_v55, %v2944_v40  ;;  %v2966_v4 = vadd.f32 %v2955_v55, %v2945_v16  ;;  %v2967_v33 = vadd.f32 %v2955_v55, %v2946_v14  ;;  %v2968_v25 = vadd.f32 %v2955_v55, %v2947_v22 }
 0x680   :  { %v2969_v36 = vadd.f32 %v2955_v55, %v2948_v37  ;;  %v2970_v58 = vadd.f32 %v2955_v55, %v2949_v30  ;;  %v2971_v46 = vadd.f32 %v2955_v55, %v2950_v21  ;;  %v2973_v6 = vmul.f32 0.2, %v2957_v50 }
 0x681   :  { %v2974_v10 = vmul.f32 0.2, %v2958_v26  ;;  %v2975_v39 = vmul.f32 0.2, %v2959_v61  ;;  %v2972_v56 = vadd.f32 %v2955_v55, %v2951_v62  ;;  %v2976_v32 = vmul.f32 0.2, %v2960_v42 }
 0x682   :  { %v2977_v5 = vmul.f32 0.2, %v2961_v19  ;;  %v2978_v15 = vmul.f32 0.2, %v2962_v9  ;;  %v2979_v11 = vmul.f32 0.2, %v2963_v28  ;;  %v2989_v44 = vmax.f32 %v2957_v50, %v2973_v6 }
 0x683   :  { %v2980_v31 = vmul.f32 0.2, %v2964_v2  ;;  %v2981_v3 = vmul.f32 0.2, %v2965_v63  ;;  %v2982_v43 = vmul.f32 0.2, %v2966_v4  ;;  %v2990_v47 = vmax.f32 %v2958_v26, %v2974_v10 }
 0x684   :  { %v2983_v12 = vmul.f32 0.2, %v2967_v33  ;;  %v2984_v38 = vmul.f32 0.2, %v2968_v25  ;;  %v2985_v53 = vmul.f32 0.2, %v2969_v36  ;;  %v2991_v17 = vmax.f32 %v2959_v61, %v2975_v39  ;;  %3005 = vst [vmem:[%s7986_s9] sm:$0xff] %v2989_v44 }
 0x685   :  { %v2986_v45 = vmul.f32 0.2, %v2970_v58  ;;  %v2987_v0 = vmul.f32 0.2, %v2971_v46  ;;  %v2988_v35 = vmul.f32 0.2, %v2972_v56  ;;  %v2992_v8 = vmax.f32 %v2960_v42, %v2976_v32 }
 0x686   :  { %v2993_v24 = vmax.f32 %v2961_v19, %v2977_v5  ;;  %v2994_v57 = vmax.f32 %v2962_v9, %v2978_v15  ;;  %3006 = vst [vmem:[%s7986_s9 + $0x8] sm:$0xff] %v2990_v47  ;;  %v2995_v27 = vmax.f32 %v2963_v28, %v2979_v11  ;;  %v2996_v51 = vmax.f32 %v2964_v2, %v2980_v31 }
 0x687   :  { %v2997_v54 = vmax.f32 %v2965_v63, %v2981_v3  ;;  %v2998_v20 = vmax.f32 %v2966_v4, %v2982_v43  ;;  %3007 = vst [vmem:[%s7986_s9 + $0x10] sm:$0xff] %v2991_v17  ;;  %v2999_v49 = vmax.f32 %v2967_v33, %v2983_v12  ;;  %v3000_v34 = vmax.f32 %v2968_v25, %v2984_v38 }
 0x688   :  { %v3001_v59 = vmax.f32 %v2969_v36, %v2985_v53  ;;  %v3002_v60 = vmax.f32 %v2970_v58, %v2986_v45  ;;  %3008 = vst [vmem:[%s7986_s9 + $0x18] sm:$0xff] %v2992_v8  ;;  %3009 = vst [vmem:[%s7986_s9 + $0x20] sm:$0xff] %v2993_v24  ;;  %v3003_v23 = vmax.f32 %v2971_v46, %v2987_v0 }
 0x689   :  { %3010 = vst [vmem:[%s7986_s9 + $0x28] sm:$0xff] %v2994_v57  ;;  %v3004_v52 = vmax.f32 %v2972_v56, %v2988_v35  ;;  %3011 = vst [vmem:[%s7986_s9 + $0x30] sm:$0xff] %v2995_v27 }
 0x68a   :  { %3012 = vst [vmem:[%s7986_s9 + $0x38] sm:$0xff] %v2996_v51  ;;  %3013 = vst [vmem:[%s7986_s9 + $0x40] sm:$0xff] %v2997_v54 }
 0x68b   :  { %3014 = vst [vmem:[%s7986_s9 + $0x48] sm:$0xff] %v2998_v20  ;;  %3015 = vst [vmem:[%s7986_s9 + $0x50] sm:$0xff] %v2999_v49 }
 0x68c   :  { %3016 = vst [vmem:[%s7986_s9 + $0x58] sm:$0xff] %v3000_v34  ;;  %3017 = vst [vmem:[%s7986_s9 + $0x60] sm:$0xff] %v3001_v59 }
 0x68d   :  { %3018 = vst [vmem:[%s7986_s9 + $0x68] sm:$0xff] %v3002_v60  ;;  %3019 = vst [vmem:[%s7986_s9 + $0x70] sm:$0xff] %v3003_v23 }
 0x68e   :  { %3020 = vst [vmem:[%s7986_s9 + $0x78] sm:$0xff] %v3004_v52 }

</bundles_post_ra>
